<compile_context>
chip_gen: v5e
topology: v5e:2x2
jax: 0.10.0
libtpu: 0.0.40
codegen_flags: <defaults>
</compile_context>

<pallas_src>
import functools
import math

import jax
import jax.numpy as jnp
from jax import lax
from jax.experimental import pallas as pl
from jax.experimental.pallas import tpu as pltpu


def _layernorm(x, gamma, beta, eps=1e-5):
    # PyTorch nn.LayerNorm: biased variance over the last dim, default eps=1e-5.
    mean = jnp.mean(x, axis=-1, keepdims=True)
    var = jnp.mean(jnp.square(x - mean), axis=-1, keepdims=True)
    return (x - mean) * lax.rsqrt(var + eps) * gamma + beta


def _multihead_kernel(x_ref, wq_ref, wk_ref, wv_ref, wp_ref,
                      g1_ref, be1_ref, w1_ref, b1_ref, w2_ref, b2_ref,
                      g2_ref, be2_ref, o_ref, *, n_heads, head_size):
    # x_ref: (T, E) f32
    # wq/wk/wv_ref: (E, H*Dh) bf16 (Wq pre-scaled by 1/sqrt(Dh))   wp_ref: (H*Dh, E) bf16
    # w1_ref: (E, 4E) bf16   w2_ref: (4E, E) bf16   biases / LN params: f32
    x = x_ref[...]                                     # (T, E) f32
    T, _ = x.shape
    x_bf = x.astype(jnp.bfloat16)

    # --- fused Q/K/V projections: three full-width (T,E)@(E,H*Dh) MXU matmuls ---
    q_all = jnp.dot(x_bf, wq_ref[...], preferred_element_type=jnp.float32)   # (T, HD)
    k_all = jnp.dot(x_bf, wk_ref[...], preferred_element_type=jnp.float32)   # (T, HD)
    v_all = jnp.dot(x_bf, wv_ref[...], preferred_element_type=jnp.float32)   # (T, HD)

    # Additive causal bias built once (0 where col <= row, -1e30 elsewhere).
    row = lax.broadcasted_iota(jnp.int32, (T, T), 0)
    col = lax.broadcasted_iota(jnp.int32, (T, T), 1)
    causal_bias = jnp.where(row >= col, 0.0, -1e30).astype(jnp.float32)

    # --- per-head causal softmax attention (heads unrolled; H small and static) ---
    heads = []
    for h in range(n_heads):
        sl = slice(h * head_size, (h + 1) * head_size)
        q = q_all[:, sl].astype(jnp.bfloat16)           # (T, Dh), scale already folded in
        k = k_all[:, sl].astype(jnp.bfloat16)
        v = v_all[:, sl].astype(jnp.bfloat16)

        s = lax.dot_general(q, k, (((1,), (1,)), ((), ())),
                            preferred_element_type=jnp.float32)              # (T, T) = q @ k^T
        s = s + causal_bias
        m = jnp.max(s, axis=-1, keepdims=True)
        p = jnp.exp(s - m)
        p = p * pl.reciprocal(jnp.sum(p, axis=-1, keepdims=True), approx=True)

        heads.append(jnp.dot(p.astype(jnp.bfloat16), v,
                             preferred_element_type=jnp.float32))             # (T, Dh)
    # TODO(synk): per-head nn.Dropout() is identity in eval mode; training-mode masks would
    #             use pltpu.prng_seed / pltpu.prng_random_bits.

    # Lane-dim concat (heads land in disjoint lane ranges) + ONE projection matmul.
    head_cat = jnp.concatenate(heads, axis=-1)                                # (T, H*Dh)
    attn = jnp.dot(head_cat.astype(jnp.bfloat16), wp_ref[...],
                   preferred_element_type=jnp.float32)                        # (T, E)

    # --- residual + LayerNorm1 ---
    y1 = _layernorm(x + attn, g1_ref[...], be1_ref[...])

    # --- FeedForward: Linear(E,4E) -> ReLU -> Linear(4E,E) -> Dropout(identity) ---
    h1 = jnp.dot(y1.astype(jnp.bfloat16), w1_ref[...],
                 preferred_element_type=jnp.float32) + b1_ref[...]
    h1 = jnp.maximum(h1, 0.0)
    f = jnp.dot(h1.astype(jnp.bfloat16), w2_ref[...],
                preferred_element_type=jnp.float32) + b2_ref[...]

    # --- second residual adds the ORIGINAL x (as in the module), then LayerNorm2 ---
    out = _layernorm(f + x, g2_ref[...], be2_ref[...])
    o_ref[...] = out.astype(o_ref.dtype)


@functools.partial(jax.jit, static_argnames=("n_heads", "head_size"))
def multihead_forward(x, params, *, n_heads, head_size):
    """x: (B, T, E) float32. Returns (B, T, E) float32."""
    B, T, E = x.shape
    Hf = 4 * E
    HD = n_heads * head_size
    scale = 1.0 / math.sqrt(head_size)

    bf = jnp.bfloat16
    # Merge heads into full-width matmul operands (columns [h*Dh:(h+1)*Dh] <-> head h).
    wq = (params["wq"] * scale).transpose(1, 0, 2).reshape(E, HD).astype(bf)  # (E, HD), pre-scaled
    wk = params["wk"].transpose(1, 0, 2).reshape(E, HD).astype(bf)            # (E, HD)
    wv = params["wv"].transpose(1, 0, 2).reshape(E, HD).astype(bf)            # (E, HD)
    wp = params["wp"].reshape(HD, E).astype(bf)                               # (HD, E)
    w1 = params["w1"].astype(bf)                                              # (E, 4E)
    w2 = params["w2"].astype(bf)                                              # (4E, E)
    g1 = params["g1"].reshape(1, E)
    be1 = params["be1"].reshape(1, E)
    b1 = params["b1"].reshape(1, Hf)
    b2 = params["b2"].reshape(1, E)
    g2 = params["g2"].reshape(1, E)
    be2 = params["be2"].reshape(1, E)

    weight_bytes = sum(int(a.size) * a.dtype.itemsize
                       for a in (wq, wk, wv, wp, w1, w2, g1, be1, b1, b2, g2, be2))

    # VMEM budget: double-buffered weights (constant index_map still gets default 2 buffers),
    # double-buffered x/out blocks, and f32 intermediates. Capped well under v7x's 64 MiB/TC.
    block_bytes = T * E * 4
    interm_bytes = (4 * T * HD + 2 * T * T + T * Hf + 6 * T * E) * 4
    vmem_budget = 2 * weight_bytes + 4 * block_bytes + interm_bytes
    vmem_limit = int(min(max(vmem_budget + (4 << 20), 16 << 20), 48 << 20))

    # Cost estimate (helps XLA schedule around the custom call).
    flops = int(B * (3 * 2 * T * E * HD        # fused q/k/v projections
                     + 2 * 2 * T * T * HD      # q@k^T and p@v over all heads
                     + 2 * T * HD * E          # output projection
                     + 2 * 2 * T * E * Hf))    # two FFN matmuls
    transc = int(B * (n_heads * T * T + n_heads * T + 2 * T))
    bytes_accessed = int(2 * B * T * E * 4 + weight_bytes)

    kernel = functools.partial(_multihead_kernel, n_heads=n_heads, head_size=head_size)

    out = pl.pallas_call(
        kernel,
        out_shape=jax.ShapeDtypeStruct((B, T, E), x.dtype),
        grid_spec=pltpu.PrefetchScalarGridSpec(
            num_scalar_prefetch=0,
            grid=(B,),
            in_specs=[
                pl.BlockSpec((None, T, E), lambda b: (b, 0, 0)),   # x (per-batch slab)
                pl.BlockSpec((E, HD), lambda b: (0, 0)),           # Wq (resident, pre-scaled)
                pl.BlockSpec((E, HD), lambda b: (0, 0)),           # Wk (resident)
                pl.BlockSpec((E, HD), lambda b: (0, 0)),           # Wv (resident)
                pl.BlockSpec((HD, E), lambda b: (0, 0)),           # Wproj (resident)
                pl.BlockSpec((1, E), lambda b: (0, 0)),            # ln1 gamma
                pl.BlockSpec((1, E), lambda b: (0, 0)),            # ln1 beta
                pl.BlockSpec((E, Hf), lambda b: (0, 0)),           # W1 (resident)
                pl.BlockSpec((1, Hf), lambda b: (0, 0)),           # b1
                pl.BlockSpec((Hf, E), lambda b: (0, 0)),           # W2 (resident)
                pl.BlockSpec((1, E), lambda b: (0, 0)),            # b2
                pl.BlockSpec((1, E), lambda b: (0, 0)),            # ln2 gamma
                pl.BlockSpec((1, E), lambda b: (0, 0)),            # ln2 beta
            ],
            out_specs=pl.BlockSpec((None, T, E), lambda b: (b, 0, 0)),
        ),
        compiler_params=pltpu.CompilerParams(
            dimension_semantics=("parallel",),
            vmem_limit_bytes=vmem_limit,
        ),
        cost_estimate=pl.CostEstimate(
            flops=flops, transcendentals=transc, bytes_accessed=bytes_accessed),
    )(x, wq, wk, wv, wp, g1, be1, w1, b1, w2, b2, g2, be2)
    return out


def init_params(key, embedding_size, n_heads, head_size):
    """Init matching nn.Linear / nn.LayerNorm defaults (weights stored as x @ W layout)."""
    E, H, Dh = embedding_size, n_heads, head_size
    Hf = 4 * E
    ks = jax.random.split(key, 8)
    bqkv = 1.0 / math.sqrt(E)
    bprj = 1.0 / math.sqrt(H * Dh)
    bff2 = 1.0 / math.sqrt(Hf)
    return dict(
        wq=jax.random.uniform(ks[0], (H, E, Dh), jnp.float32, -bqkv, bqkv),
        wk=jax.random.uniform(ks[1], (H, E, Dh), jnp.float32, -bqkv, bqkv),
        wv=jax.random.uniform(ks[2], (H, E, Dh), jnp.float32, -bqkv, bqkv),
        wp=jax.random.uniform(ks[3], (H, Dh, E), jnp.float32, -bprj, bprj),
        g1=jnp.ones((E,), jnp.float32), be1=jnp.zeros((E,), jnp.float32),
        w1=jax.random.uniform(ks[4], (E, Hf), jnp.float32, -bqkv, bqkv),
        b1=jax.random.uniform(ks[5], (Hf,), jnp.float32, -bqkv, bqkv),
        w2=jax.random.uniform(ks[6], (Hf, E), jnp.float32, -bff2, bff2),
        b2=jax.random.uniform(ks[7], (E,), jnp.float32, -bff2, bff2),
        g2=jnp.ones((E,), jnp.float32), be2=jnp.zeros((E,), jnp.float32),
    )


def multihead_ref(x, p, n_heads, head_size, use_bf16):
    """Pure-JAX reference. use_bf16=True mirrors the kernel's mixed precision (incl. pre-scaled Wq)."""
    cast = (lambda a: a.astype(jnp.bfloat16)) if use_bf16 else (lambda a: a)
    B, T, E = x.shape
    scale = 1.0 / math.sqrt(head_size)
    causal = jnp.tril(jnp.ones((T, T), dtype=bool))[None]
    x_c = cast(x)
    heads = []
    for h in range(n_heads):
        q = jnp.einsum("bte,ed->btd", x_c, cast(p["wq"][h] * scale),
                       preferred_element_type=jnp.float32)
        k = jnp.einsum("bte,ed->btd", x_c, cast(p["wk"][h]), preferred_element_type=jnp.float32)
        v = jnp.einsum("bte,ed->btd", x_c, cast(p["wv"][h]), preferred_element_type=jnp.float32)
        s = jnp.einsum("btd,bsd->bts", cast(q), cast(k), preferred_element_type=jnp.float32)
        s = jnp.where(causal, s, s - 1e30)
        m = jnp.max(s, axis=-1, keepdims=True)
        pr = jnp.exp(s - m)
        pr = pr / jnp.sum(pr, axis=-1, keepdims=True)
        heads.append(jnp.einsum("bts,bsd->btd", cast(pr), cast(v),
                                preferred_element_type=jnp.float32))
    attn = jnp.einsum("btd,de->bte", cast(jnp.concatenate(heads, axis=-1)),
                      cast(p["wp"].reshape(n_heads * head_size, E)),
                      preferred_element_type=jnp.float32)
    y1 = _layernorm(x + attn, p["g1"], p["be1"])
    h1 = jnp.maximum(jnp.einsum("bte,ef->btf", cast(y1), cast(p["w1"]),
                                preferred_element_type=jnp.float32) + p["b1"], 0.0)
    f = jnp.einsum("btf,fe->bte", cast(h1), cast(p["w2"]),
                   preferred_element_type=jnp.float32) + p["b2"]
    return _layernorm(f + x, p["g2"], p["be2"])


if __name__ == "__main__":
    key = jax.random.PRNGKey(0)
    k_x, k_p = jax.random.split(key)

    # batch=2, seq_len=128, embedding=128 (lane-dense), 4 heads of size 32.
    B, T, E = 2, 128, 128
    n_heads, head_size = 4, 32

    x = jax.random.normal(k_x, (B, T, E), jnp.float32)
    params = init_params(k_p, E, n_heads, head_size)

    out = multihead_forward(x, params, n_heads=n_heads, head_size=head_size)
    out = jax.block_until_ready(out)

    assert out.shape == x.shape and out.dtype == x.dtype

    # Check vs a JAX reference that uses the same bf16-input / f32-accumulate policy
    # (tolerance covers the in-kernel approx reciprocal in the softmax denominator).
    ref_mixed = multihead_ref(x, params, n_heads, head_size, use_bf16=True)
    assert jnp.allclose(out, ref_mixed, atol=1e-2, rtol=1e-2), "mismatch vs mixed-precision reference"

    # Loose sanity check vs the full-f32 reference (bf16 quantization tolerance).
    ref_f32 = multihead_ref(x, params, n_heads, head_size, use_bf16=False)
    assert jnp.allclose(out, ref_f32, atol=1e-1, rtol=1e-1), "mismatch vs f32 reference"

    print("KERNEL_OK")
</pallas_src>

<mosaic_0001>
module attributes {stable_mosaic.version = 11 : i64} {
  func.func @_multihead_kernel(%arg0: i32, %arg1: memref<1x128x128xf32, #tpu.memory_space<vmem>>, %arg2: memref<128x128xbf16, #tpu.memory_space<vmem>>, %arg3: memref<128x128xbf16, #tpu.memory_space<vmem>>, %arg4: memref<128x128xbf16, #tpu.memory_space<vmem>>, %arg5: memref<128x128xbf16, #tpu.memory_space<vmem>>, %arg6: memref<1x128xf32, #tpu.memory_space<vmem>>, %arg7: memref<1x128xf32, #tpu.memory_space<vmem>>, %arg8: memref<128x512xbf16, #tpu.memory_space<vmem>>, %arg9: memref<1x512xf32, #tpu.memory_space<vmem>>, %arg10: memref<512x128xbf16, #tpu.memory_space<vmem>>, %arg11: memref<1x128xf32, #tpu.memory_space<vmem>>, %arg12: memref<1x128xf32, #tpu.memory_space<vmem>>, %arg13: memref<1x128xf32, #tpu.memory_space<vmem>>, %arg14: memref<1x128x128xf32, #tpu.memory_space<vmem>>) attributes {dimension_semantics = [#tpu.dimension_semantics<parallel>], iteration_bounds = array<i64: 2>, scalar_prefetch = 0 : i64, scratch_operands = 0 : i64, tpu.core_type = #tpu.core_type<tc>, window_params = [{transform_indices = @transform_0, window_bounds = array<i64: 1, 128, 128>}, {pipeline_mode = #tpu.pipeline_mode<synchronous>, transform_indices = @transform_1, window_bounds = array<i64: 128, 128>}, {pipeline_mode = #tpu.pipeline_mode<synchronous>, transform_indices = @transform_2, window_bounds = array<i64: 128, 128>}, {pipeline_mode = #tpu.pipeline_mode<synchronous>, transform_indices = @transform_3, window_bounds = array<i64: 128, 128>}, {pipeline_mode = #tpu.pipeline_mode<synchronous>, transform_indices = @transform_4, window_bounds = array<i64: 128, 128>}, {pipeline_mode = #tpu.pipeline_mode<synchronous>, transform_indices = @transform_5, window_bounds = array<i64: 1, 128>}, {pipeline_mode = #tpu.pipeline_mode<synchronous>, transform_indices = @transform_6, window_bounds = array<i64: 1, 128>}, {pipeline_mode = #tpu.pipeline_mode<synchronous>, transform_indices = @transform_7, window_bounds = array<i64: 128, 512>}, {pipeline_mode = #tpu.pipeline_mode<synchronous>, transform_indices = @transform_8, window_bounds = array<i64: 1, 512>}, {pipeline_mode = #tpu.pipeline_mode<synchronous>, transform_indices = @transform_9, window_bounds = array<i64: 512, 128>}, {pipeline_mode = #tpu.pipeline_mode<synchronous>, transform_indices = @transform_10, window_bounds = array<i64: 1, 128>}, {pipeline_mode = #tpu.pipeline_mode<synchronous>, transform_indices = @transform_11, window_bounds = array<i64: 1, 128>}, {pipeline_mode = #tpu.pipeline_mode<synchronous>, transform_indices = @transform_12, window_bounds = array<i64: 1, 128>}, {transform_indices = @transform_13, window_bounds = array<i64: 1, 128, 128>}]} {
    %c0 = arith.constant 0 : index
    %c0_0 = arith.constant 0 : index
    %c0_1 = arith.constant 0 : index
    %0 = vector.load %arg1[%c0, %c0_0, %c0_1] : memref<1x128x128xf32, #tpu.memory_space<vmem>>, vector<1x128x128xf32>
    %1 = vector.shape_cast %0 : vector<1x128x128xf32> to vector<128x128xf32>
    %2 = arith.truncf %1 : vector<128x128xf32> to vector<128x128xbf16>
    %c0_2 = arith.constant 0 : index
    %c0_3 = arith.constant 0 : index
    %3 = vector.load %arg2[%c0_2, %c0_3] : memref<128x128xbf16, #tpu.memory_space<vmem>>, vector<128x128xbf16>
    %cst = arith.constant dense<0.000000e+00> : vector<128x128xf32>
    %4 = tpu.matmul %2, %3, %cst {dimension_numbers = #tpu.dot_dimension_numbers<[1], [0], [0], [1], [0, 0, 1, 1], [], []>} : vector<128x128xbf16>, vector<128x128xbf16>, vector<128x128xf32> -> vector<128x128xf32>
    %c0_4 = arith.constant 0 : index
    %c0_5 = arith.constant 0 : index
    %5 = vector.load %arg3[%c0_4, %c0_5] : memref<128x128xbf16, #tpu.memory_space<vmem>>, vector<128x128xbf16>
    %cst_6 = arith.constant dense<0.000000e+00> : vector<128x128xf32>
    %6 = tpu.matmul %2, %5, %cst_6 {dimension_numbers = #tpu.dot_dimension_numbers<[1], [0], [0], [1], [0, 0, 1, 1], [], []>} : vector<128x128xbf16>, vector<128x128xbf16>, vector<128x128xf32> -> vector<128x128xf32>
    %c0_7 = arith.constant 0 : index
    %c0_8 = arith.constant 0 : index
    %7 = vector.load %arg4[%c0_7, %c0_8] : memref<128x128xbf16, #tpu.memory_space<vmem>>, vector<128x128xbf16>
    %cst_9 = arith.constant dense<0.000000e+00> : vector<128x128xf32>
    %8 = tpu.matmul %2, %7, %cst_9 {dimension_numbers = #tpu.dot_dimension_numbers<[1], [0], [0], [1], [0, 0, 1, 1], [], []>} : vector<128x128xbf16>, vector<128x128xbf16>, vector<128x128xf32> -> vector<128x128xf32>
    %9 = tpu.iota {dimensions = array<i32: 0>} : vector<128x128xi32>
    %10 = tpu.iota {dimensions = array<i32: 1>} : vector<128x128xi32>
    %11 = arith.cmpi sge, %9, %10 : vector<128x128xi32>
    %cst_10 = arith.constant 0.000000e+00 : f32
    %cst_11 = arith.constant -1.000000e+30 : f32
    %12 = vector.broadcast %cst_10 : f32 to vector<128x128xf32>
    %13 = vector.broadcast %cst_11 : f32 to vector<128x128xf32>
    %14 = arith.select %11, %12, %13 : vector<128x128xi1>, vector<128x128xf32>
    %15 = vector.extract_strided_slice %4 {offsets = [0, 0], sizes = [128, 32], strides = [1, 1]} : vector<128x128xf32> to vector<128x32xf32>
    %16 = arith.truncf %15 : vector<128x32xf32> to vector<128x32xbf16>
    %17 = vector.extract_strided_slice %6 {offsets = [0, 0], sizes = [128, 32], strides = [1, 1]} : vector<128x128xf32> to vector<128x32xf32>
    %18 = arith.truncf %17 : vector<128x32xf32> to vector<128x32xbf16>
    %19 = vector.extract_strided_slice %8 {offsets = [0, 0], sizes = [128, 32], strides = [1, 1]} : vector<128x128xf32> to vector<128x32xf32>
    %20 = arith.truncf %19 : vector<128x32xf32> to vector<128x32xbf16>
    %cst_12 = arith.constant dense<0.000000e+00> : vector<128x128xf32>
    %21 = tpu.matmul %16, %18, %cst_12 {dimension_numbers = #tpu.dot_dimension_numbers<[1], [1], [0], [0], [0, 0, 1, 0], [], []>} : vector<128x32xbf16>, vector<128x32xbf16>, vector<128x128xf32> -> vector<128x128xf32>
    %22 = arith.addf %21, %14 : vector<128x128xf32>
    %cst_13 = arith.constant dense<0xFF800000> : vector<128xf32>
    %23 = vector.multi_reduction <maximumf>, %22, %cst_13 [1] : vector<128x128xf32> to vector<128xf32>
    %24 = vector.shape_cast %23 : vector<128xf32> to vector<128x1xf32>
    %25 = vector.broadcast %24 : vector<128x1xf32> to vector<128x128xf32>
    %26 = arith.subf %22, %25 : vector<128x128xf32>
    %27 = math.exp %26 : vector<128x128xf32>
    %cst_14 = arith.constant dense<0.000000e+00> : vector<128xf32>
    %28 = vector.multi_reduction <add>, %27, %cst_14 [1] : vector<128x128xf32> to vector<128xf32>
    %29 = vector.shape_cast %28 : vector<128xf32> to vector<128x1xf32>
    %30 = tpu.reciprocal %29 {approx = true} : vector<128x1xf32> -> vector<128x1xf32>
    %31 = vector.broadcast %30 : vector<128x1xf32> to vector<128x128xf32>
    %32 = arith.mulf %27, %31 : vector<128x128xf32>
    %33 = arith.truncf %32 : vector<128x128xf32> to vector<128x128xbf16>
    %cst_15 = arith.constant dense<0.000000e+00> : vector<128x32xf32>
    %34 = tpu.matmul %33, %20, %cst_15 {dimension_numbers = #tpu.dot_dimension_numbers<[1], [0], [0], [1], [0, 0, 1, 1], [], []>} : vector<128x128xbf16>, vector<128x32xbf16>, vector<128x32xf32> -> vector<128x32xf32>
    %35 = vector.extract_strided_slice %4 {offsets = [0, 32], sizes = [128, 32], strides = [1, 1]} : vector<128x128xf32> to vector<128x32xf32>
    %36 = arith.truncf %35 : vector<128x32xf32> to vector<128x32xbf16>
    %37 = vector.extract_strided_slice %6 {offsets = [0, 32], sizes = [128, 32], strides = [1, 1]} : vector<128x128xf32> to vector<128x32xf32>
    %38 = arith.truncf %37 : vector<128x32xf32> to vector<128x32xbf16>
    %39 = vector.extract_strided_slice %8 {offsets = [0, 32], sizes = [128, 32], strides = [1, 1]} : vector<128x128xf32> to vector<128x32xf32>
    %40 = arith.truncf %39 : vector<128x32xf32> to vector<128x32xbf16>
    %cst_16 = arith.constant dense<0.000000e+00> : vector<128x128xf32>
    %41 = tpu.matmul %36, %38, %cst_16 {dimension_numbers = #tpu.dot_dimension_numbers<[1], [1], [0], [0], [0, 0, 1, 0], [], []>} : vector<128x32xbf16>, vector<128x32xbf16>, vector<128x128xf32> -> vector<128x128xf32>
    %42 = arith.addf %41, %14 : vector<128x128xf32>
    %cst_17 = arith.constant dense<0xFF800000> : vector<128xf32>
    %43 = vector.multi_reduction <maximumf>, %42, %cst_17 [1] : vector<128x128xf32> to vector<128xf32>
    %44 = vector.shape_cast %43 : vector<128xf32> to vector<128x1xf32>
    %45 = vector.broadcast %44 : vector<128x1xf32> to vector<128x128xf32>
    %46 = arith.subf %42, %45 : vector<128x128xf32>
    %47 = math.exp %46 : vector<128x128xf32>
    %cst_18 = arith.constant dense<0.000000e+00> : vector<128xf32>
    %48 = vector.multi_reduction <add>, %47, %cst_18 [1] : vector<128x128xf32> to vector<128xf32>
    %49 = vector.shape_cast %48 : vector<128xf32> to vector<128x1xf32>
    %50 = tpu.reciprocal %49 {approx = true} : vector<128x1xf32> -> vector<128x1xf32>
    %51 = vector.broadcast %50 : vector<128x1xf32> to vector<128x128xf32>
    %52 = arith.mulf %47, %51 : vector<128x128xf32>
    %53 = arith.truncf %52 : vector<128x128xf32> to vector<128x128xbf16>
    %cst_19 = arith.constant dense<0.000000e+00> : vector<128x32xf32>
    %54 = tpu.matmul %53, %40, %cst_19 {dimension_numbers = #tpu.dot_dimension_numbers<[1], [0], [0], [1], [0, 0, 1, 1], [], []>} : vector<128x128xbf16>, vector<128x32xbf16>, vector<128x32xf32> -> vector<128x32xf32>
    %55 = vector.extract_strided_slice %4 {offsets = [0, 64], sizes = [128, 32], strides = [1, 1]} : vector<128x128xf32> to vector<128x32xf32>
    %56 = arith.truncf %55 : vector<128x32xf32> to vector<128x32xbf16>
    %57 = vector.extract_strided_slice %6 {offsets = [0, 64], sizes = [128, 32], strides = [1, 1]} : vector<128x128xf32> to vector<128x32xf32>
    %58 = arith.truncf %57 : vector<128x32xf32> to vector<128x32xbf16>
    %59 = vector.extract_strided_slice %8 {offsets = [0, 64], sizes = [128, 32], strides = [1, 1]} : vector<128x128xf32> to vector<128x32xf32>
    %60 = arith.truncf %59 : vector<128x32xf32> to vector<128x32xbf16>
    %cst_20 = arith.constant dense<0.000000e+00> : vector<128x128xf32>
    %61 = tpu.matmul %56, %58, %cst_20 {dimension_numbers = #tpu.dot_dimension_numbers<[1], [1], [0], [0], [0, 0, 1, 0], [], []>} : vector<128x32xbf16>, vector<128x32xbf16>, vector<128x128xf32> -> vector<128x128xf32>
    %62 = arith.addf %61, %14 : vector<128x128xf32>
    %cst_21 = arith.constant dense<0xFF800000> : vector<128xf32>
    %63 = vector.multi_reduction <maximumf>, %62, %cst_21 [1] : vector<128x128xf32> to vector<128xf32>
    %64 = vector.shape_cast %63 : vector<128xf32> to vector<128x1xf32>
    %65 = vector.broadcast %64 : vector<128x1xf32> to vector<128x128xf32>
    %66 = arith.subf %62, %65 : vector<128x128xf32>
    %67 = math.exp %66 : vector<128x128xf32>
    %cst_22 = arith.constant dense<0.000000e+00> : vector<128xf32>
    %68 = vector.multi_reduction <add>, %67, %cst_22 [1] : vector<128x128xf32> to vector<128xf32>
    %69 = vector.shape_cast %68 : vector<128xf32> to vector<128x1xf32>
    %70 = tpu.reciprocal %69 {approx = true} : vector<128x1xf32> -> vector<128x1xf32>
    %71 = vector.broadcast %70 : vector<128x1xf32> to vector<128x128xf32>
    %72 = arith.mulf %67, %71 : vector<128x128xf32>
    %73 = arith.truncf %72 : vector<128x128xf32> to vector<128x128xbf16>
    %cst_23 = arith.constant dense<0.000000e+00> : vector<128x32xf32>
    %74 = tpu.matmul %73, %60, %cst_23 {dimension_numbers = #tpu.dot_dimension_numbers<[1], [0], [0], [1], [0, 0, 1, 1], [], []>} : vector<128x128xbf16>, vector<128x32xbf16>, vector<128x32xf32> -> vector<128x32xf32>
    %75 = vector.extract_strided_slice %4 {offsets = [0, 96], sizes = [128, 32], strides = [1, 1]} : vector<128x128xf32> to vector<128x32xf32>
    %76 = arith.truncf %75 : vector<128x32xf32> to vector<128x32xbf16>
    %77 = vector.extract_strided_slice %6 {offsets = [0, 96], sizes = [128, 32], strides = [1, 1]} : vector<128x128xf32> to vector<128x32xf32>
    %78 = arith.truncf %77 : vector<128x32xf32> to vector<128x32xbf16>
    %79 = vector.extract_strided_slice %8 {offsets = [0, 96], sizes = [128, 32], strides = [1, 1]} : vector<128x128xf32> to vector<128x32xf32>
    %80 = arith.truncf %79 : vector<128x32xf32> to vector<128x32xbf16>
    %cst_24 = arith.constant dense<0.000000e+00> : vector<128x128xf32>
    %81 = tpu.matmul %76, %78, %cst_24 {dimension_numbers = #tpu.dot_dimension_numbers<[1], [1], [0], [0], [0, 0, 1, 0], [], []>} : vector<128x32xbf16>, vector<128x32xbf16>, vector<128x128xf32> -> vector<128x128xf32>
    %82 = arith.addf %81, %14 : vector<128x128xf32>
    %cst_25 = arith.constant dense<0xFF800000> : vector<128xf32>
    %83 = vector.multi_reduction <maximumf>, %82, %cst_25 [1] : vector<128x128xf32> to vector<128xf32>
    %84 = vector.shape_cast %83 : vector<128xf32> to vector<128x1xf32>
    %85 = vector.broadcast %84 : vector<128x1xf32> to vector<128x128xf32>
    %86 = arith.subf %82, %85 : vector<128x128xf32>
    %87 = math.exp %86 : vector<128x128xf32>
    %cst_26 = arith.constant dense<0.000000e+00> : vector<128xf32>
    %88 = vector.multi_reduction <add>, %87, %cst_26 [1] : vector<128x128xf32> to vector<128xf32>
    %89 = vector.shape_cast %88 : vector<128xf32> to vector<128x1xf32>
    %90 = tpu.reciprocal %89 {approx = true} : vector<128x1xf32> -> vector<128x1xf32>
    %91 = vector.broadcast %90 : vector<128x1xf32> to vector<128x128xf32>
    %92 = arith.mulf %87, %91 : vector<128x128xf32>
    %93 = arith.truncf %92 : vector<128x128xf32> to vector<128x128xbf16>
    %cst_27 = arith.constant dense<0.000000e+00> : vector<128x32xf32>
    %94 = tpu.matmul %93, %80, %cst_27 {dimension_numbers = #tpu.dot_dimension_numbers<[1], [0], [0], [1], [0, 0, 1, 1], [], []>} : vector<128x128xbf16>, vector<128x32xbf16>, vector<128x32xf32> -> vector<128x32xf32>
    %95 = tpu.concatenate %34, %54, %74, %94 in 1 : vector<128x32xf32>, vector<128x32xf32>, vector<128x32xf32>, vector<128x32xf32> -> vector<128x128xf32>
    %96 = arith.truncf %95 : vector<128x128xf32> to vector<128x128xbf16>
    %c0_28 = arith.constant 0 : index
    %c0_29 = arith.constant 0 : index
    %97 = vector.load %arg5[%c0_28, %c0_29] : memref<128x128xbf16, #tpu.memory_space<vmem>>, vector<128x128xbf16>
    %cst_30 = arith.constant dense<0.000000e+00> : vector<128x128xf32>
    %98 = tpu.matmul %96, %97, %cst_30 {dimension_numbers = #tpu.dot_dimension_numbers<[1], [0], [0], [1], [0, 0, 1, 1], [], []>} : vector<128x128xbf16>, vector<128x128xbf16>, vector<128x128xf32> -> vector<128x128xf32>
    %99 = arith.addf %1, %98 : vector<128x128xf32>
    %c0_31 = arith.constant 0 : index
    %c0_32 = arith.constant 0 : index
    %100 = vector.load %arg6[%c0_31, %c0_32] : memref<1x128xf32, #tpu.memory_space<vmem>>, vector<1x128xf32>
    %c0_33 = arith.constant 0 : index
    %c0_34 = arith.constant 0 : index
    %101 = vector.load %arg7[%c0_33, %c0_34] : memref<1x128xf32, #tpu.memory_space<vmem>>, vector<1x128xf32>
    %cst_35 = arith.constant dense<0.000000e+00> : vector<128xf32>
    %102 = vector.multi_reduction <add>, %99, %cst_35 [1] : vector<128x128xf32> to vector<128xf32>
    %103 = vector.shape_cast %102 : vector<128xf32> to vector<128x1xf32>
    %cst_36 = arith.constant 1.280000e+02 : f32
    %104 = vector.broadcast %cst_36 : f32 to vector<128x1xf32>
    %105 = arith.divf %103, %104 : vector<128x1xf32>
    %106 = vector.broadcast %105 : vector<128x1xf32> to vector<128x128xf32>
    %107 = arith.subf %99, %106 : vector<128x128xf32>
    %108 = arith.mulf %107, %107 : vector<128x128xf32>
    %cst_37 = arith.constant dense<0.000000e+00> : vector<128xf32>
    %109 = vector.multi_reduction <add>, %108, %cst_37 [1] : vector<128x128xf32> to vector<128xf32>
    %110 = vector.shape_cast %109 : vector<128xf32> to vector<128x1xf32>
    %cst_38 = arith.constant 1.280000e+02 : f32
    %111 = vector.broadcast %cst_38 : f32 to vector<128x1xf32>
    %112 = arith.divf %110, %111 : vector<128x1xf32>
    %113 = vector.broadcast %105 : vector<128x1xf32> to vector<128x128xf32>
    %114 = arith.subf %99, %113 : vector<128x128xf32>
    %cst_39 = arith.constant 9.99999974E-6 : f32
    %115 = vector.broadcast %cst_39 : f32 to vector<128x1xf32>
    %116 = arith.addf %112, %115 : vector<128x1xf32>
    %117 = math.rsqrt %116 : vector<128x1xf32>
    %118 = vector.broadcast %117 : vector<128x1xf32> to vector<128x128xf32>
    %119 = arith.mulf %114, %118 : vector<128x128xf32>
    %120 = vector.broadcast %100 : vector<1x128xf32> to vector<128x128xf32>
    %121 = arith.mulf %119, %120 : vector<128x128xf32>
    %122 = vector.broadcast %101 : vector<1x128xf32> to vector<128x128xf32>
    %123 = arith.addf %121, %122 : vector<128x128xf32>
    %124 = arith.truncf %123 : vector<128x128xf32> to vector<128x128xbf16>
    %c0_40 = arith.constant 0 : index
    %c0_41 = arith.constant 0 : index
    %125 = vector.load %arg8[%c0_40, %c0_41] : memref<128x512xbf16, #tpu.memory_space<vmem>>, vector<128x512xbf16>
    %cst_42 = arith.constant dense<0.000000e+00> : vector<128x512xf32>
    %126 = tpu.matmul %124, %125, %cst_42 {dimension_numbers = #tpu.dot_dimension_numbers<[1], [0], [0], [1], [0, 0, 1, 1], [], []>} : vector<128x128xbf16>, vector<128x512xbf16>, vector<128x512xf32> -> vector<128x512xf32>
    %c0_43 = arith.constant 0 : index
    %c0_44 = arith.constant 0 : index
    %127 = vector.load %arg9[%c0_43, %c0_44] : memref<1x512xf32, #tpu.memory_space<vmem>>, vector<1x512xf32>
    %128 = vector.broadcast %127 : vector<1x512xf32> to vector<128x512xf32>
    %129 = arith.addf %126, %128 : vector<128x512xf32>
    %cst_45 = arith.constant 0.000000e+00 : f32
    %130 = vector.broadcast %cst_45 : f32 to vector<128x512xf32>
    %131 = arith.maximumf %129, %130 : vector<128x512xf32>
    %132 = arith.truncf %131 : vector<128x512xf32> to vector<128x512xbf16>
    %c0_46 = arith.constant 0 : index
    %c0_47 = arith.constant 0 : index
    %133 = vector.load %arg10[%c0_46, %c0_47] : memref<512x128xbf16, #tpu.memory_space<vmem>>, vector<512x128xbf16>
    %cst_48 = arith.constant dense<0.000000e+00> : vector<128x128xf32>
    %134 = tpu.matmul %132, %133, %cst_48 {dimension_numbers = #tpu.dot_dimension_numbers<[1], [0], [0], [1], [0, 0, 1, 1], [], []>} : vector<128x512xbf16>, vector<512x128xbf16>, vector<128x128xf32> -> vector<128x128xf32>
    %c0_49 = arith.constant 0 : index
    %c0_50 = arith.constant 0 : index
    %135 = vector.load %arg11[%c0_49, %c0_50] : memref<1x128xf32, #tpu.memory_space<vmem>>, vector<1x128xf32>
    %136 = vector.broadcast %135 : vector<1x128xf32> to vector<128x128xf32>
    %137 = arith.addf %134, %136 : vector<128x128xf32>
    %138 = arith.addf %137, %1 : vector<128x128xf32>
    %c0_51 = arith.constant 0 : index
    %c0_52 = arith.constant 0 : index
    %139 = vector.load %arg12[%c0_51, %c0_52] : memref<1x128xf32, #tpu.memory_space<vmem>>, vector<1x128xf32>
    %c0_53 = arith.constant 0 : index
    %c0_54 = arith.constant 0 : index
    %140 = vector.load %arg13[%c0_53, %c0_54] : memref<1x128xf32, #tpu.memory_space<vmem>>, vector<1x128xf32>
    %cst_55 = arith.constant dense<0.000000e+00> : vector<128xf32>
    %141 = vector.multi_reduction <add>, %138, %cst_55 [1] : vector<128x128xf32> to vector<128xf32>
    %142 = vector.shape_cast %141 : vector<128xf32> to vector<128x1xf32>
    %cst_56 = arith.constant 1.280000e+02 : f32
    %143 = vector.broadcast %cst_56 : f32 to vector<128x1xf32>
    %144 = arith.divf %142, %143 : vector<128x1xf32>
    %145 = vector.broadcast %144 : vector<128x1xf32> to vector<128x128xf32>
    %146 = arith.subf %138, %145 : vector<128x128xf32>
    %147 = arith.mulf %146, %146 : vector<128x128xf32>
    %cst_57 = arith.constant dense<0.000000e+00> : vector<128xf32>
    %148 = vector.multi_reduction <add>, %147, %cst_57 [1] : vector<128x128xf32> to vector<128xf32>
    %149 = vector.shape_cast %148 : vector<128xf32> to vector<128x1xf32>
    %cst_58 = arith.constant 1.280000e+02 : f32
    %150 = vector.broadcast %cst_58 : f32 to vector<128x1xf32>
    %151 = arith.divf %149, %150 : vector<128x1xf32>
    %152 = vector.broadcast %144 : vector<128x1xf32> to vector<128x128xf32>
    %153 = arith.subf %138, %152 : vector<128x128xf32>
    %cst_59 = arith.constant 9.99999974E-6 : f32
    %154 = vector.broadcast %cst_59 : f32 to vector<128x1xf32>
    %155 = arith.addf %151, %154 : vector<128x1xf32>
    %156 = math.rsqrt %155 : vector<128x1xf32>
    %157 = vector.broadcast %156 : vector<128x1xf32> to vector<128x128xf32>
    %158 = arith.mulf %153, %157 : vector<128x128xf32>
    %159 = vector.broadcast %139 : vector<1x128xf32> to vector<128x128xf32>
    %160 = arith.mulf %158, %159 : vector<128x128xf32>
    %161 = vector.broadcast %140 : vector<1x128xf32> to vector<128x128xf32>
    %162 = arith.addf %160, %161 : vector<128x128xf32>
    %c0_60 = arith.constant 0 : index
    %c0_61 = arith.constant 0 : index
    %c0_62 = arith.constant 0 : index
    %163 = vector.load %arg14[%c0_60, %c0_61, %c0_62] : memref<1x128x128xf32, #tpu.memory_space<vmem>>, vector<1x128x128xf32>
    %164 = vector.shape_cast %163 : vector<1x128x128xf32> to vector<128x128xf32>
    %165 = vector.shape_cast %162 : vector<128x128xf32> to vector<1x128x128xf32>
    tpu.vector_store %arg14[%c0_60, %c0_61, %c0_62], %165 {strides = array<i32>} : memref<1x128x128xf32, #tpu.memory_space<vmem>>, vector<1x128x128xf32>,
    return
  }
  func.func @transform_0(%arg0: i32) -> (i32, i32, i32) {
    %c0_i32 = arith.constant 0 : i32
    %c0_i32_0 = arith.constant 0 : i32
    %c0_i32_1 = arith.constant 0 : i32
    return %arg0, %c0_i32, %c0_i32_0 : i32, i32, i32
  }
  func.func @transform_1(%arg0: i32) -> (i32, i32) {
    %c0_i32 = arith.constant 0 : i32
    %c0_i32_0 = arith.constant 0 : i32
    %c0_i32_1 = arith.constant 0 : i32
    return %c0_i32, %c0_i32_0 : i32, i32
  }
  func.func @transform_2(%arg0: i32) -> (i32, i32) {
    %c0_i32 = arith.constant 0 : i32
    %c0_i32_0 = arith.constant 0 : i32
    %c0_i32_1 = arith.constant 0 : i32
    return %c0_i32, %c0_i32_0 : i32, i32
  }
  func.func @transform_3(%arg0: i32) -> (i32, i32) {
    %c0_i32 = arith.constant 0 : i32
    %c0_i32_0 = arith.constant 0 : i32
    %c0_i32_1 = arith.constant 0 : i32
    return %c0_i32, %c0_i32_0 : i32, i32
  }
  func.func @transform_4(%arg0: i32) -> (i32, i32) {
    %c0_i32 = arith.constant 0 : i32
    %c0_i32_0 = arith.constant 0 : i32
    %c0_i32_1 = arith.constant 0 : i32
    return %c0_i32, %c0_i32_0 : i32, i32
  }
  func.func @transform_5(%arg0: i32) -> (i32, i32) {
    %c0_i32 = arith.constant 0 : i32
    %c0_i32_0 = arith.constant 0 : i32
    %c0_i32_1 = arith.constant 0 : i32
    return %c0_i32, %c0_i32_0 : i32, i32
  }
  func.func @transform_6(%arg0: i32) -> (i32, i32) {
    %c0_i32 = arith.constant 0 : i32
    %c0_i32_0 = arith.constant 0 : i32
    %c0_i32_1 = arith.constant 0 : i32
    return %c0_i32, %c0_i32_0 : i32, i32
  }
  func.func @transform_7(%arg0: i32) -> (i32, i32) {
    %c0_i32 = arith.constant 0 : i32
    %c0_i32_0 = arith.constant 0 : i32
    %c0_i32_1 = arith.constant 0 : i32
    return %c0_i32, %c0_i32_0 : i32, i32
  }
  func.func @transform_8(%arg0: i32) -> (i32, i32) {
    %c0_i32 = arith.constant 0 : i32
    %c0_i32_0 = arith.constant 0 : i32
    %c0_i32_1 = arith.constant 0 : i32
    return %c0_i32, %c0_i32_0 : i32, i32
  }
  func.func @transform_9(%arg0: i32) -> (i32, i32) {
    %c0_i32 = arith.constant 0 : i32
    %c0_i32_0 = arith.constant 0 : i32
    %c0_i32_1 = arith.constant 0 : i32
    return %c0_i32, %c0_i32_0 : i32, i32
  }
  func.func @transform_10(%arg0: i32) -> (i32, i32) {
    %c0_i32 = arith.constant 0 : i32
    %c0_i32_0 = arith.constant 0 : i32
    %c0_i32_1 = arith.constant 0 : i32
    return %c0_i32, %c0_i32_0 : i32, i32
  }
  func.func @transform_11(%arg0: i32) -> (i32, i32) {
    %c0_i32 = arith.constant 0 : i32
    %c0_i32_0 = arith.constant 0 : i32
    %c0_i32_1 = arith.constant 0 : i32
    return %c0_i32, %c0_i32_0 : i32, i32
  }
  func.func @transform_12(%arg0: i32) -> (i32, i32) {
    %c0_i32 = arith.constant 0 : i32
    %c0_i32_0 = arith.constant 0 : i32
    %c0_i32_1 = arith.constant 0 : i32
    return %c0_i32, %c0_i32_0 : i32, i32
  }
  func.func @transform_13(%arg0: i32) -> (i32, i32, i32) {
    %c0_i32 = arith.constant 0 : i32
    %c0_i32_0 = arith.constant 0 : i32
    %c0_i32_1 = arith.constant 0 : i32
    return %arg0, %c0_i32, %c0_i32_0 : i32, i32, i32
  }
}

</mosaic_0001>

<bundles_post_ra>
// kernel: multihead_forward.1
= control target key start
LH: loop header
LB: loop body
LE: loop exit
PB: predicated region body
PF: predicated region fallthrough
CT: control target
= control target key end

     0   :  { %18 = vsyncpa [#allocation3], 0  ;;  %s8119_s0 = inlined_call_operand.vmem [shape: f32[2,128,128], index: 0, kind: input, shape index: {}]   ;;  %s8120_s1 = inlined_call_operand.vmem [shape: bf16[128,128], index: 1, kind: input, shape index: {}]   ;;  %s8121_s2 = inlined_call_operand.vmem [shape: bf16[128,128], index: 2, kind: input, shape index: {}]   ;;  %s8122_s3 = inlined_call_operand.vmem [shape: bf16[128,128], index: 3, kind: input, shape index: {}]   ;;  %s8123_s4 = inlined_call_operand.vmem [shape: bf16[128,128], index: 4, kind: input, shape index: {}]   ;;  %s8124_s5 = inlined_call_operand.vmem [shape: f32[1,128], index: 5, kind: input, shape index: {}]   ;;  %s8125_s6 = inlined_call_operand.vmem [shape: f32[1,128], index: 6, kind: input, shape index: {}]   ;;  %s8126_s7 = inlined_call_operand.vmem [shape: bf16[128,512], index: 7, kind: input, shape index: {}]   ;;  %s8127_s8 = inlined_call_operand.vmem [shape: f32[1,512], index: 8, kind: input, shape index: {}]   ;;  %s8128_s9 = inlined_call_operand.vmem [shape: bf16[512,128], index: 9, kind: input, shape index: {}]   ;;  %s8129_s10 = inlined_call_operand.vmem [shape: f32[1,128], index: 10, kind: input, shape index: {}]   ;;  %s8130_s11 = inlined_call_operand.vmem [shape: f32[1,128], index: 11, kind: input, shape index: {}]   ;;  %s8131_s12 = inlined_call_operand.vmem [shape: f32[1,128], index: 12, kind: input, shape index: {}]   ;;  %s8132_s13 = inlined_call_operand.hbm [shape: f32[2,128,128], index: 13, kind: output, shape index: {}]  }
   0x1   :  { %20 = vsyncpa [#allocation3 + $0x1], 0  ;;  %s5636_s25 = smov 0   ;;  %s5638_s26 = smov 0  }
   0x2   :  { %s5640_s27 = smov 0   ;;  %s5642_s28 = smov 0  }
   0x3 LB: > { %8162 = sst [smem:[#allocation5_spill]] %s5553_s27  ;;  %s5657_s29 = sadd.s32 4294967295, %s5557_s28   ;;  %s5557_s28 = sphi %s5642_s28, %s8203_s28   ;;  %s5553_s27 = sphi %s5640_s27, %s8205_s27   ;;  %s5549_s26 = sphi %s5638_s26, %s8207_s26   ;;  %s5545_s25 = sphi %s5636_s25, %s8206_s25  }
   0x4   : > { %s4436_s30 = sadd.s32 4294967294, %s5557_s28   ;;  %s5661_s14 = sadd.s32 1, %s5557_s28  }
   0x5   : > { %8163 = sst [smem:[#allocation6_spill]] %s5661_s14  ;;  %s311_s15 = sadd.s32 1, %s5553_s27 }
   0x6   : > { %s308_s16 = ssub.s32 %s5557_s28, %s5661_s14  ;;  %p321_p0 = scmp.ne.s32.totalorder %s5553_s27, %s5549_s26 }
   0x7   : > { %p309_p1 = scmp.eq.s32.totalorder %s308_s16, 0  ;;  %p322_p2 = scmp.eq.s32.totalorder %s5657_s29, 1 }
   0x8   : > { %p327_p3 = scmp.ne.s32.totalorder %s5549_s26, %s5545_s25  ;;  %p328_p4 = scmp.eq.s32.totalorder %s4436_s30, 1 }
   0x9   : > { %s5672_s17 = scalar_select %p309_p1, %s5553_s27, %s311_s15  }
   0xa   : > { %p5674_p5 = por %p322_p2, %p321_p0  ;;  %p5678_p6 = por %p328_p4, %p327_p3 }
   0xb   : > { %8164 = sst [smem:[#allocation7_spill]] %s5672_s17  ;;  %p4439_p7 = scmp.ge.s32.totalorder %s5557_s28, 1 }
   0xc   : > { %s8166_s19 = scalar_select %p5678_p6, 1, 0 }
   0xd   : > { %p390_p8 = scmp.lt.s32.totalorder %s5557_s28, 3 }
   0xe   : > { %8167 = sst [smem:[#allocation8_spill]] %s8166_s19 }
   0xf   : > { %p391_p9 = pnand %p4439_p7, %p390_p8 }
  0x11   : > { %394 = sbr.rel (%p391_p9) target bundleno = 2679 (0xa77), region = 72 }
  0x16   : > { %v4872_v0 = vld [vmem:[%s8120_s1 + $0x38] sm:$0xff]  ;;  %v4871_v3 = vld [vmem:[%s8120_s1 + $0x30] sm:$0xff]  ;;  %v4870_v6 = vld [vmem:[%s8120_s1 + $0x28] sm:$0xff]  ;;  %p434_p10 = scmp.lt.s32.totalorder %s5657_s29, 1  ;;  %s5559_s16 = smov 96   ;;  %vm877_vm0 = vcmask 261120  }
  0x17   : > { %v4880_v1 = vld [vmem:[%s8121_s2 + $0x38] sm:$0xff]  ;;  %527 = vmatpush.bf16.msra.mxu0 %v4872_v0  ;;  %v4879_v4 = vld [vmem:[%s8121_s2 + $0x30] sm:$0xff]  ;;  %v4878_v7 = vld [vmem:[%s8121_s2 + $0x28] sm:$0xff]  ;;  %s5560_s21 = smov 64   ;;  %s5561_s14 = smov 32  }
  0x18   : > { %v4888_v2 = vld [vmem:[%s8122_s3 + $0x38] sm:$0xff]  ;;  %640 = vmatpush.bf16.msra.mxu1 %v4880_v1  ;;  %v4887_v5 = vld [vmem:[%s8122_s3 + $0x30] sm:$0xff]  ;;  %v4886_v8 = vld [vmem:[%s8122_s3 + $0x28] sm:$0xff]  ;;  %s435_s20 = scalar_select %p434_p10, %s5657_s29, 1 }
  0x19   : > { %753 = vmatpush.bf16.msra.mxu2 %v4888_v2  ;;  %v4869_v9 = vld [vmem:[%s8120_s1 + $0x20] sm:$0xff]  ;;  %v4868_v12 = vld [vmem:[%s8120_s1 + $0x18] sm:$0xff]  ;;  %v4867_v15 = vld [vmem:[%s8120_s1 + $0x10] sm:$0xff]  ;;  %s4961_s19 = sshll.u32 %s5657_s29, 7 }
  0x1a   : > { %v4877_v10 = vld [vmem:[%s8121_s2 + $0x20] sm:$0xff]  ;;  %v4876_v13 = vld [vmem:[%s8121_s2 + $0x18] sm:$0xff]  ;;  %v4875_v16 = vld [vmem:[%s8121_s2 + $0x10] sm:$0xff]  ;;  %s4864_s27 = sshll.u32 %s435_s20, 7 }
  0x1b   : > { %528 = vmatpush.bf16.msra.mxu0 %v4871_v3  ;;  %v4885_v11 = vld [vmem:[%s8122_s3 + $0x20] sm:$0xff]  ;;  %v4884_v14 = vld [vmem:[%s8122_s3 + $0x18] sm:$0xff]  ;;  %v4883_v17 = vld [vmem:[%s8122_s3 + $0x10] sm:$0xff]  ;;  %s5752_s24 = scalar_lea.vmem %s8119_s0, %s4864_s27 }
  0x1c   : > { %641 = vmatpush.bf16.msra.mxu1 %v4879_v4  ;;  %v4866_v18 = vld [vmem:[%s8120_s1 + $0x8] sm:$0xff]  ;;  %v4865_v21 = vld [vmem:[%s8120_s1] sm:$0xff]  ;;  %v441_v27 = vld [vmem:[%s5752_s24 + $0x10] sm:$0xff] }
  0x1d   : > { %754 = vmatpush.bf16.msra.mxu2 %v4887_v5  ;;  %v4874_v19 = vld [vmem:[%s8121_s2 + $0x8] sm:$0xff]  ;;  %v4873_v22 = vld [vmem:[%s8121_s2] sm:$0xff]  ;;  %v442_v28 = vld [vmem:[%s5752_s24 + $0x18] sm:$0xff] }
  0x1e   : > { %v4882_v20 = vld [vmem:[%s8122_s3 + $0x8] sm:$0xff]  ;;  %v439_v23 = vld [vmem:[%s5752_s24] sm:$0xff]  ;;  %v456_v29 = vpack.c.bf16 %v442_v28, %v441_v27  ;;  %v445_v33 = vld [vmem:[%s5752_s24 + $0x30] sm:$0xff] }
  0x1f   : > { %529 = vmatpush.bf16.msra.mxu0 %v4870_v6  ;;  %v440_v24 = vld [vmem:[%s5752_s24 + $0x8] sm:$0xff]  ;;  %v4881_v25 = vld [vmem:[%s8122_s3] sm:$0xff]  ;;  %v446_v34 = vld [vmem:[%s5752_s24 + $0x38] sm:$0xff] }
  0x20   : > { %642 = vmatpush.bf16.msra.mxu1 %v4878_v7  ;;  %v455_v26 = vpack.c.bf16 %v440_v24, %v439_v23  ;;  %v443_v30 = vld [vmem:[%s5752_s24 + $0x20] sm:$0xff]  ;;  %v444_v31 = vld [vmem:[%s5752_s24 + $0x28] sm:$0xff]  ;;  %v458_v35 = vpack.c.bf16 %v446_v34, %v445_v33  ;;  %v449_v39 = vld [vmem:[%s5752_s24 + $0x50] sm:$0xff] }
  0x21   : > { %755 = vmatpush.bf16.msra.mxu2 %v4886_v8  ;;  %v457_v32 = vpack.c.bf16 %v444_v31, %v443_v30  ;;  %v447_v36 = vld [vmem:[%s5752_s24 + $0x40] sm:$0xff]  ;;  %v448_v37 = vld [vmem:[%s5752_s24 + $0x48] sm:$0xff]  ;;  %v450_v40 = vld [vmem:[%s5752_s24 + $0x58] sm:$0xff] }
  0x22   : > { %v459_v38 = vpack.c.bf16 %v448_v37, %v447_v36  ;;  %v460_v41 = vpack.c.bf16 %v450_v40, %v449_v39  ;;  %v451_v42 = vld [vmem:[%s5752_s24 + $0x60] sm:$0xff]  ;;  %v452_v43 = vld [vmem:[%s5752_s24 + $0x68] sm:$0xff]  ;;  %v453_v45 = vld [vmem:[%s5752_s24 + $0x70] sm:$0xff] }
  0x23   : > { %530 = vmatpush.bf16.msra.mxu0 %v4869_v9  ;;  %v461_v44 = vpack.c.bf16 %v452_v43, %v451_v42  ;;  %v454_v46 = vld [vmem:[%s5752_s24 + $0x78] sm:$0xff] }
  0x24   : > { %643 = vmatpush.bf16.msra.mxu1 %v4877_v10  ;;  %v462_v47 = vpack.c.bf16 %v454_v46, %v453_v45 }
  0x25   : > { %756 = vmatpush.bf16.msra.mxu2 %v4885_v11 }
  0x27   : > { %531 = vmatpush.bf16.msra.mxu0 %v4868_v12 }
  0x28   : > { %644 = vmatpush.bf16.msra.mxu1 %v4876_v13 }
  0x29   : > { %757 = vmatpush.bf16.msra.mxu2 %v4884_v14 }
  0x2b   : > { %532 = vmatpush.bf16.msra.mxu0 %v4867_v15 }
  0x2c   : > { %645 = vmatpush.bf16.msra.mxu1 %v4875_v16 }
  0x2d   : > { %758 = vmatpush.bf16.msra.mxu2 %v4883_v17 }
  0x2f   : > { %533 = vmatpush.bf16.msra.mxu0 %v4866_v18 }
  0x30   : > { %646 = vmatpush.bf16.msra.mxu1 %v4874_v19 }
  0x31   : > { %759 = vmatpush.bf16.msra.mxu2 %v4882_v20 }
  0x33   : > { %534 = vmatpush.bf16.msra.mxu0 %v4865_v21 }
  0x34   : > { %647 = vmatpush.bf16.msra.mxu1 %v4873_v22 }
  0x35   : > { %760 = vmatpush.bf16.msra.mxu2 %v4881_v25 }
  0x36   : > { %535 = vmatmul.bf16.vlgmr.msra.gmra.mxu0 %v455_v26 }
  0x37   : > { %648 = vmatmul.bf16.vlgmr.msra.gmra.mxu1 %v455_v26 }
  0x38   : > { %761 = vmatmul.bf16.vlgmr.msra.gmra.mxu2 %v455_v26 }
  0x46   : > { %540 = vmatmul.bf16.gmra.mxu0 %v456_v29 }
  0x47   : > { %653 = vmatmul.bf16.gmra.mxu1 %v456_v29 }
  0x48   : > { %766 = vmatmul.bf16.gmra.mxu2 %v456_v29 }
  0x56   : > { %545 = vmatmul.bf16.gmra.mxu0 %v457_v32 }
  0x57   : > { %658 = vmatmul.bf16.gmra.mxu1 %v457_v32 }
  0x58   : > { %771 = vmatmul.bf16.gmra.mxu2 %v457_v32 }
  0x66   : > { %550 = vmatmul.bf16.gmra.mxu0 %v458_v35 }
  0x67   : > { %663 = vmatmul.bf16.gmra.mxu1 %v458_v35 }
  0x68   : > { %776 = vmatmul.bf16.gmra.mxu2 %v458_v35 }
  0x76   : > { %555 = vmatmul.bf16.gmra.mxu0 %v459_v38 }
  0x77   : > { %668 = vmatmul.bf16.gmra.mxu1 %v459_v38 }
  0x78   : > { %781 = vmatmul.bf16.gmra.mxu2 %v459_v38 }
  0x86   : > { %560 = vmatmul.bf16.gmra.mxu0 %v460_v41 }
  0x87   : > { %673 = vmatmul.bf16.gmra.mxu1 %v460_v41 }
  0x88   : > { %786 = vmatmul.bf16.gmra.mxu2 %v460_v41 }
  0x96   : > { %565 = vmatmul.bf16.gmra.mxu0 %v461_v44 }
  0x97   : > { %678 = vmatmul.bf16.gmra.mxu1 %v461_v44 }
  0x98   : > { %791 = vmatmul.bf16.gmra.mxu2 %v461_v44 }
  0xa6   : > { %570 = vmatmul.bf16.gmra.mxu0 %v462_v47 }
  0xa7   : > { %683 = vmatmul.bf16.gmra.mxu1 %v462_v47 }
  0xa8   : > { %796 = vmatmul.bf16.gmra.mxu2 %v462_v47 }
  0xb3   : > { %v536_v48 = vpop.f32.mrf.mxu0 }
  0xb4   : > { %v649_v49 = vpop.f32.mrf.mxu1 }
  0xbb   : > { %v5779_v50 = vpop.f32.mrf.mxu2  ;;  %v538_v51 = vpop.f32.mrf.mxu0 }
  0xbc   : > { %v651_v52 = vpop.f32.mrf.mxu1  ;;  %v5781_v53 = vpack.c.bf16 %v538_v51, %v536_v48 }
  0xbd   : > { %v5783_v54 = vpack.c.bf16 %v651_v52, %v649_v49 }
  0xbe   : > { %1184 = vrot.lane.b32.xlu2 %v5781_v53, %s5559_s16 }
  0xbf   : > { %1208 = vrot.lane.b32.xlu1 %v5783_v54, %s5559_s16 }
  0xc3   : > { %v5789_v55 = vpop.f32.mrf.mxu2  ;;  %v541_v56 = vpop.f32.mrf.mxu0 }
  0xc4   : > { %v654_v57 = vpop.f32.mrf.mxu1 }
  0xcb   : > { %v5791_v58 = vpop.f32.mrf.mxu2  ;;  %v543_v59 = vpop.f32.mrf.mxu0 }
  0xcc   : > { %v656_v60 = vpop.f32.mrf.mxu1  ;;  %v5797_v62 = vpack.c.bf16 %v543_v59, %v541_v56 }
  0xcd   : > { %v5793_v61 = vpack.c.bf16 %v656_v60, %v654_v57 }
  0xcf   : > { %1210 = vrot.lane.b32.xlu0 %v5793_v61, %s5559_s16 }
  0xd3   : > { %v5799_v63 = vpop.f32.mrf.mxu2  ;;  %v546_v0 = vpop.f32.mrf.mxu0 }
  0xd4   : > { %v659_v1 = vpop.f32.mrf.mxu1 }
  0xd7   : > { %1186 = vrot.lane.b32.xlu0 %v5797_v62, %s5559_s16 }
  0xdb   : > { %v5803_v2 = vpop.f32.mrf.mxu2  ;;  %v548_v3 = vpop.f32.mrf.mxu0 }
  0xdc   : > { %v661_v4 = vpop.f32.mrf.mxu1  ;;  %v5805_v5 = vpack.c.bf16 %v548_v3, %v546_v0  ;;  %v5909_v0 = vpack.c.bf16 %v5799_v63, %v5791_v58 }
  0xdd   : > { %v5807_v6 = vpack.c.bf16 %v661_v4, %v659_v1 }
  0xde   : > { %1188 = vrot.lane.b32.xlu1 %v5805_v5, %s5559_s16  ;;  %8170 = vst [vmem:[#allocation11_spill] sm:$0xff] %v5909_v0 }
  0xdf   : > { %1212 = vrot.lane.b32.xlu2 %v5807_v6, %s5559_s16  ;;  %v909_v58 = vsel %vm877_vm0, %v5807_v6, 0 }
  0xe3   : > { %v5813_v7 = vpop.f32.mrf.mxu2  ;;  %v551_v8 = vpop.f32.mrf.mxu0 }
  0xe4   : > { %v664_v9 = vpop.f32.mrf.mxu1  ;;  %v5902_v60 = vpack.c.bf16 %v5813_v7, %v5803_v2  ;;  %v5920_v2 = vpack.c.bf16 %v5789_v55, %v5779_v50  ;;  %v906_v50 = vsel %vm877_vm0, %v5793_v61, 0 }
  0xe6   : > { %8169 = vst [vmem:[#allocation10_spill] sm:$0xff] %v5902_v60 }
  0xe7   : > { %8171 = vst [vmem:[#allocation12_spill] sm:$0xff] %v5920_v2 }
  0xeb   : > { %v5815_v10 = vpop.f32.mrf.mxu2  ;;  %v553_v11 = vpop.f32.mrf.mxu0 }
  0xec   : > { %v666_v12 = vpop.f32.mrf.mxu1  ;;  %v5821_v14 = vpack.c.bf16 %v553_v11, %v551_v8 }
  0xed   : > { %v5817_v13 = vpack.c.bf16 %v666_v12, %v664_v9 }
  0xef   : > { %1214 = vrot.lane.b32.xlu2 %v5817_v13, %s5559_s16  ;;  %v912_v1 = vsel %vm877_vm0, %v5817_v13, 0 }
  0xf3   : > { %v5823_v15 = vpop.f32.mrf.mxu2  ;;  %v556_v16 = vpop.f32.mrf.mxu0 }
  0xf4   : > { %v669_v17 = vpop.f32.mrf.mxu1  ;;  %v5889_v56 = vpack.c.bf16 %v5823_v15, %v5815_v10 }
  0xf6   : > { %8168 = vst [vmem:[#allocation9_spill] sm:$0xff] %v5889_v56 }
  0xf7   : > { %1190 = vrot.lane.b32.xlu2 %v5821_v14, %s5559_s16 }
  0xfb   : > { %v782_v18 = vpop.f32.mrf.mxu2  ;;  %v558_v19 = vpop.f32.mrf.mxu0 }
  0xfc   : > { %v671_v20 = vpop.f32.mrf.mxu1  ;;  %v5831_v22 = vpack.c.bf16 %v558_v19, %v556_v16 }
  0xfd   : > { %v5827_v21 = vpack.c.bf16 %v671_v20, %v669_v17 }
  0xff   : > { %1216 = vrot.lane.b32.xlu1 %v5827_v21, %s5559_s16  ;;  %v915_v59 = vsel %vm877_vm0, %v5827_v21, 0 }
 0x103   : > { %v784_v23 = vpop.f32.mrf.mxu2  ;;  %v561_v24 = vpop.f32.mrf.mxu0 }
 0x104   : > { %v674_v25 = vpop.f32.mrf.mxu1  ;;  %v5876_v51 = vpack.c.bf16 %v784_v23, %v782_v18 }
 0x107   : > { %1192 = vrot.lane.b32.xlu1 %v5831_v22, %s5559_s16 }
 0x10b   : > { %v787_v26 = vpop.f32.mrf.mxu2  ;;  %v563_v27 = vpop.f32.mrf.mxu0 }
 0x10c   : > { %v676_v28 = vpop.f32.mrf.mxu1  ;;  %v5861_v46 = vpack.c.bf16 %v563_v27, %v561_v24 }
 0x10d   : > { %v866_v29 = vpack.c.bf16 %v676_v28, %v674_v25 }
 0x10f   : > { %1580 = vrot.lane.b32.xlu2 %v866_v29, %s5560_s21  ;;  %1218 = vrot.lane.b32.xlu1 %v866_v29, %s5559_s16  ;;  %v918_v52 = vsel %vm877_vm0, %v866_v29, 0 }
 0x113   : > { %v789_v30 = vpop.f32.mrf.mxu2  ;;  %v566_v31 = vpop.f32.mrf.mxu0 }
 0x114   : > { %v679_v32 = vpop.f32.mrf.mxu1  ;;  %v5873_v49 = vpack.c.bf16 %v789_v30, %v787_v26 }
 0x117   : > { %1578 = vrot.lane.b32.xlu2 %v5827_v21, %s5560_s21 }
 0x118   : > { %v5891_v57 = vpop.permute.xlu2 %1184 }
 0x11b   : > { %v792_v33 = vpop.f32.mrf.mxu2  ;;  %v568_v34 = vpop.f32.mrf.mxu0 }
 0x11c   : > { %v681_v35 = vpop.f32.mrf.mxu1  ;;  %v5839_v36 = vpack.c.bf16 %v568_v34, %v566_v31 }
 0x11d   : > { %v867_v37 = vpack.c.bf16 %v681_v35, %v679_v32 }
 0x11f   : > { %1220 = vrot.lane.b32.xlu0 %v867_v37, %s5559_s16  ;;  %1936 = vrot.lane.b32.xlu1 %v867_v37, %s5561_s14  ;;  %v921_v48 = vsel %vm877_vm0, %v867_v37, 0 }
 0x120   : > { %1196 = vrot.lane.b32.xlu2 %v5839_v36, %s5559_s16 }
 0x123   : > { %v794_v38 = vpop.f32.mrf.mxu2  ;;  %v571_v11 = vpop.f32.mrf.mxu0 }
 0x124   : > { %v684_v39 = vpop.f32.mrf.mxu1  ;;  %v5863_v47 = vpack.c.bf16 %v794_v38, %v792_v33 }
 0x127   : > { %1582 = vrot.lane.b32.xlu0 %v867_v37, %s5560_s21  ;;  %1934 = vrot.lane.b32.xlu1 %v866_v29, %s5561_s14 }
 0x128   : > { %1928 = vrot.lane.b32.xlu2 %v5807_v6, %s5561_s14 }
 0x12b   : > { %v797_v40 = vpop.f32.mrf.mxu2  ;;  %v573_v15 = vpop.f32.mrf.mxu0 }
 0x12c   : > { %v686_v41 = vpop.f32.mrf.mxu1  ;;  %v5993_v16 = vpack.c.bf16 %v573_v15, %v571_v11 }
 0x12d   : > { %v5849_v42 = vpack.c.bf16 %v686_v41, %v684_v39 }
 0x12f   : > { %1222 = vrot.lane.b32.xlu0 %v5849_v42, %s5559_s16  ;;  %1576 = vrot.lane.b32.xlu1 %v5817_v13, %s5560_s21  ;;  %v924_v43 = vsel %vm877_vm0, %v5849_v42, 0 }
 0x130   : > { %1926 = vrot.lane.b32.xlu2 %v5793_v61, %s5561_s14  ;;  %926 = vmatpush.bf16.xpose.msra.mxu3 %v924_v43 }
 0x131   : > { %v5947_v4 = vpop.permute.xlu1 %1208 }
 0x133   : > { %v799_v44 = vpop.f32.mrf.mxu2 }
 0x134   : > { %v5859_v45 = vpack.c.bf16 %v799_v44, %v797_v40 }
 0x136   : > { %1127 = vmatpush.bf16.msrb.mxu0 %v5859_v45 }
 0x137   : > { %1574 = vrot.lane.b32.xlu1 %v5807_v6, %s5560_s21  ;;  %1194 = vrot.lane.b32.xlu0 %v5861_v46, %s5559_s16  ;;  %v903_v6 = vsel %vm877_vm0, %v5783_v54, 0 }
 0x138   : > { %1554 = vrot.lane.b32.xlu2 %v5781_v53, %s5560_s21  ;;  %927 = vmatpush.bf16.xpose.msra.mxu3 %v921_v48 }
 0x139   : > { %v5922_v3 = vpop.permute.xlu2 %1212 }
 0x13a   : > { %1128 = vmatpush.bf16.msrb.mxu0 %v5863_v47  ;;  %v1255_v43 = vsel %vm877_vm0, %v5922_v3, 0 }
 0x13e   : > { %1129 = vmatpush.bf16.msrb.mxu0 %v5873_v49 }
 0x13f   : > { %1924 = vrot.lane.b32.xlu1 %v5783_v54, %s5561_s14  ;;  %1932 = vrot.lane.b32.xlu0 %v5827_v21, %s5561_s14 }
 0x140   : > { %1910 = vrot.lane.b32.xlu2 %v5797_v62, %s5561_s14  ;;  %928 = vmatpush.bf16.xpose.msra.mxu3 %v918_v52  ;;  %v1249_v52 = vsel %vm877_vm0, %v5947_v4, 0 }
 0x142   : > { %1130 = vmatpush.bf16.msrb.mxu0 %v5876_v51 }
 0x146   : > { %1131 = vmatpush.bf16.msrb.mxu0 %v5889_v56 }
 0x147   : > { %1556 = vrot.lane.b32.xlu1 %v5797_v62, %s5560_s21  ;;  %1930 = vrot.lane.b32.xlu0 %v5817_v13, %s5561_s14 }
 0x148   : > { %1562 = vrot.lane.b32.xlu2 %v5831_v22, %s5560_s21  ;;  %929 = vmatpush.bf16.xpose.msra.mxu3 %v915_v59 }
 0x149   : > { %v5933_v63 = vpop.permute.xlu2 %1214 }
 0x14a   : > { %1132 = vmatpush.bf16.msrb.mxu0 %v5902_v60  ;;  %v1258_v39 = vsel %vm877_vm0, %v5933_v63, 0 }
 0x14e   : > { %1133 = vmatpush.bf16.msrb.mxu0 %v5909_v0 }
 0x14f   : > { %1912 = vrot.lane.b32.xlu1 %v5805_v5, %s5561_s14  ;;  %1572 = vrot.lane.b32.xlu0 %v5793_v61, %s5560_s21 }
 0x150   : > { %1491 = vrot.lane.b32.xlu2 %v5873_v49, %s5559_s16  ;;  %930 = vmatpush.bf16.xpose.msra.mxu3 %v912_v1  ;;  %v5959_v7 = vpop.permute.xlu1 %1188 }
 0x151   : > { %v5945_v55 = vpop.permute.xlu2 %1190 }
 0x152   : > { %1134 = vmatpush.bf16.msrb.mxu0 %v5920_v2 }
 0x157   : > { %1560 = vrot.lane.b32.xlu1 %v5821_v14, %s5560_s21  ;;  %1570 = vrot.lane.b32.xlu0 %v5783_v54, %s5560_s21 }
 0x158   : > { %1485 = vrot.lane.b32.xlu2 %v5902_v60, %s5559_s16  ;;  %931 = vmatpush.bf16.xpose.msra.mxu3 %v909_v58  ;;  %v802_v58 = vlaneseq }
 0x15a   : > { %v6106_v4 = vand.u32 127, %v802_v58 }
 0x15f   : > { %1914 = vrot.lane.b32.xlu1 %v5821_v14, %s5561_s14  ;;  %1908 = vrot.lane.b32.xlu0 %v5781_v53, %s5561_s14 }
 0x160   : > { %1847 = vrot.lane.b32.xlu2 %v5863_v47, %s5560_s21  ;;  %932 = vmatpush.bf16.xpose.msra.mxu3 %v906_v50  ;;  %v6104_v50 = vshrl.u32 %v802_v58, 7 }
 0x162   : > { %vm821_vm1 = vcmp.ge.s32.totalorder %v6104_v50, %v6106_v4  ;;  %v807_v58 = vadd.s32 32, %v6104_v50  ;;  %v811_v60 = vadd.s32 64, %v6104_v50 }
 0x164   : > { %vm825_vm5 = vcmp.ge.s32.totalorder %v807_v58, %v6106_v4  ;;  %v809_v58 = vadd.s32 48, %v6104_v50  ;;  %vm829_vm9 = vcmp.ge.s32.totalorder %v811_v60, %v6106_v4 }
 0x166   : > { %vm827_vm7 = vcmp.ge.s32.totalorder %v809_v58, %v6106_v4 }
 0x167   : > { %1564 = vrot.lane.b32.xlu1 %v5861_v46, %s5560_s21  ;;  %1558 = vrot.lane.b32.xlu0 %v5805_v5, %s5560_s21 }
 0x168   : > { %1938 = vrot.lane.b32.xlu2 %v5849_v42, %s5561_s14  ;;  %933 = vmatpush.bf16.xpose.msra.mxu3 %v903_v6 }
 0x169   : > { %v5957_v61 = vpop.permute.xlu2 %1580 }
 0x16f   : > { %4539 = vmatmul.msk.bf16.vlgmr.msra.gmra.mxu3 %vm877_vm0, %v5781_v53  ;;  %1918 = vrot.lane.b32.xlu1 %v5861_v46, %s5561_s14  ;;  %v5983_v53 = vpop.permute.xlu0 %1210 }
 0x170   : > { %1916 = vrot.lane.b32.xlu0 %v5831_v22, %s5561_s14  ;;  %1568 = vrot.lane.b32.xlu2 %v5993_v16, %s5560_s21 }
 0x171   : > { %v5967_v8 = vpop.permute.xlu2 %1578  ;;  %v1217_v54 = vpop.permute.xlu1 %1216 }
 0x172   : > { %v1261_v35 = vsel %vm877_vm0, %v1217_v54, 0  ;;  %v1623_v60 = vsel %vm877_vm0, %v5967_v8, 0 }
 0x177   : > { %1487 = vrot.lane.b32.xlu1 %v5889_v56, %s5559_s16  ;;  %v5991_v13 = vpop.permute.xlu0 %1186 }
 0x178   : > { %1493 = vrot.lane.b32.xlu0 %v5863_v47, %s5559_s16 }
 0x179   : > { %v5975_v10 = vpop.permute.xlu1 %1192 }
 0x17a   : > { %v5973_v9 = vpop.permute.xlu2 %1196 }
 0x17f   : > { %4540 = vmatmul.msk.bf16.gmra.mxu3 %vm877_vm0, %v5797_v62  ;;  %1920 = vrot.lane.b32.xlu1 %v5839_v36, %s5561_s14 }
 0x180   : > { %1489 = vrot.lane.b32.xlu0 %v5876_v51, %s5559_s16 }
 0x181   : > { %v1219_v62 = vpop.permute.xlu1 %1218 }
 0x182   : > { %v5987_v12 = vpop.permute.xlu2 %1928  ;;  %v1264_v32 = vsel %vm877_vm0, %v1219_v62, 0  ;;  %v804_v62 = vadd.s32 8, %v6104_v50 }
 0x184   : > { %vm822_vm2 = vcmp.ge.s32.totalorder %v804_v62, %v6106_v4 }
 0x187   : > { %1481 = vrot.lane.b32.xlu1 %v5920_v2, %s5559_s16 }
 0x188   : > { %1566 = vrot.lane.b32.xlu0 %v5839_v36, %s5560_s21 }
 0x18a   : > { %v6005_v19 = vpop.permute.xlu2 %1926 }
 0x18b   : > { %v1968_v62 = vsel %vm877_vm0, %v6005_v19, 0 }
 0x18f   : > { %4541 = vmatmul.msk.bf16.gmra.mxu3 %vm877_vm0, %v5805_v5  ;;  %2201 = vrot.lane.b32.xlu1 %v5863_v47, %s5561_s14  ;;  %v1252_v47 = vsel %vm877_vm0, %v5983_v53, 0 }
 0x190   : > { %1483 = vrot.lane.b32.xlu0 %v5909_v0, %s5559_s16 }
 0x191   : > { %v1221_v17 = vpop.permute.xlu0 %1220  ;;  %v6003_v18 = vpop.permute.xlu1 %1936 }
 0x192   : > { %v6015_v21 = vpop.permute.xlu2 %1554  ;;  %v1267_v28 = vsel %vm877_vm0, %v1221_v17, 0  ;;  %v1983_v3 = vsel %vm877_vm0, %v6003_v18, 0 }
 0x197   : > { %2199 = vrot.lane.b32.xlu1 %v5873_v49, %s5561_s14 }
 0x198   : > { %2195 = vrot.lane.b32.xlu0 %v5889_v56, %s5561_s14 }
 0x199   : > { %v6011_v20 = vpop.permute.xlu0 %1582  ;;  %v6013_v5 = vpop.permute.xlu1 %1934 }
 0x19a   : > { %v6026_v26 = vpop.permute.xlu2 %1910  ;;  %v1980_v54 = vsel %vm877_vm0, %v6013_v5, 0 }
 0x19f   : > { %4542 = vmatmul.msk.bf16.gmra.mxu3 %vm877_vm0, %v5821_v14  ;;  %2197 = vrot.lane.b32.xlu1 %v5876_v51, %s5561_s14 }
 0x1a0   : > { %1843 = vrot.lane.b32.xlu0 %v5876_v51, %s5560_s21 }
 0x1a1   : > { %v1223_v23 = vpop.permute.xlu0 %1222  ;;  %v6023_v24 = vpop.permute.xlu1 %1576 }
 0x1a2   : > { %v1270_v25 = vsel %vm877_vm0, %v1223_v23, 0  ;;  %v6041_v29 = vpop.permute.xlu2 %1562 }
 0x1a3   : > { %1272 = vmatpush.bf16.xpose.msrb.mxu1 %v1270_v25  ;;  %v805_v25 = vadd.s32 16, %v6104_v50 }
 0x1a5   : > { %vm823_vm3 = vcmp.ge.s32.totalorder %v805_v25, %v6106_v4  ;;  %v808_v25 = vadd.s32 40, %v6104_v50 }
 0x1a7   : > { %1845 = vrot.lane.b32.xlu1 %v5873_v49, %s5560_s21  ;;  %vm826_vm6 = vcmp.ge.s32.totalorder %v808_v25, %v6106_v4 }
 0x1a8   : > { %1584 = vrot.lane.b32.xlu0 %v5849_v42, %s5560_s21 }
 0x1a9   : > { %v6032_v14 = vpop.permute.xlu1 %1574  ;;  %v6034_v27 = vpop.permute.xlu0 %1194 }
 0x1aa   : > { %v6054_v34 = vpop.permute.xlu2 %1491 }
 0x1ab   : > { %1273 = vmatpush.bf16.xpose.msrb.mxu1 %v1267_v28 }
 0x1af   : > { %4543 = vmatmul.msk.bf16.gmra.mxu3 %vm877_vm0, %v5831_v22  ;;  %1198 = vrot.lane.b32.xlu1 %v5993_v16, %s5559_s16 }
 0x1b0   : > { %2203 = vrot.lane.b32.xlu0 %v5859_v45, %s5561_s14 }
 0x1b1   : > { %v6045_v30 = vpop.permute.xlu1 %1924  ;;  %v1933_v31 = vpop.permute.xlu0 %1932 }
 0x1b2   : > { %v6067_v40 = vpop.permute.xlu2 %1485  ;;  %v1977_v18 = vsel %vm877_vm0, %v1933_v31, 0 }
 0x1b3   : > { %1274 = vmatpush.bf16.xpose.msrb.mxu1 %v1264_v32 }
 0x1b7   : > { %1922 = vrot.lane.b32.xlu1 %v5993_v16, %s5561_s14 }
 0x1b8   : > { %1849 = vrot.lane.b32.xlu0 %v5859_v45, %s5560_s21 }
 0x1b9   : > { %v6052_v22 = vpop.permute.xlu1 %1556  ;;  %v1931_v33 = vpop.permute.xlu0 %1930 }
 0x1ba   : > { %v6075_v44 = vpop.permute.xlu2 %1847  ;;  %v1974_v32 = vsel %vm877_vm0, %v1931_v33, 0 }
 0x1bb   : > { %1275 = vmatpush.bf16.xpose.msrb.mxu1 %v1261_v35 }
 0x1bf   : > { %4544 = vmatmul.msk.bf16.gmra.mxu3 %vm877_vm0, %v5861_v46  ;;  %1495 = vrot.lane.b32.xlu1 %v5859_v45, %s5559_s16 }
 0x1c1   : > { %v6061_v37 = vpop.permute.xlu1 %1912  ;;  %v6063_v38 = vpop.permute.xlu0 %1572 }
 0x1c2   : > { %v1939_v48 = vpop.permute.xlu2 %1938 }
 0x1c3   : > { %1276 = vmatpush.bf16.xpose.msrb.mxu1 %v1258_v39  ;;  %v1986_v59 = vsel %vm877_vm0, %v1939_v48, 0 }
 0x1c9   : > { %v6069_v41 = vpop.permute.xlu1 %1560  ;;  %v6071_v42 = vpop.permute.xlu0 %1570 }
 0x1cb   : > { %1277 = vmatpush.bf16.xpose.msrb.mxu1 %v1255_v43  ;;  %v806_v43 = vadd.s32 24, %v6104_v50 }
 0x1cd   : > { %vm824_vm4 = vcmp.ge.s32.totalorder %v806_v43, %v6106_v4  ;;  %v1965_v43 = vsel %vm877_vm0, %v6045_v30, 0 }
 0x1cf   : > { %4545 = vmatmul.msk.bf16.gmra.mxu3 %vm877_vm0, %v5839_v36 }
 0x1d1   : > { %v6079_v45 = vpop.permute.xlu1 %1914  ;;  %v6081_v46 = vpop.permute.xlu0 %1908 }
 0x1d3   : > { %1278 = vmatpush.bf16.xpose.msrb.mxu1 %v1252_v47 }
 0x1d9   : > { %v6085_v49 = vpop.permute.xlu1 %1564  ;;  %v6087_v51 = vpop.permute.xlu0 %1558 }
 0x1db   : > { %1279 = vmatpush.bf16.xpose.msrb.mxu1 %v1249_v52  ;;  %v1971_v52 = vsel %vm877_vm0, %v5987_v12, 0 }
 0x1df   : > { %4546 = vmatmul.msk.bf16.gmra.mxu3 %vm877_vm0, %v5993_v16 }
 0x1e1   : > { %v6094_v36 = vpop.permute.xlu1 %1918 }
 0x1e2   : > { %v6096_v1 = vpop.permute.xlu0 %1916  ;;  %4547 = vmatmul.msk.bf16.vlgmr.msrb.gmra.mxu1 %vm877_vm0, %v5891_v57  ;;  %v5562_v57 = vmov -1e+30  }
 0x1e3   : > { %1988 = vmatpush.bf16.xpose.msra.mxu1 %v1986_v59  ;;  %v6115_v53 = vsel %vm821_vm1, 0.0, %v5562_v57  ;;  %v6131_v5 = vsel %vm822_vm2, 0.0, %v5562_v57  ;;  %v6145_v31 = vsel %vm823_vm3, 0.0, %v5562_v57  ;;  %v6162_v59 = vsel %vm824_vm4, 0.0, %v5562_v57 }
 0x1e4   : > { %v6202_v30 = vsel %vm827_vm7, 0.0, %v5562_v57  ;;  %vm2470_vm2 = vcmask 523264   ;;  %vm2487_vm3 = vcmask 785408  }
 0x1e9   : > { %v6102_v63 = vpop.permute.xlu1 %1487 }
 0x1ea   : > { %v6108_v6 = vpop.permute.xlu0 %1493 }
 0x1eb   : > { %1989 = vmatpush.bf16.xpose.msra.mxu1 %v1983_v3 }
 0x1f1   : > { %v6117_v11 = vpop.permute.xlu1 %1920 }
 0x1f2   : > { %v6120_v15 = vpop.permute.xlu0 %1489  ;;  %v935_v16 = vpop.f32.mrf.mxu3  ;;  %4548 = vmatmul.msk.bf16.gmra.mxu1 %vm877_vm0, %v5991_v13 }
 0x1f3   : > { %1990 = vmatpush.bf16.xpose.msra.mxu1 %v1980_v54  ;;  %v6125_v17 = vadd.f32 %v935_v16, %v6115_v53  ;;  %v6177_v16 = vsel %vm825_vm5, 0.0, %v5562_v57 }
 0x1f5   : > { %975 = vmax.xlane.f32.xlu1 %v6125_v17 }
 0x1f9   : > { %v6133_v23 = vpop.permute.xlu1 %1481 }
 0x1fa   : > { %v6136_v28 = vpop.permute.xlu0 %1566  ;;  %v937_v13 = vpop.f32.mrf.mxu3 }
 0x1fb   : > { %1991 = vmatpush.bf16.xpose.msra.mxu1 %v1977_v18  ;;  %v6140_v35 = vadd.f32 %v937_v13, %v6131_v5 }
 0x1fd   : > { %977 = vmax.xlane.f32.xlu2 %v6140_v35 }
 0x201   : > { %v6147_v39 = vpop.permute.xlu1 %2201 }
 0x202   : > { %v6150_v47 = vpop.permute.xlu0 %1483  ;;  %v940_v48 = vpop.f32.mrf.mxu3  ;;  %4549 = vmatmul.msk.bf16.gmra.mxu1 %vm877_vm0, %v5959_v7 }
 0x203   : > { %1992 = vmatpush.bf16.xpose.msra.mxu1 %v1974_v32  ;;  %v6155_v33 = vadd.f32 %v940_v48, %v6145_v31  ;;  %v6192_v48 = vsel %vm826_vm6, 0.0, %v5562_v57 }
 0x205   : > { %979 = vmax.xlane.f32.xlu1 %v6155_v33 }
 0x209   : > { %v6164_v3 = vpop.permute.xlu1 %2199 }
 0x20a   : > { %v6167_v54 = vpop.permute.xlu0 %2195  ;;  %v942_v7 = vpop.f32.mrf.mxu3 }
 0x20b   : > { %1993 = vmatpush.bf16.xpose.msra.mxu1 %v1971_v52  ;;  %v6172_v12 = vadd.f32 %v942_v7, %v6162_v59 }
 0x20d   : > { %981 = vmax.xlane.f32.xlu1 %v6172_v12 }
 0x211   : > { %v6179_v18 = vpop.permute.xlu1 %2197 }
 0x212   : > { %v1844_v13 = vpop.permute.xlu0 %1843  ;;  %v945_v32 = vpop.f32.mrf.mxu3  ;;  %4550 = vmatmul.msk.bf16.gmra.mxu1 %vm877_vm0, %v5945_v55 }
 0x213   : > { %1994 = vmatpush.bf16.xpose.msra.mxu1 %v1968_v62  ;;  %v6185_v19 = vadd.f32 %v945_v32, %v6177_v16 }
 0x215   : > { %983 = vmax.xlane.f32.xlu2 %v6185_v19 }
 0x219   : > { %v1846_v52 = vpop.permute.xlu1 %1845 }
 0x21a   : > { %v1585_v7 = vpop.permute.xlu0 %1584  ;;  %v947_v62 = vpop.f32.mrf.mxu3 }
 0x21b   : > { %1995 = vmatpush.bf16.xpose.msra.mxu1 %v1965_v43  ;;  %v1632_v55 = vsel %vm877_vm0, %v1585_v7, 0  ;;  %v6197_v32 = vadd.f32 %v947_v62, %v6192_v48  ;;  %v810_v43 = vadd.s32 56, %v6104_v50  ;;  %v1629_v62 = vsel %vm877_vm0, %v6011_v20, 0 }
 0x21c   : > { %1634 = vmatpush.bf16.xpose.msrb.mxu3 %v1632_v55 }
 0x21d   : > { %985 = vmax.xlane.f32.xlu1 %v6197_v32  ;;  %vm828_vm8 = vcmp.ge.s32.totalorder %v810_v43, %v6106_v4  ;;  %v6233_v43 = vsel %vm829_vm9, 0.0, %v5562_v57 }
 0x21e   : > { %v6219_v58 = vsel %vm828_vm8, 0.0, %v5562_v57 }
 0x221   : > { %v6204_v25 = vpop.permute.xlu1 %1198 }
 0x222   : > { %v6207_v2 = vpop.permute.xlu0 %2203  ;;  %v950_v0 = vpop.f32.mrf.mxu3  ;;  %4551 = vmatmul.msk.bf16.gmra.mxu1 %vm877_vm0, %v5975_v10 }
 0x223   : > { %v6212_v7 = vadd.f32 %v950_v0, %v6202_v30  ;;  %v1626_v0 = vsel %vm877_vm0, %v5957_v61, 0 }
 0x224   : > { %1635 = vmatpush.bf16.xpose.msrb.mxu3 %v1629_v62 }
 0x225   : > { %8172 = vst [vmem:[#allocation13_spill] sm:$0xff] %v6212_v7  ;;  %987 = vmax.xlane.f32.xlu0 %v6212_v7  ;;  %v812_v7 = vadd.s32 72, %v6104_v50 }
 0x227   : > { %vm830_vm10 = vcmp.ge.s32.totalorder %v812_v7, %v6106_v4 }
 0x229   : > { %v6221_v55 = vpop.permute.xlu1 %1922 }
 0x22a   : > { %v1850_v56 = vpop.permute.xlu0 %1849  ;;  %v952_v10 = vpop.f32.mrf.mxu3 }
 0x22b   : > { %1859 = vmatpush.bf16.msra.mxu0 %v1850_v56  ;;  %v6227_v20 = vadd.f32 %v952_v10, %v6219_v58 }
 0x22c   : > { %1636 = vmatpush.bf16.xpose.msrb.mxu3 %v1626_v0 }
 0x22d   : > { %989 = vmax.xlane.f32.xlu2 %v6227_v20 }
 0x22f   : > { %1860 = vmatpush.bf16.msra.mxu0 %v6075_v44  ;;  %v6247_v44 = vsel %vm830_vm10, 0.0, %v5562_v57 }
 0x231   : > { %v1496_v62 = vpop.permute.xlu1 %1495 }
 0x232   : > { %v955_v56 = vpop.f32.mrf.mxu3  ;;  %4552 = vmatmul.msk.bf16.gmra.mxu1 %vm877_vm0, %v6034_v27  ;;  %1505 = vmatpush.bf16.msrb.mxu2 %v1496_v62  ;;  %v813_v27 = vadd.s32 80, %v6104_v50 }
 0x233   : > { %v6239_v61 = vadd.f32 %v955_v56, %v6233_v43  ;;  %1861 = vmatpush.bf16.msra.mxu0 %v1846_v52  ;;  %v1620_v52 = vsel %vm877_vm0, %v6023_v24, 0  ;;  %v1611_v56 = vsel %vm877_vm0, %v6071_v42, 0 }
 0x234   : > { %1637 = vmatpush.bf16.xpose.msrb.mxu3 %v1623_v60  ;;  %vm831_vm11 = vcmp.ge.s32.totalorder %v813_v27, %v6106_v4  ;;  %v818_v60 = vadd.s32 120, %v6104_v50 }
 0x235   : > { %991 = vmax.xlane.f32.xlu0 %v6239_v61 }
 0x236   : > { %1506 = vmatpush.bf16.msrb.mxu2 %v6108_v6  ;;  %v6260_v6 = vsel %vm831_vm11, 0.0, %v5562_v57  ;;  %vm836_vm1 = vcmp.ge.s32.totalorder %v818_v60, %v6106_v4 }
 0x237   : > { %1862 = vmatpush.bf16.msra.mxu0 %v1844_v13  ;;  %v814_v13 = vadd.s32 88, %v6104_v50 }
 0x239   : > { %vm832_vm12 = vcmp.ge.s32.totalorder %v814_v13, %v6106_v4 }
 0x23a   : > { %v957_v10 = vpop.f32.mrf.mxu3  ;;  %1507 = vmatpush.bf16.msrb.mxu2 %v6054_v34  ;;  %v1617_v34 = vsel %vm877_vm0, %v6032_v14, 0 }
 0x23b   : > { %v6254_v8 = vadd.f32 %v957_v10, %v6247_v44 }
 0x23c   : > { %1638 = vmatpush.bf16.xpose.msrb.mxu3 %v1620_v52 }
 0x23d   : > { %993 = vmax.xlane.f32.xlu0 %v6254_v8 }
 0x23e   : > { %1508 = vmatpush.bf16.msrb.mxu2 %v6120_v15  ;;  %v6275_v15 = vsel %vm832_vm12, 0.0, %v5562_v57 }
 0x23f   : > { %8173 = vst [vmem:[#allocation14_spill] sm:$0xff] %v6275_v15 }
 0x242   : > { %v960_v7 = vpop.f32.mrf.mxu3  ;;  %4553 = vmatmul.msk.bf16.gmra.mxu1 %vm877_vm0, %v5973_v9  ;;  %1509 = vmatpush.bf16.msrb.mxu2 %v6102_v63  ;;  %v815_v9 = vadd.s32 96, %v6104_v50  ;;  %v1614_v63 = vsel %vm877_vm0, %v6063_v38, 0 }
 0x243   : > { %v6267_v24 = vadd.f32 %v960_v7, %v6260_v6  ;;  %v6339_v7 = vsel %vm836_vm1, 0.0, %v5562_v57 }
 0x244   : > { %1639 = vmatpush.bf16.xpose.msrb.mxu3 %v1617_v34  ;;  %vm833_vm13 = vcmp.ge.s32.totalorder %v815_v9, %v6106_v4  ;;  %8177 = vst [vmem:[#allocation18_spill] sm:$0xff] %v6339_v7 }
 0x245   : > { %995 = vmax.xlane.f32.xlu1 %v6267_v24 }
 0x246   : > { %1510 = vmatpush.bf16.msrb.mxu2 %v6067_v40  ;;  %v6289_v40 = vsel %vm833_vm13, 0.0, %v5562_v57 }
 0x247   : > { %8174 = vst [vmem:[#allocation15_spill] sm:$0xff] %v6289_v40 }
 0x24a   : > { %v962_v0 = vpop.f32.mrf.mxu3  ;;  %1511 = vmatpush.bf16.msrb.mxu2 %v6150_v47  ;;  %v816_v47 = vadd.s32 104, %v6104_v50 }
 0x24b   : > { %v6282_v14 = vadd.f32 %v962_v0, %v6275_v15 }
 0x24c   : > { %1640 = vmatpush.bf16.xpose.msrb.mxu3 %v1614_v63  ;;  %vm834_vm14 = vcmp.ge.s32.totalorder %v816_v47, %v6106_v4 }
 0x24d   : > { %997 = vmax.xlane.f32.xlu2 %v6282_v14 }
 0x24e   : > { %1512 = vmatpush.bf16.msrb.mxu2 %v6133_v23 }
 0x252   : > { %2213 = vmatpush.bf16.msra.mxu2 %v6207_v2  ;;  %v965_v62 = vpop.f32.mrf.mxu3  ;;  %4554 = vmatmul.msk.bf16.gmra.mxu1 %vm877_vm0, %v6204_v25  ;;  %v6304_v2 = vsel %vm834_vm14, 0.0, %v5562_v57 }
 0x253   : > { %v6295_v38 = vadd.f32 %v965_v62, %v6289_v40  ;;  %8175 = vst [vmem:[#allocation16_spill] sm:$0xff] %v6304_v2 }
 0x254   : > { %1641 = vmatpush.bf16.xpose.msrb.mxu3 %v1611_v56 }
 0x255   : > { %999 = vmax.xlane.f32.xlu0 %v6295_v38 }
 0x256   : > { %2214 = vmatpush.bf16.msra.mxu2 %v6147_v39  ;;  %v817_v39 = vadd.s32 112, %v6104_v50 }
 0x258   : > { %vm835_vm15 = vcmp.ge.s32.totalorder %v817_v39, %v6106_v4 }
 0x25a   : > { %2215 = vmatpush.bf16.msra.mxu2 %v6164_v3  ;;  %v967_v23 = vpop.f32.mrf.mxu3 }
 0x25b   : > { %4555 = vmatmul.msk.bf16.vlgmr.msrb.gmra.mxu3 %vm877_vm0, %v6015_v21  ;;  %v6310_v42 = vadd.f32 %v967_v23, %v6304_v2 }
 0x25d   : > { %1001 = vmax.xlane.f32.xlu1 %v6310_v42 }
 0x25e   : > { %2216 = vmatpush.bf16.msra.mxu2 %v6179_v18  ;;  %v6323_v18 = vsel %vm835_vm15, 0.0, %v5562_v57 }
 0x25f   : > { %v1281_v25 = vpop.f32.mrf.mxu1  ;;  %8176 = vst [vmem:[#allocation17_spill] sm:$0xff] %v6323_v18 }
 0x260   : > { %v6316_v3 = vadd.f32 %v1281_v25, %v6115_v53 }
 0x262   : > { %2217 = vmatpush.bf16.msra.mxu2 %v6167_v54  ;;  %1321 = vmax.xlane.f32.xlu2 %v6316_v3  ;;  %v970_v21 = vpop.f32.mrf.mxu3 }
 0x263   : > { %4563 = vmatmul.msk.bf16.vlgmr.msra.gmra.mxu1 %vm877_vm0, %v6081_v46  ;;  %v6327_v27 = vadd.f32 %v970_v21, %v6323_v18 }
 0x267   : > { %v1283_v54 = vpop.f32.mrf.mxu1 }
 0x268   : > { %v976_v10 = vpop.xlane.xlu1 %975  ;;  %v6330_v52 = vadd.f32 %v1283_v54, %v6131_v5 }
 0x269   : > { %v1007_v13 = vsub.f32 %v6125_v17, %v976_v10 }
 0x26a   : > { %1323 = vmax.xlane.f32.xlu0 %v6330_v52  ;;  %1003 = vmax.xlane.f32.xlu2 %v6327_v27  ;;  %v972_v50 = vpop.f32.mrf.mxu3 }
 0x26b   : > { %v1023_v46 = vmul.f32 1.442695, %v1007_v13  ;;  %4556 = vmatmul.msk.bf16.gmra.mxu3 %vm877_vm0, %v6052_v22  ;;  %v6342_v34 = vadd.f32 %v972_v50, %v6339_v7 }
 0x26d   : > { %5141 = vpow2.f32 %v1023_v46 }
 0x26f   : > { %v1286_v9 = vpop.f32.mrf.mxu1 }
 0x270   : > { %v6345_v4 = vadd.f32 %v1286_v9, %v6145_v31 }
 0x272   : > { %1005 = vmax.xlane.f32.xlu0 %v6342_v34  ;;  %1325 = vmax.xlane.f32.xlu2 %v6345_v4 }
 0x273   : > { %4564 = vmatmul.msk.bf16.gmra.mxu1 %vm877_vm0, %v6026_v26  ;;  %v6350_v17 = vpop.eup %5141 }
 0x274   : > { %1055 = vadd.xlane.f32.xlu1 %v6350_v17 }
 0x277   : > { %v1288_v22 = vpop.f32.mrf.mxu1 }
 0x278   : > { %v980_v57 = vpop.xlane.xlu1 %979  ;;  %v6355_v0 = vadd.f32 %v1288_v22, %v6162_v59 }
 0x279   : > { %v1009_v63 = vsub.f32 %v6155_v33, %v980_v57 }
 0x27a   : > { %1327 = vmax.xlane.f32.xlu0 %v6355_v0 }
 0x27b   : > { %4557 = vmatmul.msk.bf16.gmra.mxu3 %vm877_vm0, %v6087_v51  ;;  %v1027_v26 = vmul.f32 1.442695, %v1009_v63 }
 0x27d   : > { %5143 = vpow2.f32 %v1027_v26 }
 0x27f   : > { %v1291_v47 = vpop.f32.mrf.mxu1 }
 0x280   : > { %v6362_v62 = vadd.f32 %v1291_v47, %v6177_v16  ;;  %v982_v23 = vpop.xlane.xlu1 %981 }
 0x282   : > { %1329 = vmax.xlane.f32.xlu0 %v6362_v62 }
 0x283   : > { %4565 = vmatmul.msk.bf16.gmra.mxu1 %vm877_vm0, %v6061_v37  ;;  %v6367_v56 = vpop.eup %5143 }
 0x287   : > { %v1293_v37 = vpop.f32.mrf.mxu1 }
 0x288   : > { %v6414_v22 = vadd.f32 %v1293_v37, %v6192_v48 }
 0x28a   : > { %1059 = vadd.xlane.f32.xlu0 %v6367_v56 }
 0x28b   : > { %4558 = vmatmul.msk.bf16.gmra.mxu3 %vm877_vm0, %v6069_v41 }
 0x28f   : > { %v1296_v41 = vpop.f32.mrf.mxu1 }
 0x290   : > { %v986_v13 = vpop.xlane.xlu1 %985 }
 0x291   : > { %v1012_v63 = vsub.f32 %v6197_v32, %v986_v13 }
 0x293   : > { %4566 = vmatmul.msk.bf16.gmra.mxu1 %vm877_vm0, %v6079_v45  ;;  %v1033_v47 = vmul.f32 1.442695, %v1012_v63 }
 0x297   : > { %v6386_v45 = vpop.f32.mrf.mxu1 }
 0x298   : > { %v988_v46 = vpop.xlane.xlu0 %987 }
 0x29b   : > { %4559 = vmatmul.msk.bf16.gmra.mxu3 %vm877_vm0, %v6041_v29  ;;  %v1569_v29 = vpop.permute.xlu2 %1568 }
 0x29f   : > { %v6389_v51 = vpop.f32.mrf.mxu1 }
 0x2a3   : > { %4567 = vmatmul.msk.bf16.gmra.mxu1 %vm877_vm0, %v6096_v1 }
 0x2a7   : > { %v1303_v1 = vpop.f32.mrf.mxu1 }
 0x2ab   : > { %4560 = vmatmul.msk.bf16.gmra.mxu3 %vm877_vm0, %v6085_v49  ;;  %v978_v49 = vpop.xlane.xlu2 %977 }
 0x2af   : > { %v6399_v21 = vpop.f32.mrf.mxu1 }
 0x2b3   : > { %4568 = vmatmul.msk.bf16.gmra.mxu1 %vm877_vm0, %v6094_v36  ;;  %v1008_v36 = vsub.f32 %v6140_v35, %v978_v49  ;;  %v984_v54 = vpop.xlane.xlu2 %983  ;;  %v6422_v49 = vadd.f32 %v1296_v41, %v6202_v30 }
 0x2b4   : > { %v1011_v57 = vsub.f32 %v6185_v19, %v984_v54 }
 0x2b5   : > { %v1025_v33 = vmul.f32 1.442695, %v1008_v36  ;;  %v992_v36 = vpop.xlane.xlu0 %991 }
 0x2b6   : > { %v1031_v26 = vmul.f32 1.442695, %v1011_v57  ;;  %v1015_v19 = vsub.f32 %v6239_v61, %v992_v36  ;;  %v6444_v57 = vadd.f32 %v1303_v1, %v6247_v44 }
 0x2b7   : > { %5145 = vpow2.f32 %v1025_v33  ;;  %v1308_v9 = vpop.f32.mrf.mxu1 }
 0x2b8   : > { %v1039_v33 = vmul.f32 1.442695, %v1015_v19  ;;  %v996_v1 = vpop.xlane.xlu1 %995 }
 0x2bb   : > { %4561 = vmatmul.msk.bf16.gmra.mxu3 %vm877_vm0, %v6136_v28  ;;  %v990_v41 = vpop.xlane.xlu2 %989 }
 0x2bd   : > { %v6404_v35 = vpop.eup %5145 }
 0x2bf   : > { %v6430_v32 = vpop.f32.mrf.mxu1 }
 0x2c3   : > { %4569 = vmatmul.msk.bf16.gmra.mxu1 %vm877_vm0, %v6117_v11  ;;  %v1010_v11 = vsub.f32 %v6172_v12, %v982_v23  ;;  %v998_v13 = vpop.xlane.xlu2 %997 }
 0x2c5   : > { %v1029_v25 = vmul.f32 1.442695, %v1010_v11 }
 0x2c7   : > { %5147 = vpow2.f32 %v1029_v25  ;;  %v1313_v61 = vpop.f32.mrf.mxu1 }
 0x2c8   : > { %5149 = vpow2.f32 %v1031_v26  ;;  %v6450_v26 = vadd.f32 %v6386_v45, %v6219_v58 }
 0x2c9   : > { %5151 = vpow2.f32 %v1033_v47 }
 0x2ca   : > { %5153 = vpow2.f32 %v1039_v33  ;;  %v6457_v33 = vadd.f32 %v1308_v9, %v6275_v15  ;;  %v6479_v15 = vadd.f32 %v6389_v51, %v6233_v43 }
 0x2cb   : > { %4562 = vmatmul.msk.bf16.gmra.mxu3 %vm877_vm0, %v1569_v29 }
 0x2cd   : > { %v6411_v50 = vpop.eup %5147 }
 0x2ce   : > { %v6432_v23 = vpop.eup %5149 }
 0x2cf   : > { %v6437_v25 = vpop.eup %5151  ;;  %v1316_v36 = vpop.f32.mrf.mxu1 }
 0x2d0   : > { %v6446_v63 = vpop.eup %5153  ;;  %v1002_v51 = vpop.xlane.xlu1 %1001 }
 0x2d3   : > { %4570 = vmatmul.msk.bf16.gmra.mxu1 %vm877_vm0, %v6221_v55 }
 0x2de   : > { %v1643_v28 = vpop.f32.mrf.mxu3 }
 0x2df   : > { %v6395_v39 = vadd.f32 %v1643_v28, %v6115_v53 }
 0x2e1   : > { %1683 = vmax.xlane.f32.xlu1 %v6395_v39 }
 0x2e6   : > { %v1645_v60 = vpop.f32.mrf.mxu3 }
 0x2e7   : > { %v6402_v55 = vadd.f32 %v1645_v60, %v6131_v5  ;;  %v1014_v60 = vsub.f32 %v6227_v20, %v990_v41  ;;  %v1018_v20 = vsub.f32 %v6282_v14, %v998_v13  ;;  %v1017_v14 = vsub.f32 %v6267_v24, %v996_v1  ;;  %v8180_v41 = vld [vmem:[#allocation13_spill] sm:$0xff]  ;;  %v1318_v24 = vpop.f32.mrf.mxu1 }
 0x2e9   : > { %1057 = vadd.xlane.f32.xlu1 %v6404_v35  ;;  %1685 = vmax.xlane.f32.xlu2 %v6402_v55  ;;  %v1037_v54 = vmul.f32 1.442695, %v1014_v60  ;;  %v1013_v60 = vsub.f32 %v8180_v41, %v988_v46  ;;  %v1043_v9 = vmul.f32 1.442695, %v1017_v14  ;;  %v6487_v41 = vadd.f32 %v1316_v36, %v6323_v18 }
 0x2ea   : > { %v6498_v36 = vadd.f32 %v1313_v61, %v6304_v2  ;;  %v6516_v18 = vadd.f32 %v6430_v32, %v6289_v40 }
 0x2eb   : > { %5155 = vpow2.f32 %v1037_v54  ;;  %v6469_v54 = vpop.xlane.xlu2 %1321  ;;  %v1035_v13 = vmul.f32 1.442695, %v1013_v60 }
 0x2ee   : > { %v1648_v10 = vpop.f32.mrf.mxu3 }
 0x2ef   : > { %v6409_v12 = vadd.f32 %v1648_v10, %v6145_v31  ;;  %v994_v10 = vpop.xlane.xlu0 %993 }
 0x2f1   : > { %1061 = vadd.xlane.f32.xlu1 %v6411_v50  ;;  %1687 = vmax.xlane.f32.xlu0 %v6409_v12 }
 0x2f2   : > { %1331 = vmax.xlane.f32.xlu2 %v6414_v22 }
 0x2f6   : > { %v1650_v29 = vpop.f32.mrf.mxu3 }
 0x2f7   : > { %v6425_v37 = vadd.f32 %v1650_v29, %v6162_v59  ;;  %v1045_v29 = vmul.f32 1.442695, %v1018_v20  ;;  %v1000_v19 = vpop.xlane.xlu0 %999  ;;  %v6473_v20 = vadd.f32 %v6399_v21, %v6260_v6  ;;  %v1016_v21 = vsub.f32 %v6254_v8, %v994_v10 }
 0x2f9   : > { %1689 = vmax.xlane.f32.xlu1 %v6425_v37  ;;  %1333 = vmax.xlane.f32.xlu0 %v6422_v49  ;;  %5157 = vpow2.f32 %v1045_v29  ;;  %v1004_v29 = vpop.xlane.xlu2 %1003  ;;  %v1041_v14 = vmul.f32 1.442695, %v1016_v21 }
 0x2fa   : > { %5159 = vpow2.f32 %v1043_v9  ;;  %v1997_v9 = vpop.f32.mrf.mxu1 }
 0x2fb   : > { %5161 = vpow2.f32 %v1035_v13 }
 0x2fe   : > { %v1653_v28 = vpop.f32.mrf.mxu3 }
 0x2ff   : > { %v6435_v11 = vadd.f32 %v1653_v28, %v6177_v16  ;;  %v6459_v28 = vpop.eup %5155 }
 0x301   : > { %8178 = vst [vmem:[#allocation19_spill] sm:$0xff] %v6435_v11  ;;  %1065 = vadd.xlane.f32.xlu1 %v6437_v25  ;;  %1063 = vadd.xlane.f32.xlu0 %v6432_v23  ;;  %v1326_v10 = vpop.xlane.xlu2 %1325 }
 0x302   : > { %1691 = vmax.xlane.f32.xlu2 %v6435_v11  ;;  %v6475_v11 = vpop.eup %5157  ;;  %v1999_v21 = vpop.f32.mrf.mxu1 }
 0x303   : > { %v6489_v60 = vpop.eup %5159 }
 0x306   : > { %v1655_v47 = vpop.f32.mrf.mxu3 }
 0x307   : > { %v6462_v45 = vadd.f32 %v1655_v47, %v6192_v48  ;;  %v1324_v47 = vpop.xlane.xlu0 %1323 }
 0x308   : > { %v1354_v46 = vsub.f32 %v6330_v52, %v1324_v47  ;;  %v1020_v52 = vsub.f32 %v6310_v42, %v1002_v51  ;;  %v1355_v42 = vsub.f32 %v6345_v4, %v1326_v10  ;;  %v6510_v51 = vadd.f32 %v1999_v21, %v6131_v5 }
 0x309   : > { %1071 = vadd.xlane.f32.xlu1 %v6446_v63  ;;  %1339 = vmax.xlane.f32.xlu0 %v6444_v57  ;;  %8179 = vst [vmem:[#allocation20_spill] sm:$0xff] %v6462_v45  ;;  %v6523_v5 = vadd.f32 %v1997_v9, %v6115_v53  ;;  %v1021_v21 = vsub.f32 %v6327_v27, %v1004_v29  ;;  %v1056_v27 = vpop.xlane.xlu1 %1055 }
 0x30a   : > { %1335 = vmax.xlane.f32.xlu2 %v6450_v26  ;;  %v1371_v1 = vmul.f32 1.442695, %v1354_v46  ;;  %v1049_v8 = vmul.f32 1.442695, %v1020_v52  ;;  %v1019_v46 = vsub.f32 %v6295_v38, %v1000_v19  ;;  %8181 = vst [vmem:[#allocation13_spill] sm:$0xff] %v6510_v51  ;;  %v2002_v32 = vpop.f32.mrf.mxu1 }
 0x30c   : > { %5163 = vpow2.f32 %v1371_v1  ;;  %v1373_v1 = vmul.f32 1.442695, %v1355_v42 }
 0x30d   : > { %5165 = vpow2.f32 %v1041_v14  ;;  %v1047_v14 = vmul.f32 1.442695, %v1019_v46  ;;  %v6540_v46 = vadd.f32 %v1318_v24, %v6339_v7 }
 0x30e   : > { %5167 = vpow2.f32 %v1049_v8  ;;  %v1658_v10 = vpop.f32.mrf.mxu3 }
 0x30f   : > { %v1006_v61 = vpop.xlane.xlu0 %1005  ;;  %5169 = vpow2.f32 %v1373_v1  ;;  %v6535_v53 = vadd.f32 %v1658_v10, %v6202_v30 }
 0x310   : > { %v1022_v4 = vsub.f32 %v6342_v34, %v1006_v61  ;;  %5171 = vpow2.f32 %v1047_v14  ;;  %v1353_v34 = vsub.f32 %v6316_v3, %v6469_v54  ;;  %v1051_v54 = vmul.f32 1.442695, %v1021_v21 }
 0x311   : > { %1343 = vmax.xlane.f32.xlu1 %v6457_v33  ;;  %1069 = vadd.xlane.f32.xlu0 %v6459_v28  ;;  %8182 = vst [vmem:[#allocation21_spill] sm:$0xff] %v6535_v53 }
 0x312   : > { %1693 = vmax.xlane.f32.xlu2 %v6462_v45  ;;  %v6491_v45 = vpop.eup %5161  ;;  %v1053_v38 = vmul.f32 1.442695, %v1022_v4  ;;  %v1369_v42 = vmul.f32 1.442695, %v1353_v34  ;;  %v2004_v1 = vpop.f32.mrf.mxu1 }
 0x313   : > { %v6500_v13 = vpop.eup %5163  ;;  %v6547_v61 = vadd.f32 %v2004_v1, %v6162_v59 }
 0x314   : > { %v6502_v47 = vpop.eup %5165  ;;  %5173 = vpow2.f32 %v1053_v38 }
 0x315   : > { %v6512_v52 = vpop.eup %5167  ;;  %5175 = vpow2.f32 %v1369_v42  ;;  %8183 = vst [vmem:[#allocation22_spill] sm:$0xff] %v6547_v61  ;;  %v6566_v42 = vadd.f32 %v2002_v32, %v6145_v31 }
 0x316   : > { %v6525_v19 = vpop.eup %5169  ;;  %v1660_v3 = vpop.f32.mrf.mxu3  ;;  %5177 = vpow2.f32 %v1051_v54 }
 0x317   : > { %v6527_v8 = vpop.eup %5171  ;;  %v1328_v14 = vpop.xlane.xlu0 %1327  ;;  %v6550_v4 = vadd.f32 %v1660_v3, %v6219_v58  ;;  %8185 = vst [vmem:[#allocation24_spill] sm:$0xff] %v6566_v42  ;;  %5179 = vrcp.f32 %v1056_v27 }
 0x318   : > { %v1356_v59 = vsub.f32 %v6355_v0, %v1328_v14  ;;  %v8186_v0 = vld [vmem:[#allocation9_spill] sm:$0xff] }
 0x319   : > { %1077 = vadd.xlane.f32.xlu1 %v6475_v11  ;;  %1341 = vmax.xlane.f32.xlu0 %v6473_v20  ;;  %8184 = vst [vmem:[#allocation23_spill] sm:$0xff] %v6550_v4 }
 0x31a   : > { %1337 = vmax.xlane.f32.xlu2 %v6479_v15  ;;  %v6537_v9 = vpop.eup %5173  ;;  %v1375_v34 = vmul.f32 1.442695, %v1356_v59 }
 0x31b   : > { %v6552_v24 = vpop.eup %5175 }
 0x31c   : > { %v6557_v29 = vpop.eup %5177  ;;  %5181 = vpow2.f32 %v1375_v34 }
 0x31d   : > { %v5180_v54 = vpop.eup %5179 }
 0x31e   : > { %v1103_v32 = vmul.f32 %v5180_v54, %v6350_v17 }
 0x31f   : > { %v6559_v38 = vpop.xlane.xlu0 %1329 }
 0x321   : > { %1349 = vmax.xlane.f32.xlu1 %v6487_v41  ;;  %1075 = vadd.xlane.f32.xlu0 %v6489_v60 }
 0x322   : > { %1067 = vadd.xlane.f32.xlu2 %v6491_v45  ;;  %v6569_v7 = vpop.eup %5181 }
 0x327   : > { %v1060_v21 = vpop.xlane.xlu0 %1059 }
 0x329   : > { %1403 = vadd.xlane.f32.xlu1 %v6500_v13  ;;  %1347 = vmax.xlane.f32.xlu0 %v6498_v36 }
 0x32a   : > { %1073 = vadd.xlane.f32.xlu2 %v6502_v47 }
 0x331   : > { %2039 = vmax.xlane.f32.xlu1 %v6510_v51  ;;  %1081 = vadd.xlane.f32.xlu0 %v6512_v52 }
 0x332   : > { %1345 = vmax.xlane.f32.xlu2 %v6516_v18 }
 0x339   : > { %2037 = vmax.xlane.f32.xlu0 %v6523_v5  ;;  %1405 = vadd.xlane.f32.xlu1 %v6525_v19 }
 0x33a   : > { %1079 = vadd.xlane.f32.xlu2 %v6527_v8 }
 0x341   : > { %1085 = vadd.xlane.f32.xlu0 %v6537_v9  ;;  %1695 = vmax.xlane.f32.xlu1 %v6535_v53 }
 0x342   : > { %1351 = vmax.xlane.f32.xlu2 %v6540_v46 }
 0x349   : > { %2043 = vmax.xlane.f32.xlu0 %v6547_v61  ;;  %1697 = vmax.xlane.f32.xlu1 %v6550_v4 }
 0x34a   : > { %1401 = vadd.xlane.f32.xlu2 %v6552_v24 }
 0x352   : > { %1083 = vadd.xlane.f32.xlu2 %v6557_v29 }
 0x354   : > { %v6563_v10 = vpop.xlane.xlu1 %1683 }
 0x35a   : > { %2041 = vmax.xlane.f32.xlu2 %v6566_v42 }
 0x35c   : > { %v1058_v1 = vpop.xlane.xlu1 %1057  ;;  %v1686_v3 = vpop.xlane.xlu2 %1685 }
 0x35d   : > { %5183 = vrcp.f32 %v1058_v1  ;;  %v1716_v2 = vsub.f32 %v6402_v55, %v1686_v3 }
 0x35f   : > { %v1733_v53 = vmul.f32 1.442695, %v1716_v2  ;;  %v8187_v2 = vld [vmem:[#allocation10_spill] sm:$0xff] }
 0x362   : > { %1407 = vadd.xlane.f32.xlu2 %v6569_v7  ;;  %1841 = vrot.lane.b32.xlu1 %v8186_v0, %s5560_s21 }
 0x363   : > { %v5184_v14 = vpop.eup %5183 }
 0x364   : > { %v1062_v59 = vpop.xlane.xlu1 %1061  ;;  %v6574_v31 = vpop.xlane.xlu0 %1687  ;;  %v1104_v27 = vmul.f32 %v5184_v14, %v6404_v35 }
 0x365   : > { %v1332_v34 = vpop.xlane.xlu2 %1331  ;;  %5185 = vrcp.f32 %v1062_v59  ;;  %v2007_v59 = vpop.f32.mrf.mxu1 }
 0x366   : > { %v1358_v61 = vsub.f32 %v6414_v22, %v1332_v34  ;;  %v1119_v1 = vpack.c.bf16 %v1104_v27, %v1103_v32 }
 0x368   : > { %v1379_v4 = vmul.f32 1.442695, %v1358_v61  ;;  %1135 = vmatmul.bf16.vlgmr.msrb.gmra.mxu0 %v1119_v1 }
 0x36a   : > { %5187 = vpow2.f32 %v1379_v4 }
 0x36b   : > { %5189 = vrcp.f32 %v1060_v21  ;;  %v5186_v40 = vpop.eup %5185 }
 0x36c   : > { %v6580_v0 = vpop.xlane.xlu1 %1689  ;;  %v1334_v42 = vpop.xlane.xlu0 %1333  ;;  %5191 = vpow2.f32 %v1733_v53  ;;  %v1106_v35 = vmul.f32 %v5186_v40, %v6411_v50 }
 0x36d   : > { %v1359_v32 = vsub.f32 %v6422_v49, %v1334_v42 }
 0x370   : > { %v6582_v51 = vpop.eup %5187 }
 0x371   : > { %v5190_v17 = vpop.eup %5189  ;;  %1411 = vadd.xlane.f32.xlu0 %v6582_v51 }
 0x372   : > { %v1105_v61 = vmul.f32 %v5190_v17, %v6367_v56  ;;  %v6589_v21 = vpop.eup %5191 }
 0x374   : > { %v1066_v22 = vpop.xlane.xlu1 %1065  ;;  %v1064_v55 = vpop.xlane.xlu0 %1063  ;;  %v1120_v4 = vpack.c.bf16 %v1106_v35, %v1105_v61  ;;  %v1381_v35 = vmul.f32 1.442695, %v1359_v32 }
 0x375   : > { %v6587_v54 = vpop.xlane.xlu2 %1691  ;;  %5193 = vrcp.f32 %v1066_v22  ;;  %v6602_v22 = vadd.f32 %v2007_v59, %v6177_v16  ;;  %v2009_v61 = vpop.f32.mrf.mxu1 }
 0x376   : > { %5195 = vrcp.f32 %v1064_v55 }
 0x377   : > { %5197 = vpow2.f32 %v1381_v35 }
 0x378   : > { %1140 = vmatmul.bf16.gmra.mxu0 %v1120_v4 }
 0x379   : > { %1765 = vadd.xlane.f32.xlu0 %v6589_v21 }
 0x37a   : > { %2193 = vrot.lane.b32.xlu2 %v8187_v2, %s5561_s14 }
 0x37b   : > { %v5194_v40 = vpop.eup %5193 }
 0x37c   : > { %v1072_v53 = vpop.xlane.xlu1 %1071  ;;  %v5196_v50 = vpop.eup %5195  ;;  %v1108_v14 = vmul.f32 %v5194_v40, %v6437_v25 }
 0x37d   : > { %v6594_v3 = vpop.xlane.xlu2 %1335  ;;  %v1107_v56 = vmul.f32 %v5196_v50, %v6432_v23  ;;  %v1340_v17 = vpop.xlane.xlu0 %1339  ;;  %v1357_v50 = vsub.f32 %v6362_v62, %v6559_v38 }
 0x37e   : > { %v6607_v40 = vpop.eup %5197  ;;  %v1362_v16 = vsub.f32 %v6444_v57, %v1340_v17 }
 0x37f   : > { %v1121_v1 = vpack.c.bf16 %v1108_v14, %v1107_v56  ;;  %v1377_v32 = vmul.f32 1.442695, %v1357_v50 }
 0x384   : > { %v1344_v34 = vpop.xlane.xlu1 %1343 }
 0x385   : > { %v6599_v27 = vpop.xlane.xlu2 %1693  ;;  %v1070_v49 = vpop.xlane.xlu0 %1069  ;;  %v1364_v42 = vsub.f32 %v6457_v33, %v1344_v34 }
 0x387   : > { %v1391_v14 = vmul.f32 1.442695, %v1364_v42 }
 0x388   : > { %1145 = vmatmul.bf16.gmra.mxu0 %v1121_v1  ;;  %v1387_v1 = vmul.f32 1.442695, %v1362_v16 }
 0x38c   : > { %2045 = vmax.xlane.f32.xlu1 %v6602_v22  ;;  %v1078_v55 = vpop.xlane.xlu1 %1077 }
 0x38d   : > { %v1338_v23 = vpop.xlane.xlu2 %1337 }
 0x38e   : > { %v1361_v25 = vsub.f32 %v6479_v15, %v1338_v23  ;;  %v2012_v15 = vpop.f32.mrf.mxu1  ;;  %v1342_v23 = vpop.xlane.xlu0 %1341 }
 0x38f   : > { %v6617_v34 = vadd.f32 %v2012_v15, %v6202_v30 }
 0x390   : > { %v1385_v4 = vmul.f32 1.442695, %v1361_v25 }
 0x392   : > { %5199 = vpow2.f32 %v1385_v4 }
 0x393   : > { %5201 = vrcp.f32 %v1070_v49 }
 0x394   : > { %1413 = vadd.xlane.f32.xlu1 %v6607_v40  ;;  %v6619_v62 = vpop.xlane.xlu1 %1349 }
 0x395   : > { %v1068_v56 = vpop.xlane.xlu2 %1067 }
 0x396   : > { %5203 = vrcp.f32 %v1068_v56  ;;  %v1076_v56 = vpop.xlane.xlu0 %1075 }
 0x397   : > { %5205 = vpow2.f32 %v1391_v14  ;;  %v6638_v14 = vadd.f32 %v2009_v61, %v6192_v48 }
 0x398   : > { %v6613_v59 = vpop.eup %5199  ;;  %5207 = vpow2.f32 %v1377_v32  ;;  %v1715_v32 = vsub.f32 %v6395_v39, %v6563_v10  ;;  %v8188_v39 = vld [vmem:[#allocation11_spill] sm:$0xff] }
 0x399   : > { %1417 = vadd.xlane.f32.xlu0 %v6613_v59  ;;  %v5202_v33 = vpop.eup %5201  ;;  %5209 = vpow2.f32 %v1387_v1 }
 0x39a   : > { %v1110_v35 = vmul.f32 %v5202_v33, %v6459_v28  ;;  %v1731_v33 = vmul.f32 1.442695, %v1715_v32 }
 0x39c   : > { %v5204_v38 = vpop.eup %5203  ;;  %2049 = vmax.xlane.f32.xlu1 %v6617_v34  ;;  %v1404_v42 = vpop.xlane.xlu1 %1403 }
 0x39d   : > { %v1074_v57 = vpop.xlane.xlu2 %1073  ;;  %v1109_v17 = vmul.f32 %v5204_v38, %v6491_v45  ;;  %v6624_v4 = vpop.eup %5205  ;;  %v1360_v45 = vsub.f32 %v6450_v26, %v6594_v3 }
 0x39e   : > { %v6627_v30 = vpop.eup %5207  ;;  %5211 = vrcp.f32 %v1074_v57  ;;  %v1348_v48 = vpop.xlane.xlu0 %1347 }
 0x39f   : > { %v1122_v25 = vpack.c.bf16 %v1110_v35, %v1109_v17  ;;  %v6629_v49 = vpop.eup %5209  ;;  %5213 = vrcp.f32 %v1072_v53  ;;  %v1383_v16 = vmul.f32 1.442695, %v1360_v45  ;;  %v1363_v35 = vsub.f32 %v6473_v20, %v1342_v23 }
 0x3a1   : > { %1423 = vadd.xlane.f32.xlu0 %v6624_v4  ;;  %1150 = vmatmul.bf16.gmra.mxu0 %v1122_v25  ;;  %5215 = vpow2.f32 %v1383_v16  ;;  %v2014_v16 = vpop.f32.mrf.mxu1 }
 0x3a2   : > { %5217 = vrcp.f32 %v1076_v56  ;;  %v1389_v56 = vmul.f32 1.442695, %v1363_v35  ;;  %v6663_v32 = vadd.f32 %v2014_v16, %v6219_v58 }
 0x3a3   : > { %1409 = vadd.xlane.f32.xlu2 %v6627_v30  ;;  %5219 = vpow2.f32 %v1731_v33 }
 0x3a4   : > { %1419 = vadd.xlane.f32.xlu1 %v6629_v49  ;;  %v5212_v50 = vpop.eup %5211  ;;  %v6645_v1 = vpop.xlane.xlu1 %2039  ;;  %5221 = vrcp.f32 %v1078_v55 }
 0x3a5   : > { %v6635_v28 = vpop.xlane.xlu2 %1345  ;;  %v5214_v15 = vpop.eup %5213  ;;  %v1112_v53 = vmul.f32 %v5212_v50, %v6502_v47  ;;  %5223 = vrcp.f32 %v1404_v42 }
 0x3a6   : > { %v1111_v3 = vmul.f32 %v5214_v15, %v6446_v63  ;;  %v1082_v45 = vpop.xlane.xlu0 %1081 }
 0x3a7   : > { %v6647_v57 = vpop.eup %5215 }
 0x3a8   : > { %v1123_v38 = vpack.c.bf16 %v1112_v53, %v1111_v3  ;;  %v5218_v10 = vpop.eup %5217 }
 0x3a9   : > { %v6654_v61 = vpop.eup %5219  ;;  %v1113_v25 = vmul.f32 %v5218_v10, %v6489_v60 }
 0x3aa   : > { %v5222_v17 = vpop.eup %5221 }
 0x3ab   : > { %2047 = vmax.xlane.f32.xlu2 %v6638_v14  ;;  %v1114_v55 = vmul.f32 %v5222_v17, %v6475_v11  ;;  %v5224_v20 = vpop.eup %5223  ;;  %v8189_v11 = vld [vmem:[#allocation12_spill] sm:$0xff] }
 0x3ac   : > { %v1406_v63 = vpop.xlane.xlu1 %1405  ;;  %v1450_v53 = vmul.f32 %v5224_v20, %v6500_v13 }
 0x3ad   : > { %v1080_v26 = vpop.xlane.xlu2 %1079  ;;  %v1124_v15 = vpack.c.bf16 %v1114_v55, %v1113_v25 }
 0x3ae   : > { %v2038_v3 = vpop.xlane.xlu0 %2037 }
 0x3b1   : > { %1155 = vmatmul.bf16.gmra.mxu0 %v1123_v38 }
 0x3b3   : > { %1415 = vadd.xlane.f32.xlu2 %v6647_v57 }
 0x3b4   : > { %v6665_v23 = vpop.xlane.xlu1 %1695 }
 0x3b5   : > { %2191 = vrot.lane.b32.xlu0 %v8188_v39, %s5561_s14  ;;  %v6652_v47 = vpop.xlane.xlu2 %1351 }
 0x3b6   : > { %v1368_v55 = vsub.f32 %v6540_v46, %v6652_v47 }
 0x3b8   : > { %v1399_v20 = vmul.f32 1.442695, %v1368_v55 }
 0x3bb   : > { %1763 = vadd.xlane.f32.xlu2 %v6654_v61 }
 0x3bc   : > { %v6677_v35 = vpop.xlane.xlu1 %1697 }
 0x3bd   : > { %v1402_v50 = vpop.xlane.xlu2 %1401  ;;  %1839 = vrot.lane.b32.xlu1 %v8187_v2, %s5560_s21 }
 0x3be   : > { %5225 = vrcp.f32 %v1402_v50 }
 0x3bf   : > { %5227 = vrcp.f32 %v1080_v26  ;;  %v1366_v26 = vsub.f32 %v6498_v36, %v1348_v48  ;;  %v1086_v48 = vpop.xlane.xlu0 %1085 }
 0x3c0   : > { %5229 = vpow2.f32 %v1389_v56 }
 0x3c1   : > { %1160 = vmatmul.bf16.gmra.mxu0 %v1124_v15  ;;  %5231 = vrcp.f32 %v1082_v45  ;;  %v1395_v25 = vmul.f32 1.442695, %v1366_v26  ;;  %v2069_v15 = vsub.f32 %v6523_v5, %v2038_v3 }
 0x3c3   : > { %2051 = vmax.xlane.f32.xlu2 %v6663_v32  ;;  %5233 = vpow2.f32 %v1395_v25 }
 0x3c4   : > { %v5226_v60 = vpop.eup %5225 }
 0x3c5   : > { %v1084_v2 = vpop.xlane.xlu2 %1083  ;;  %2189 = vrot.lane.b32.xlu1 %v8189_v11, %s5561_s14  ;;  %v1449_v42 = vmul.f32 %v5226_v60, %v6552_v24  ;;  %v5228_v33 = vpop.eup %5227 }
 0x3c6   : > { %v6672_v38 = vpop.eup %5229  ;;  %v1115_v17 = vmul.f32 %v5228_v33, %v6527_v8  ;;  %v2017_v24 = vpop.f32.mrf.mxu1  ;;  %5235 = vrcp.f32 %v1084_v2 }
 0x3c7   : > { %v1465_v58 = vpack.c.bf16 %v1450_v53, %v1449_v42  ;;  %v5232_v10 = vpop.eup %5231  ;;  %v6685_v36 = vadd.f32 %v2017_v24, %v6233_v43  ;;  %5237 = vrcp.f32 %v1406_v63  ;;  %v1663_v8 = vpop.f32.mrf.mxu3  ;;  %v1717_v24 = vsub.f32 %v6409_v12, %v6574_v31 }
 0x3c8   : > { %v1116_v13 = vmul.f32 %v5232_v10, %v6512_v52  ;;  %5239 = vrcp.f32 %v1086_v48  ;;  %v1718_v12 = vsub.f32 %v6425_v37, %v6580_v0  ;;  %v8192_v0 = vld [vmem:[#allocation15_spill] sm:$0xff] }
 0x3c9   : > { %1513 = vmatmul.bf16.vlgmr.msrb.gmra.mxu2 %v1465_v58  ;;  %v6690_v52 = vpop.eup %5233  ;;  %v2085_v58 = vmul.f32 1.442695, %v2069_v15 }
 0x3ca   : > { %v1125_v50 = vpack.c.bf16 %v1116_v13, %v1115_v17  ;;  %v6713_v13 = vadd.f32 %v1663_v8, %v6233_v43 }
 0x3cb   : > { %1421 = vadd.xlane.f32.xlu2 %v6672_v38 }
 0x3cc   : > { %v5236_v56 = vpop.eup %5235 }
 0x3cd   : > { %v6679_v45 = vpop.xlane.xlu2 %2041  ;;  %1837 = vrot.lane.b32.xlu1 %v8188_v39, %s5560_s21  ;;  %v5238_v60 = vpop.eup %5237  ;;  %v1117_v42 = vmul.f32 %v5236_v56, %v6557_v29 }
 0x3ce   : > { %v5240_v2 = vpop.eup %5239  ;;  %v2019_v63 = vpop.f32.mrf.mxu1  ;;  %v1451_v26 = vmul.f32 %v5238_v60, %v6525_v19 }
 0x3cf   : > { %v6696_v47 = vadd.f32 %v2019_v63, %v6247_v44  ;;  %v1118_v33 = vmul.f32 %v5240_v2, %v6537_v9  ;;  %v1665_v3 = vpop.f32.mrf.mxu3  ;;  %v6741_v60 = vpop.xlane.xlu0 %2043 }
 0x3d0   : > { %v6725_v43 = vadd.f32 %v1665_v3, %v6247_v44  ;;  %v8191_v44 = vld [vmem:[#allocation13_spill] sm:$0xff] }
 0x3d1   : > { %1165 = vmatmul.bf16.gmra.mxu0 %v1125_v50  ;;  %v1126_v10 = vpack.c.bf16 %v1118_v33, %v1117_v42 }
 0x3d3   : > { %2053 = vmax.xlane.f32.xlu2 %v6685_v36 }
 0x3d4   : > { %v1842_v39 = vpop.permute.xlu1 %1841 }
 0x3d5   : > { %v1408_v16 = vpop.xlane.xlu2 %1407  ;;  %1863 = vmatpush.bf16.msra.mxu0 %v1842_v39  ;;  %v1735_v39 = vmul.f32 1.442695, %v1717_v24 }
 0x3d6   : > { %5241 = vrcp.f32 %v1408_v16  ;;  %v2022_v9 = vpop.f32.mrf.mxu1  ;;  %v1367_v16 = vsub.f32 %v6487_v41, %v6619_v62  ;;  %v1737_v41 = vmul.f32 1.442695, %v1718_v12  ;;  %v2070_v62 = vsub.f32 %v8191_v44, %v6645_v1 }
 0x3d7   : > { %5243 = vpow2.f32 %v1399_v20  ;;  %v6708_v19 = vpop.f32.mrf.mxu3  ;;  %v6719_v48 = vadd.f32 %v2022_v9, %v6260_v6 }
 0x3d8   : > { %5245 = vpow2.f32 %v2085_v58  ;;  %v1397_v31 = vmul.f32 1.442695, %v1367_v16  ;;  %v2087_v37 = vmul.f32 1.442695, %v2070_v62 }
 0x3db   : > { %1427 = vadd.xlane.f32.xlu2 %v6690_v52 }
 0x3dc   : > { %v5242_v53 = vpop.eup %5241 }
 0x3dd   : > { %v2194_v46 = vpop.permute.xlu2 %2193  ;;  %v1452_v5 = vmul.f32 %v5242_v53, %v6569_v7  ;;  %v6702_v29 = vpop.eup %5243  ;;  %v1365_v7 = vsub.f32 %v6516_v18, %v6635_v28  ;;  %v8190_v28 = vld [vmem:[#allocation14_spill] sm:$0xff] }
 0x3de   : > { %2218 = vmatpush.bf16.msra.mxu2 %v2194_v46  ;;  %v6705_v25 = vpop.eup %5245  ;;  %v2024_v55 = vpop.f32.mrf.mxu1  ;;  %v8193_v46 = vld [vmem:[#allocation21_spill] sm:$0xff] }
 0x3df   : > { %2055 = vmax.xlane.f32.xlu0 %v6696_v47  ;;  %v1466_v17 = vpack.c.bf16 %v1452_v5, %v1451_v26  ;;  %v1393_v50 = vmul.f32 1.442695, %v1365_v7  ;;  %v1670_v18 = vpop.f32.mrf.mxu3  ;;  %v1721_v33 = vsub.f32 %v8193_v46, %v6665_v23  ;;  %v8194_v5 = vld [vmem:[#allocation24_spill] sm:$0xff]  ;;  %v8195_v23 = vld [vmem:[#allocation19_spill] sm:$0xff] }
 0x3e0   : > { %v6731_v8 = vadd.f32 %v1670_v18, %v8190_v28  ;;  %v2071_v3 = vsub.f32 %v8194_v5, %v6679_v45  ;;  %v1719_v45 = vsub.f32 %v8195_v23, %v6587_v54  ;;  %v8196_v23 = vld [vmem:[#allocation16_spill] sm:$0xff] }
 0x3e1   : > { %1170 = vmatmul.bf16.gmra.mxu0 %v1126_v10  ;;  %1518 = vmatmul.bf16.gmra.mxu2 %v1466_v17  ;;  %5247 = vpow2.f32 %v1393_v50  ;;  %v1743_v17 = vmul.f32 1.442695, %v1721_v33 }
 0x3e2   : > { %5249 = vpow2.f32 %v1735_v39  ;;  %v2089_v9 = vmul.f32 1.442695, %v2071_v3  ;;  %v1739_v50 = vmul.f32 1.442695, %v1719_v45 }
 0x3e3   : > { %1431 = vadd.xlane.f32.xlu2 %v6702_v29  ;;  %5251 = vpow2.f32 %v1397_v31 }
 0x3e4   : > { %5253 = vpow2.f32 %v1737_v41  ;;  %v1412_v26 = vpop.xlane.xlu0 %1411 }
 0x3e5   : > { %5255 = vpow2.f32 %v2087_v37 }
 0x3e6   : > { %v2027_v20 = vpop.f32.mrf.mxu1 }
 0x3e7   : > { %2117 = vadd.xlane.f32.xlu0 %v6705_v25  ;;  %v6733_v56 = vpop.eup %5247  ;;  %v6745_v2 = vadd.f32 %v2027_v20, %v8192_v0 }
 0x3e8   : > { %v6739_v15 = vpop.eup %5249 }
 0x3e9   : > { %v6747_v63 = vpop.eup %5251 }
 0x3ea   : > { %v6752_v53 = vpop.eup %5253 }
 0x3eb   : > { %1699 = vmax.xlane.f32.xlu2 %v6713_v13  ;;  %v6759_v10 = vpop.eup %5255 }
 0x3ec   : > { %v6771_v24 = vpop.xlane.xlu0 %1765 }
 0x3ef   : > { %2057 = vmax.xlane.f32.xlu0 %v6719_v48 }
 0x3f3   : > { %1701 = vmax.xlane.f32.xlu2 %v6725_v43 }
 0x3f7   : > { %1705 = vmax.xlane.f32.xlu0 %v6731_v8  ;;  %1425 = vadd.xlane.f32.xlu1 %v6733_v56 }
 0x3fb   : > { %1767 = vadd.xlane.f32.xlu2 %v6739_v15 }
 0x3ff   : > { %2061 = vmax.xlane.f32.xlu0 %v6745_v2  ;;  %v2046_v42 = vpop.xlane.xlu1 %2045  ;;  %1429 = vadd.xlane.f32.xlu1 %v6747_v63 }
 0x400   : > { %v2073_v1 = vsub.f32 %v6602_v22, %v2046_v42  ;;  %v6763_v22 = vadd.f32 %v2024_v55, %v8190_v28 }
 0x402   : > { %v2093_v58 = vmul.f32 1.442695, %v2073_v1 }
 0x403   : > { %1769 = vadd.xlane.f32.xlu2 %v6752_v53 }
 0x404   : > { %5257 = vpow2.f32 %v2093_v58 }
 0x405   : > { %5259 = vpow2.f32 %v1743_v17 }
 0x406   : > { %5261 = vpow2.f32 %v2089_v9 }
 0x407   : > { %2119 = vadd.xlane.f32.xlu1 %v6759_v10  ;;  %v1414_v55 = vpop.xlane.xlu1 %1413  ;;  %5263 = vpow2.f32 %v1739_v50 }
 0x408   : > { %5265 = vrcp.f32 %v1412_v26 }
 0x40a   : > { %v6765_v7 = vpop.eup %5257 }
 0x40b   : > { %2059 = vmax.xlane.f32.xlu2 %v6763_v22  ;;  %2125 = vadd.xlane.f32.xlu0 %v6765_v7  ;;  %v6773_v39 = vpop.eup %5259 }
 0x40c   : > { %v6775_v16 = vpop.eup %5261  ;;  %v1418_v18 = vpop.xlane.xlu0 %1417 }
 0x40d   : > { %v6779_v31 = vpop.eup %5263 }
 0x40e   : > { %v5266_v54 = vpop.eup %5265 }
 0x40f   : > { %v6782_v41 = vpop.xlane.xlu1 %2049  ;;  %v1454_v20 = vmul.f32 %v5266_v54, %v6582_v51  ;;  %v1673_v54 = vpop.f32.mrf.mxu3 }
 0x413   : > { %2121 = vadd.xlane.f32.xlu2 %v6775_v16  ;;  %1775 = vadd.xlane.f32.xlu0 %v6773_v39 }
 0x414   : > { %v1424_v37 = vpop.xlane.xlu0 %1423 }
 0x416   : > { %v1410_v12 = vpop.xlane.xlu2 %1409 }
 0x417   : > { %5267 = vrcp.f32 %v1410_v12  ;;  %v1420_v33 = vpop.xlane.xlu1 %1419 }
 0x41b   : > { %1771 = vadd.xlane.f32.xlu2 %v6779_v31 }
 0x41d   : > { %v5268_v28 = vpop.eup %5267 }
 0x41e   : > { %v2048_v44 = vpop.xlane.xlu2 %2047  ;;  %v1453_v62 = vmul.f32 %v5268_v28, %v6627_v30 }
 0x41f   : > { %v2074_v42 = vsub.f32 %v6638_v14, %v2048_v44  ;;  %v2029_v14 = vpop.f32.mrf.mxu1 }
 0x420   : > { %1835 = vrot.lane.b32.xlu1 %v8189_v11, %s5560_s21  ;;  %v1467_v1 = vpack.c.bf16 %v1454_v20, %v1453_v62  ;;  %v6797_v45 = vadd.f32 %v2029_v14, %v8196_v23  ;;  %v6804_v62 = vadd.f32 %v1673_v54, %v8192_v0 }
 0x421   : > { %v2095_v58 = vmul.f32 1.442695, %v2074_v42 }
 0x422   : > { %1523 = vmatmul.bf16.gmra.mxu2 %v1467_v1  ;;  %v8198_v1 = vld [vmem:[#allocation22_spill] sm:$0xff] }
 0x423   : > { %5269 = vpow2.f32 %v2095_v58 }
 0x424   : > { %5271 = vrcp.f32 %v1414_v55  ;;  %v8197_v55 = vld [vmem:[#allocation23_spill] sm:$0xff] }
 0x425   : > { %v1722_v12 = vsub.f32 %v8197_v55, %v6677_v35  ;;  %v2072_v35 = vsub.f32 %v8198_v1, %v6741_v60  ;;  %v1675_v60 = vpop.f32.mrf.mxu3 }
 0x426   : > { %v1416_v46 = vpop.xlane.xlu2 %1415 }
 0x427   : > { %5273 = vrcp.f32 %v1416_v46  ;;  %v2192_v26 = vpop.permute.xlu0 %2191  ;;  %v1745_v28 = vmul.f32 1.442695, %v1722_v12 }
 0x428   : > { %2219 = vmatpush.bf16.msra.mxu2 %v2192_v26  ;;  %5275 = vrcp.f32 %v1420_v33 }
 0x429   : > { %v6789_v5 = vpop.eup %5269  ;;  %5277 = vrcp.f32 %v1418_v18  ;;  %v6809_v18 = vpop.f32.mrf.mxu1 }
 0x42a   : > { %2127 = vadd.xlane.f32.xlu2 %v6789_v5  ;;  %v5272_v51 = vpop.eup %5271  ;;  %5279 = vpow2.f32 %v1745_v28 }
 0x42b   : > { %v1455_v11 = vmul.f32 %v5272_v51, %v6607_v40 }
 0x42d   : > { %v5274_v30 = vpop.eup %5273  ;;  %v1678_v28 = vpop.f32.mrf.mxu3 }
 0x42e   : > { %v6792_v3 = vpop.xlane.xlu2 %1763  ;;  %v1456_v17 = vmul.f32 %v5274_v30, %v6647_v57  ;;  %v5276_v20 = vpop.eup %5275 }
 0x42f   : > { %v1840_v9 = vpop.permute.xlu1 %1839  ;;  %v5278_v58 = vpop.eup %5277  ;;  %v1458_v46 = vmul.f32 %v5276_v20, %v6629_v49 }
 0x430   : > { %1864 = vmatpush.bf16.msra.mxu0 %v1840_v9  ;;  %v1468_v50 = vpack.c.bf16 %v1456_v17, %v1455_v11  ;;  %v1457_v0 = vmul.f32 %v5278_v58, %v6613_v59  ;;  %v6813_v51 = vpop.eup %5279  ;;  %v8201_v58 = vld [vmem:[#allocation17_spill] sm:$0xff] }
 0x431   : > { %v2034_v49 = vpop.f32.mrf.mxu1 }
 0x432   : > { %2063 = vmax.xlane.f32.xlu2 %v6797_v45  ;;  %1528 = vmatmul.bf16.gmra.mxu2 %v1468_v50  ;;  %v1469_v30 = vpack.c.bf16 %v1458_v46, %v1457_v0  ;;  %v8199_v50 = vld [vmem:[#allocation18_spill] sm:$0xff]  ;;  %v6838_v46 = vadd.f32 %v1678_v28, %v8201_v58 }
 0x433   : > { %v6823_v55 = vadd.f32 %v2034_v49, %v8199_v50 }
 0x436   : > { %v2052_v44 = vpop.xlane.xlu2 %2051 }
 0x437   : > { %v2076_v40 = vsub.f32 %v6663_v32, %v2052_v44  ;;  %v2190_v57 = vpop.permute.xlu1 %2189  ;;  %v2091_v32 = vmul.f32 1.442695, %v2072_v35  ;;  %v6835_v35 = vadd.f32 %v6708_v19, %v6260_v6  ;;  %v2075_v19 = vsub.f32 %v6617_v34, %v6782_v41 }
 0x438   : > { %2220 = vmatpush.bf16.msra.mxu2 %v2190_v57 }
 0x439   : > { %v2099_v42 = vmul.f32 1.442695, %v2076_v40 }
 0x43a   : > { %1707 = vmax.xlane.f32.xlu2 %v6804_v62 }
 0x43b   : > { %5281 = vpow2.f32 %v2099_v42 }
 0x43c   : > { %5283 = vpow2.f32 %v2091_v32 }
 0x43e   : > { %v1422_v33 = vpop.xlane.xlu2 %1421 }
 0x43f   : > { %v1838_v26 = vpop.permute.xlu1 %1837  ;;  %5285 = vrcp.f32 %v1422_v33 }
 0x440   : > { %1865 = vmatpush.bf16.msra.mxu0 %v1838_v26  ;;  %5287 = vrcp.f32 %v1424_v37  ;;  %v8200_v37 = vld [vmem:[#allocation20_spill] sm:$0xff]  ;;  %v2097_v26 = vmul.f32 1.442695, %v2075_v19 }
 0x441   : > { %v6815_v14 = vpop.eup %5281  ;;  %v1720_v44 = vsub.f32 %v8200_v37, %v6599_v27  ;;  %v1680_v27 = vpop.f32.mrf.mxu3 }
 0x442   : > { %1777 = vadd.xlane.f32.xlu2 %v6813_v51  ;;  %1533 = vmatmul.bf16.gmra.mxu2 %v1469_v30  ;;  %v6820_v17 = vpop.eup %5283  ;;  %v6855_v30 = vadd.f32 %v1675_v60, %v8196_v23 }
 0x443   : > { %2131 = vadd.xlane.f32.xlu0 %v6815_v14  ;;  %v1741_v20 = vmul.f32 1.442695, %v1720_v44 }
 0x445   : > { %v5286_v9 = vpop.eup %5285 }
 0x446   : > { %v2054_v11 = vpop.xlane.xlu2 %2053  ;;  %v5288_v54 = vpop.eup %5287  ;;  %v1459_v40 = vmul.f32 %v5286_v9, %v6672_v38  ;;  %v6844_v38 = vadd.f32 %v1680_v27, %v8199_v50 }
 0x447   : > { %v2077_v59 = vsub.f32 %v6685_v36, %v2054_v11  ;;  %v1460_v57 = vmul.f32 %v5288_v54, %v6624_v4 }
 0x449   : > { %v2101_v12 = vmul.f32 1.442695, %v2077_v59  ;;  %v1470_v42 = vpack.c.bf16 %v1460_v57, %v1459_v40 }
 0x44a   : > { %2123 = vadd.xlane.f32.xlu1 %v6820_v17 }
 0x44b   : > { %5289 = vpow2.f32 %v2101_v12  ;;  %2067 = vmax.xlane.f32.xlu0 %v6823_v55 }
 0x44c   : > { %5291 = vpow2.f32 %v1741_v20 }
 0x44d   : > { %5293 = vpow2.f32 %v2097_v26 }
 0x44e   : > { %v1428_v36 = vpop.xlane.xlu2 %1427 }
 0x451   : > { %v6831_v1 = vpop.eup %5289 }
 0x452   : > { %v2056_v32 = vpop.xlane.xlu0 %2055  ;;  %1538 = vmatmul.bf16.gmra.mxu2 %v1470_v42  ;;  %2133 = vadd.xlane.f32.xlu2 %v6831_v1  ;;  %v6846_v33 = vpop.eup %5291 }
 0x453   : > { %1711 = vmax.xlane.f32.xlu0 %v6838_v46  ;;  %1703 = vmax.xlane.f32.xlu1 %v6835_v35  ;;  %v6860_v54 = vpop.eup %5293 }
 0x456   : > { %v1432_v4 = vpop.xlane.xlu2 %1431 }
 0x45a   : > { %v6848_v6 = vpop.xlane.xlu0 %2117  ;;  %1713 = vmax.xlane.f32.xlu2 %v6844_v38 }
 0x45b   : > { %1773 = vadd.xlane.f32.xlu1 %v6846_v33 }
 0x45e   : > { %v1700_v0 = vpop.xlane.xlu2 %1699 }
 0x45f   : > { %v1723_v20 = vsub.f32 %v6713_v13, %v1700_v0 }
 0x461   : > { %v1747_v19 = vmul.f32 1.442695, %v1723_v20 }
 0x462   : > { %v2058_v49 = vpop.xlane.xlu0 %2057 }
 0x463   : > { %v2079_v11 = vsub.f32 %v6719_v48, %v2058_v49  ;;  %1709 = vmax.xlane.f32.xlu1 %v6855_v30  ;;  %v2078_v48 = vsub.f32 %v6696_v47, %v2056_v32 }
 0x465   : > { %v2105_v59 = vmul.f32 1.442695, %v2079_v11  ;;  %v2103_v44 = vmul.f32 1.442695, %v2078_v48 }
 0x466   : > { %v1702_v9 = vpop.xlane.xlu2 %1701 }
 0x467   : > { %5295 = vpow2.f32 %v2105_v59  ;;  %v1724_v50 = vsub.f32 %v6725_v43, %v1702_v9 }
 0x468   : > { %5297 = vrcp.f32 %v1428_v36 }
 0x469   : > { %v1749_v12 = vmul.f32 1.442695, %v1724_v50 }
 0x46a   : > { %v1706_v34 = vpop.xlane.xlu0 %1705  ;;  %v1426_v41 = vpop.xlane.xlu1 %1425 }
 0x46b   : > { %5299 = vpow2.f32 %v1749_v12  ;;  %v1726_v23 = vsub.f32 %v6731_v8, %v1706_v34  ;;  %2129 = vadd.xlane.f32.xlu1 %v6860_v54  ;;  %v6874_v8 = vadd.f32 %v6809_v18, %v8201_v58  ;;  %v6884_v58 = vpop.f32.mrf.mxu0 }
 0x46c   : > { %5301 = vrcp.f32 %v1426_v41 }
 0x46d   : > { %v6865_v60 = vpop.eup %5295  ;;  %v1753_v28 = vmul.f32 1.442695, %v1726_v23 }
 0x46e   : > { %2137 = vadd.xlane.f32.xlu2 %v6865_v60  ;;  %v6868_v43 = vpop.xlane.xlu2 %1767  ;;  %v5298_v37 = vpop.eup %5297 }
 0x46f   : > { %5303 = vpow2.f32 %v1753_v28  ;;  %v1462_v57 = vmul.f32 %v5298_v37, %v6690_v52 }
 0x470   : > { %5305 = vpow2.f32 %v2103_v44 }
 0x471   : > { %v6870_v40 = vpop.eup %5299 }
 0x472   : > { %v5302_v36 = vpop.eup %5301  ;;  %1781 = vadd.xlane.f32.xlu0 %v6870_v40  ;;  %v1430_v32 = vpop.xlane.xlu1 %1429 }
 0x473   : > { %2065 = vmax.xlane.f32.xlu1 %v6874_v8  ;;  %v1461_v47 = vmul.f32 %v5302_v36, %v6733_v56  ;;  %5307 = vrcp.f32 %v1430_v32  ;;  %v6890_v49 = vpop.f32.mrf.mxu0  ;;  %v2062_v11 = vpop.xlane.xlu0 %2061 }
 0x474   : > { %5309 = vrcp.f32 %v1432_v4  ;;  %v2081_v12 = vsub.f32 %v6745_v2, %v2062_v11 }
 0x475   : > { %v6881_v42 = vpop.eup %5303  ;;  %v1471_v27 = vpack.c.bf16 %v1462_v57, %v1461_v47  ;;  %5311 = vpow2.f32 %v1747_v19 }
 0x476   : > { %1785 = vadd.xlane.f32.xlu2 %v6881_v42  ;;  %v1770_v18 = vpop.xlane.xlu2 %1769  ;;  %v6886_v26 = vpop.eup %5305  ;;  %v2109_v23 = vmul.f32 1.442695, %v2081_v12 }
 0x477   : > { %1543 = vmatmul.bf16.gmra.mxu2 %v1471_v27 }
 0x479   : > { %v5308_v52 = vpop.eup %5307 }
 0x47a   : > { %v5310_v0 = vpop.eup %5309  ;;  %v1463_v9 = vmul.f32 %v5308_v52, %v6747_v63  ;;  %v2120_v34 = vpop.xlane.xlu1 %2119 }
 0x47b   : > { %2135 = vadd.xlane.f32.xlu1 %v6886_v26  ;;  %v6893_v50 = vpop.eup %5311  ;;  %v1464_v4 = vmul.f32 %v5310_v0, %v6702_v29  ;;  %v6905_v63 = vpop.f32.mrf.mxu0 }
 0x47d   : > { %v1472_v41 = vpack.c.bf16 %v1464_v4, %v1463_v9 }
 0x47e   : > { %v2060_v13 = vpop.xlane.xlu2 %2059 }
 0x47f   : > { %v2080_v56 = vsub.f32 %v6763_v22, %v2060_v13  ;;  %v6899_v22 = vpop.f32.mrf.mxu2 }
 0x481   : > { %v2107_v59 = vmul.f32 1.442695, %v2080_v56 }
 0x483   : > { %5313 = vpow2.f32 %v2107_v59  ;;  %1779 = vadd.xlane.f32.xlu1 %v6893_v50  ;;  %v6917_v27 = vpop.f32.mrf.mxu0  ;;  %v2126_v59 = vpop.xlane.xlu0 %2125 }
 0x484   : > { %5315 = vrcp.f32 %v6792_v3 }
 0x485   : > { %5317 = vrcp.f32 %v2120_v34 }
 0x486   : > { %5319 = vrcp.f32 %v6771_v24  ;;  %v2122_v29 = vpop.xlane.xlu2 %2121 }
 0x487   : > { %1548 = vmatmul.bf16.gmra.mxu2 %v1472_v41  ;;  %5321 = vrcp.f32 %v6848_v6  ;;  %v6913_v57 = vpop.f32.mrf.mxu2 }
 0x488   : > { %5323 = vpow2.f32 %v2109_v23 }
 0x489   : > { %v6901_v48 = vpop.eup %5313  ;;  %5325 = vrcp.f32 %v1770_v18 }
 0x48a   : > { %v5316_v2 = vpop.eup %5315  ;;  %5327 = vrcp.f32 %v6868_v43 }
 0x48b   : > { %2139 = vadd.xlane.f32.xlu1 %v6901_v48  ;;  %v5318_v28 = vpop.eup %5317  ;;  %v1811_v44 = vmul.f32 %v5316_v2, %v6654_v61  ;;  %v6922_v56 = vpop.f32.mrf.mxu0 }
 0x48c   : > { %v5320_v3 = vpop.eup %5319  ;;  %v2166_v36 = vmul.f32 %v5318_v28, %v6759_v10  ;;  %v6932_v34 = vpop.xlane.xlu0 %1775 }
 0x48d   : > { %v5322_v37 = vpop.eup %5321  ;;  %v1812_v24 = vmul.f32 %v5320_v3, %v6589_v21 }
 0x48e   : > { %v6910_v47 = vpop.eup %5323  ;;  %v2165_v20 = vmul.f32 %v5322_v37, %v6705_v25  ;;  %v1772_v52 = vpop.xlane.xlu2 %1771 }
 0x48f   : > { %v1827_v32 = vpack.c.bf16 %v1812_v24, %v1811_v44  ;;  %v6920_v61 = vpop.f32.mrf.mxu2  ;;  %v5326_v21 = vpop.eup %5325 }
 0x490   : > { %v2181_v19 = vpack.c.bf16 %v2166_v36, %v2165_v20  ;;  %v5328_v13 = vpop.eup %5327  ;;  %v1814_v25 = vmul.f32 %v5326_v21, %v6752_v53 }
 0x491   : > { %v1813_v0 = vmul.f32 %v5328_v13, %v6739_v15 }
 0x492   : > { %v1836_v6 = vpop.permute.xlu1 %1835 }
 0x493   : > { %2141 = vadd.xlane.f32.xlu1 %v6910_v47  ;;  %1866 = vmatpush.bf16.msra.mxu0 %v1836_v6  ;;  %v1828_v9 = vpack.c.bf16 %v1814_v25, %v1813_v0  ;;  %v6928_v18 = vpop.f32.mrf.mxu0 }
 0x496   : > { %1867 = vmatmul.bf16.vlgmr.msra.gmra.mxu0 %v1827_v32 }
 0x497   : > { %2221 = vmatmul.bf16.vlgmr.msra.gmra.mxu2 %v2181_v19  ;;  %v6926_v11 = vpop.f32.mrf.mxu2 }
 0x49b   : > { %v6935_v2 = vpop.f32.mrf.mxu0 }
 0x49d   : > { %v2128_v10 = vpop.xlane.xlu2 %2127 }
 0x4a3   : > { %v6942_v3 = vpop.f32.mrf.mxu0 }
 0x4a5   : > { %v2064_v4 = vpop.xlane.xlu2 %2063  ;;  %v6930_v43 = vpop.f32.mrf.mxu2 }
 0x4a6   : > { %1872 = vmatmul.bf16.gmra.mxu0 %v1828_v9 }
 0x4ab   : > { %v6947_v32 = vpop.f32.mrf.mxu0 }
 0x4ad   : > { %v1708_v12 = vpop.xlane.xlu2 %1707  ;;  %v6937_v15 = vpop.f32.mrf.mxu2 }
 0x4ae   : > { %v1727_v41 = vsub.f32 %v6804_v62, %v1708_v12  ;;  %v2082_v12 = vsub.f32 %v6797_v45, %v2064_v4 }
 0x4b0   : > { %v1755_v23 = vmul.f32 1.442695, %v1727_v41  ;;  %v2111_v41 = vmul.f32 1.442695, %v2082_v12  ;;  %v5016_v12 = vpack.i.bf16 %v6913_v57, %v6899_v22 }
 0x4b2   : > { %5329 = vpow2.f32 %v1755_v23 }
 0x4b3   : > { %5331 = vrcp.f32 %v2122_v29 }
 0x4b5   : > { %v6945_v62 = vpop.f32.mrf.mxu2  ;;  %v1778_v4 = vpop.xlane.xlu2 %1777 }
 0x4b6   : > { %v2132_v53 = vpop.xlane.xlu0 %2131 }
 0x4b8   : > { %v6939_v28 = vpop.eup %5329 }
 0x4b9   : > { %1787 = vadd.xlane.f32.xlu2 %v6939_v28  ;;  %v5332_v6 = vpop.eup %5331 }
 0x4ba   : > { %v2167_v19 = vmul.f32 %v5332_v6, %v6775_v16 }
 0x4bd   : > { %v2124_v37 = vpop.xlane.xlu1 %2123 }
 0x4be   : > { %v2068_v44 = vpop.xlane.xlu0 %2067  ;;  %5333 = vrcp.f32 %v2124_v37 }
 0x4bf   : > { %v2084_v36 = vsub.f32 %v6823_v55, %v2068_v44  ;;  %v6954_v55 = vpop.f32.mrf.mxu2 }
 0x4c1   : > { %v2115_v24 = vmul.f32 1.442695, %v2084_v36 }
 0x4c3   : > { %5335 = vpow2.f32 %v2115_v24 }
 0x4c4   : > { %v5334_v20 = vpop.eup %5333  ;;  %5337 = vrcp.f32 %v2128_v10 }
 0x4c5   : > { %v2168_v21 = vmul.f32 %v5334_v20, %v6820_v17  ;;  %5339 = vrcp.f32 %v2126_v59  ;;  %v6958_v17 = vpop.f32.mrf.mxu0 }
 0x4c6   : > { %v1704_v13 = vpop.xlane.xlu1 %1703 }
 0x4c7   : > { %v1725_v29 = vsub.f32 %v6835_v35, %v1704_v13  ;;  %v2182_v25 = vpack.c.bf16 %v2168_v21, %v2167_v19  ;;  %v6964_v59 = vpop.f32.mrf.mxu2  ;;  %v1712_v21 = vpop.xlane.xlu0 %1711 }
 0x4c9   : > { %v6952_v0 = vpop.eup %5335  ;;  %v1751_v9 = vmul.f32 1.442695, %v1725_v29  ;;  %2226 = vmatmul.bf16.gmra.mxu2 %v2182_v25 }
 0x4ca   : > { %2147 = vadd.xlane.f32.xlu2 %v6952_v0  ;;  %v5338_v35 = vpop.eup %5337 }
 0x4cb   : > { %5341 = vpow2.f32 %v1751_v9  ;;  %v5340_v23 = vpop.eup %5339  ;;  %v2170_v10 = vmul.f32 %v5338_v35, %v6789_v5  ;;  %v1729_v9 = vsub.f32 %v6838_v46, %v1712_v21 }
 0x4cc   : > { %5343 = vrcp.f32 %v1772_v52  ;;  %v2169_v52 = vmul.f32 %v5340_v23, %v6765_v7  ;;  %v2134_v7 = vpop.xlane.xlu2 %2133 }
 0x4cd   : > { %v6970_v29 = vpop.f32.mrf.mxu0 }
 0x4ce   : > { %v1774_v16 = vpop.xlane.xlu1 %1773  ;;  %v2183_v19 = vpack.c.bf16 %v2170_v10, %v2169_v52 }
 0x4cf   : > { %5345 = vrcp.f32 %v1774_v16 }
 0x4d0   : > { %5347 = vpow2.f32 %v2111_v41 }
 0x4d1   : > { %v6960_v37 = vpop.eup %5341 }
 0x4d2   : > { %v5344_v44 = vpop.eup %5343  ;;  %1783 = vadd.xlane.f32.xlu0 %v6960_v37 }
 0x4d3   : > { %v1815_v24 = vmul.f32 %v5344_v44, %v6779_v31  ;;  %v6977_v31 = vpop.f32.mrf.mxu2 }
 0x4d4   : > { %v1714_v52 = vpop.xlane.xlu2 %1713 }
 0x4d5   : > { %v5346_v45 = vpop.eup %5345 }
 0x4d6   : > { %v1710_v36 = vpop.xlane.xlu1 %1709  ;;  %v1816_v6 = vmul.f32 %v5346_v45, %v6846_v33  ;;  %v6972_v25 = vpop.eup %5347 }
 0x4d7   : > { %v1728_v20 = vsub.f32 %v6855_v30, %v1710_v36  ;;  %v1759_v30 = vmul.f32 1.442695, %v1729_v9 }
 0x4d8   : > { %v1829_v13 = vpack.c.bf16 %v1816_v6, %v1815_v24 }
 0x4d9   : > { %v1757_v5 = vmul.f32 1.442695, %v1728_v20  ;;  %2231 = vmatmul.bf16.gmra.mxu2 %v2183_v19 }
 0x4da   : > { %1877 = vmatmul.bf16.gmra.mxu0 %v1829_v13  ;;  %2143 = vadd.xlane.f32.xlu0 %v6972_v25 }
 0x4db   : > { %5349 = vpow2.f32 %v1757_v5  ;;  %v1539_v36 = vpop.f32.mrf.mxu2 }
 0x4dc   : > { %5351 = vrcp.f32 %v1778_v4  ;;  %v5031_v4 = vpack.i.bf16 %v6926_v11, %v6920_v61 }
 0x4dd   : > { %5353 = vrcp.f32 %v2132_v53  ;;  %v6985_v53 = vpop.f32.mrf.mxu0 }
 0x4de   : > { %5355 = vrcp.f32 %v6932_v34  ;;  %v2130_v33 = vpop.xlane.xlu1 %2129 }
 0x4df   : > { %5357 = vrcp.f32 %v2130_v33 }
 0x4e0   : > { %5359 = vpow2.f32 %v1759_v30 }
 0x4e1   : > { %v6981_v16 = vpop.eup %5349 }
 0x4e2   : > { %v5352_v35 = vpop.eup %5351  ;;  %5017 = vrot.lane.b32.xlu2 %v5016_v12, %s5561_s14  ;;  %1789 = vadd.xlane.f32.xlu1 %v6981_v16  ;;  %v2138_v12 = vpop.xlane.xlu2 %2137 }
 0x4e3   : > { %v5354_v46 = vpop.eup %5353  ;;  %v1818_v23 = vmul.f32 %v5352_v35, %v6813_v51  ;;  %v1730_v51 = vsub.f32 %v6844_v38, %v1714_v52  ;;  %v1541_v11 = vpop.f32.mrf.mxu2 }
 0x4e4   : > { %v5356_v34 = vpop.eup %5355  ;;  %v2172_v22 = vmul.f32 %v5354_v46, %v6815_v14 }
 0x4e5   : > { %v5358_v41 = vpop.eup %5357  ;;  %v1817_v45 = vmul.f32 %v5356_v34, %v6773_v39  ;;  %v6999_v39 = vpop.f32.mrf.mxu0 }
 0x4e6   : > { %v2066_v44 = vpop.xlane.xlu1 %2065  ;;  %v2171_v10 = vmul.f32 %v5358_v41, %v6860_v54  ;;  %v6994_v6 = vpop.eup %5359  ;;  %v1761_v54 = vmul.f32 1.442695, %v1730_v51 }
 0x4e7   : > { %v2083_v57 = vsub.f32 %v6874_v8, %v2066_v44  ;;  %v1830_v19 = vpack.c.bf16 %v1818_v23, %v1817_v45  ;;  %v5046_v8 = vpack.i.bf16 %v6937_v15, %v6930_v43  ;;  %v1782_v21 = vpop.xlane.xlu0 %1781  ;;  %v5061_v43 = vpack.i.bf16 %v6954_v55, %v6945_v62 }
 0x4e8   : > { %v2184_v24 = vpack.c.bf16 %v2172_v22, %v2171_v10  ;;  %v5076_v62 = vpack.i.bf16 %v6977_v31, %v6964_v59 }
 0x4e9   : > { %v2113_v20 = vmul.f32 1.442695, %v2083_v57 }
 0x4ea   : > { %5032 = vrot.lane.b32.xlu2 %v5031_v4, %s5561_s14  ;;  %1791 = vadd.xlane.f32.xlu1 %v6994_v6 }
 0x4eb   : > { %5361 = vpow2.f32 %v2113_v20  ;;  %1882 = vmatmul.bf16.gmra.mxu0 %v1830_v19  ;;  %2236 = vmatmul.bf16.gmra.mxu2 %v2184_v24 }
 0x4ec   : > { %5363 = vrcp.f32 %v2134_v7 }
 0x4ed   : > { %v7009_v33 = vpop.f32.mrf.mxu0 }
 0x4ee   : > { %v2136_v14 = vpop.xlane.xlu1 %2135 }
 0x4ef   : > { %5365 = vrcp.f32 %v2136_v14 }
 0x4f0   : > { %5367 = vpow2.f32 %v1761_v54 }
 0x4f1   : > { %v7003_v61 = vpop.eup %5361  ;;  %5369 = vrcp.f32 %v1782_v21  ;;  %v1786_v21 = vpop.xlane.xlu2 %1785 }
 0x4f2   : > { %5047 = vrot.lane.b32.xlu2 %v5046_v8, %s5561_s14  ;;  %2145 = vadd.xlane.f32.xlu0 %v7003_v61  ;;  %v5364_v38 = vpop.eup %5363 }
 0x4f3   : > { %v2173_v9 = vmul.f32 %v5364_v38, %v6831_v1 }
 0x4f5   : > { %v5366_v13 = vpop.eup %5365  ;;  %v7021_v23 = vpop.f32.mrf.mxu0 }
 0x4f6   : > { %v1780_v5 = vpop.xlane.xlu1 %1779  ;;  %v2174_v7 = vmul.f32 %v5366_v13, %v6886_v26  ;;  %v7013_v30 = vpop.eup %5367 }
 0x4f7   : > { %5371 = vrcp.f32 %v1780_v5  ;;  %v5370_v46 = vpop.eup %5369 }
 0x4f8   : > { %v2185_v15 = vpack.c.bf16 %v2174_v7, %v2173_v9  ;;  %5373 = vrcp.f32 %v2138_v12  ;;  %v1820_v41 = vmul.f32 %v5370_v46, %v6870_v40  ;;  %v4895_v46 = vld [vmem:[%s8123_s4 + $0x30] sm:$0xff] }
 0x4fa   : > { %5062 = vrot.lane.b32.xlu2 %v5061_v43, %s5561_s14  ;;  %v1544_v35 = vpop.f32.mrf.mxu2  ;;  %1793 = vadd.xlane.f32.xlu0 %v7013_v30 }
 0x4fb   : > { %2241 = vmatmul.bf16.gmra.mxu2 %v2185_v15 }
 0x4fd   : > { %v5372_v1 = vpop.eup %5371  ;;  %v7027_v52 = vpop.f32.mrf.mxu0 }
 0x4fe   : > { %v2140_v26 = vpop.xlane.xlu1 %2139  ;;  %v1819_v34 = vmul.f32 %v5372_v1, %v6893_v50  ;;  %v5374_v10 = vpop.eup %5373  ;;  %v5091_v50 = vpack.i.bf16 %v1541_v11, %v1539_v36  ;;  %v4896_v11 = vld [vmem:[%s8123_s4 + $0x38] sm:$0xff] }
 0x4ff   : > { %5375 = vrcp.f32 %v2140_v26  ;;  %v2175_v57 = vmul.f32 %v5374_v10, %v6865_v60  ;;  %2576 = vmatpush.bf16.msra.mxu3 %v4896_v11 }
 0x500   : > { %v1831_v55 = vpack.c.bf16 %v1820_v41, %v1819_v34  ;;  %5377 = vrcp.f32 %v1786_v21 }
 0x502   : > { %5077 = vrot.lane.b32.xlu2 %v5076_v62, %s5561_s14  ;;  %v1546_v44 = vpop.f32.mrf.mxu2  ;;  %1887 = vmatmul.bf16.gmra.mxu0 %v1831_v55 }
 0x503   : > { %v5106_v59 = vpack.i.bf16 %v1546_v44, %v1544_v35  ;;  %2577 = vmatpush.bf16.msra.mxu3 %v4895_v46  ;;  %v4889_v46 = vld [vmem:[%s8123_s4] sm:$0xff] }
 0x505   : > { %v5376_v22 = vpop.eup %5375 }
 0x506   : > { %v2176_v45 = vmul.f32 %v5376_v22, %v6901_v48  ;;  %v2142_v13 = vpop.xlane.xlu1 %2141  ;;  %v5378_v5 = vpop.eup %5377 }
 0x507   : > { %v1822_v12 = vmul.f32 %v5378_v5, %v6881_v42  ;;  %v4891_v5 = vld [vmem:[%s8123_s4 + $0x10] sm:$0xff] }
 0x508   : > { %v2186_v4 = vpack.c.bf16 %v2176_v45, %v2175_v57 }
 0x50a   : > { %5092 = vrot.lane.b32.xlu2 %v5091_v50, %s5561_s14  ;;  %v1549_v40 = vpop.f32.mrf.mxu2 }
 0x50b   : > { %2246 = vmatmul.bf16.gmra.mxu2 %v2186_v4 }
 0x512   : > { %5107 = vrot.lane.b32.xlu2 %v5106_v59, %s5561_s14  ;;  %v1551_v31 = vpop.f32.mrf.mxu2 }
 0x513   : > { %v1868_v24 = vpop.f32.mrf.mxu0  ;;  %v5121_v20 = vpack.i.bf16 %v1551_v31, %v1549_v40 }
 0x51a   : > { %5122 = vrot.lane.b32.xlu2 %v5121_v20, %s5561_s14  ;;  %v2222_v19 = vpop.f32.mrf.mxu2 }
 0x51b   : > { %v1870_v60 = vpop.f32.mrf.mxu0 }
 0x51c   : > { %v5021_v51 = vpack.i.bf16 %v1870_v60, %v1868_v24  ;;  %v4893_v60 = vld [vmem:[%s8123_s4 + $0x20] sm:$0xff] }
 0x51e   : > { %5022 = vrot.lane.b32.xlu1 %v5021_v51, %s5560_s21 }
 0x522   : > { %v2224_v48 = vpop.f32.mrf.mxu2 }
 0x523   : > { %v5026_v36 = vpack.i.bf16 %v2224_v48, %v2222_v19  ;;  %v1873_v14 = vpop.f32.mrf.mxu0 }
 0x525   : > { %5027 = vrot.lane.b32.xlu0 %v5026_v36, %s5559_s16 }
 0x52b   : > { %v1875_v54 = vpop.f32.mrf.mxu0 }
 0x52c   : > { %v5036_v8 = vpack.i.bf16 %v1875_v54, %v1873_v14  ;;  %v1788_v1 = vpop.xlane.xlu2 %1787 }
 0x52e   : > { %5037 = vrot.lane.b32.xlu0 %v5036_v8, %s5560_s21  ;;  %v4892_v8 = vld [vmem:[%s8123_s4 + $0x18] sm:$0xff] }
 0x545   : > { %v1784_v38 = vpop.xlane.xlu0 %1783 }
 0x546   : > { %5379 = vrcp.f32 %v1784_v38 }
 0x547   : > { %5381 = vrcp.f32 %v2142_v13 }
 0x54c   : > { %v2227_v9 = vpop.f32.mrf.mxu2  ;;  %v5380_v7 = vpop.eup %5379 }
 0x54d   : > { %v2144_v43 = vpop.xlane.xlu0 %2143  ;;  %v1821_v15 = vmul.f32 %v5380_v7, %v6960_v37  ;;  %v5382_v26 = vpop.eup %5381 }
 0x54e   : > { %5383 = vrcp.f32 %v2144_v43  ;;  %v2177_v37 = vmul.f32 %v5382_v26, %v6910_v47  ;;  %v4894_v47 = vld [vmem:[%s8123_s4 + $0x28] sm:$0xff] }
 0x54f   : > { %v1832_v35 = vpack.c.bf16 %v1822_v12, %v1821_v15  ;;  %5385 = vrcp.f32 %v1788_v1  ;;  %2578 = vmatpush.bf16.msra.mxu3 %v4894_v47  ;;  %v4890_v43 = vld [vmem:[%s8123_s4 + $0x8] sm:$0xff] }
 0x551   : > { %1892 = vmatmul.bf16.gmra.mxu0 %v1832_v35 }
 0x553   : > { %2579 = vmatpush.bf16.msra.mxu3 %v4893_v60 }
 0x554   : > { %v2229_v34 = vpop.f32.mrf.mxu2  ;;  %v5384_v41 = vpop.eup %5383 }
 0x555   : > { %v1790_v62 = vpop.xlane.xlu1 %1789  ;;  %v5041_v55 = vpack.i.bf16 %v2229_v34, %v2227_v9  ;;  %v2178_v42 = vmul.f32 %v5384_v41, %v6972_v25  ;;  %v5386_v22 = vpop.eup %5385 }
 0x556   : > { %5387 = vrcp.f32 %v1790_v62  ;;  %v1823_v50 = vmul.f32 %v5386_v22, %v6939_v28  ;;  %v2148_v25 = vpop.xlane.xlu2 %2147 }
 0x557   : > { %v1878_v44 = vpop.f32.mrf.mxu0  ;;  %5042 = vrot.lane.b32.xlu1 %v5041_v55, %s5559_s16  ;;  %v2187_v10 = vpack.c.bf16 %v2178_v42, %v2177_v37  ;;  %5389 = vrcp.f32 %v2148_v25  ;;  %2580 = vmatpush.bf16.msra.mxu3 %v4892_v8 }
 0x559   : > { %2251 = vmatmul.bf16.gmra.mxu2 %v2187_v10 }
 0x55b   : > { %2581 = vmatpush.bf16.msra.mxu3 %v4891_v5 }
 0x55c   : > { %v5388_v57 = vpop.eup %5387  ;;  %v2232_v45 = vpop.f32.mrf.mxu2 }
 0x55d   : > { %v1824_v4 = vmul.f32 %v5388_v57, %v6981_v16  ;;  %v1792_v16 = vpop.xlane.xlu1 %1791  ;;  %v5390_v51 = vpop.eup %5389 }
 0x55e   : > { %v2180_v54 = vmul.f32 %v5390_v51, %v6952_v0  ;;  %v5018_v55 = vpop.permute.xlu2 %5017 }
 0x55f   : > { %v1880_v40 = vpop.f32.mrf.mxu0  ;;  %v1833_v59 = vpack.c.bf16 %v1824_v4, %v1823_v50  ;;  %2582 = vmatpush.bf16.msra.mxu3 %v4890_v43  ;;  %v5020_v42 = vunpack.i.h.bf16 %v5018_v55 }
 0x560   : > { %v5051_v31 = vpack.i.bf16 %v1880_v40, %v1878_v44  ;;  %v5019_v44 = vunpack.i.l.bf16 %v5018_v55 }
 0x561   : > { %1897 = vmatmul.bf16.gmra.mxu0 %v1833_v59  ;;  %v2455_v4 = vsel %vm877_vm0, %v6890_v49, %v5020_v42 }
 0x562   : > { %5052 = vrot.lane.b32.xlu0 %v5051_v31, %s5560_s21  ;;  %v2454_v40 = vsel %vm877_vm0, %v6884_v58, %v5019_v44 }
 0x563   : > { %2583 = vmatpush.bf16.msra.mxu3 %v4889_v46 }
 0x564   : > { %v2234_v24 = vpop.f32.mrf.mxu2 }
 0x565   : > { %v5056_v20 = vpack.i.bf16 %v2234_v24, %v2232_v45  ;;  %v2146_v19 = vpop.xlane.xlu0 %2145 }
 0x566   : > { %5391 = vrcp.f32 %v2146_v19 }
 0x567   : > { %5057 = vrot.lane.b32.xlu1 %v5056_v20, %s5559_s16  ;;  %5393 = vrcp.f32 %v1792_v16 }
 0x568   : > { %v1883_v28 = vpop.f32.mrf.mxu0 }
 0x56c   : > { %v5392_v48 = vpop.eup %5391 }
 0x56d   : > { %v1794_v36 = vpop.xlane.xlu0 %1793  ;;  %v2179_v14 = vmul.f32 %v5392_v48, %v7003_v61  ;;  %v5394_v9 = vpop.eup %5393 }
 0x56e   : > { %v2237_v11 = vpop.f32.mrf.mxu2  ;;  %5395 = vrcp.f32 %v1794_v36  ;;  %v1825_v61 = vmul.f32 %v5394_v9, %v6994_v6 }
 0x56f   : > { %v2188_v21 = vpack.c.bf16 %v2180_v54, %v2179_v14 }
 0x570   : > { %v1885_v38 = vpop.f32.mrf.mxu0 }
 0x571   : > { %v5066_v13 = vpack.i.bf16 %v1885_v38, %v1883_v28  ;;  %2256 = vmatmul.bf16.gmra.mxu2 %v2188_v21  ;;  %v5033_v28 = vpop.permute.xlu2 %5032 }
 0x572   : > { %v5035_v49 = vunpack.i.h.bf16 %v5033_v28  ;;  %v5034_v60 = vunpack.i.l.bf16 %v5033_v28 }
 0x573   : > { %5067 = vrot.lane.b32.xlu0 %v5066_v13, %s5560_s21 }
 0x574   : > { %v5396_v0 = vpop.eup %5395  ;;  %v2457_v36 = vsel %vm877_vm0, %v6917_v27, %v5035_v49  ;;  %v2456_v14 = vsel %vm877_vm0, %v6905_v63, %v5034_v60 }
 0x575   : > { %v1826_v7 = vmul.f32 %v5396_v0, %v7013_v30 }
 0x576   : > { %v2239_v15 = vpop.f32.mrf.mxu2 }
 0x577   : > { %v5071_v12 = vpack.i.bf16 %v2239_v15, %v2237_v11  ;;  %v1834_v35 = vpack.c.bf16 %v1826_v7, %v1825_v61 }
 0x579   : > { %5072 = vrot.lane.b32.xlu1 %v5071_v12, %s5559_s16  ;;  %1902 = vmatmul.bf16.gmra.mxu0 %v1834_v35  ;;  %v5048_v0 = vpop.permute.xlu2 %5047 }
 0x57a   : > { %v5050_v7 = vunpack.i.h.bf16 %v5048_v0  ;;  %v5049_v27 = vunpack.i.l.bf16 %v5048_v0 }
 0x57c   : > { %v2459_v46 = vsel %vm877_vm0, %v6928_v18, %v5050_v7 }
 0x57e   : > { %v2242_v1 = vpop.f32.mrf.mxu2 }
 0x57f   : > { %v1888_v6 = vpop.f32.mrf.mxu0 }
 0x581   : > { %v5063_v18 = vpop.permute.xlu2 %5062 }
 0x586   : > { %v2244_v26 = vpop.f32.mrf.mxu2 }
 0x587   : > { %v5086_v30 = vpack.i.bf16 %v2244_v26, %v2242_v1  ;;  %v1890_v34 = vpop.f32.mrf.mxu0  ;;  %v2458_v1 = vsel %vm877_vm0, %v6922_v56, %v5049_v27 }
 0x588   : > { %v5081_v41 = vpack.i.bf16 %v1890_v34, %v1888_v6 }
 0x589   : > { %5087 = vrot.lane.b32.xlu1 %v5086_v30, %s5559_s16 }
 0x58a   : > { %5082 = vrot.lane.b32.xlu0 %v5081_v41, %s5560_s21 }
 0x58e   : > { %v2247_v62 = vpop.f32.mrf.mxu2 }
 0x590   : > { %v5023_v37 = vpop.permute.xlu1 %5022 }
 0x591   : > { %v5025_v10 = vunpack.i.h.bf16 %v5023_v37  ;;  %v5024_v22 = vunpack.i.l.bf16 %v5023_v37 }
 0x593   : > { %v2471_v47 = vsel %vm2470_vm2, %v2454_v40, %v5024_v22  ;;  %v2472_v25 = vsel %vm2470_vm2, %v2455_v4, %v5025_v10 }
 0x596   : > { %v2249_v57 = vpop.f32.mrf.mxu2 }
 0x597   : > { %v5101_v45 = vpack.i.bf16 %v2249_v57, %v2247_v62  ;;  %v5028_v50 = vpop.permute.xlu0 %5027  ;;  %v5065_v57 = vunpack.i.h.bf16 %v5063_v18 }
 0x598   : > { %v5030_v59 = vunpack.i.h.bf16 %v5028_v50  ;;  %v5029_v31 = vunpack.i.l.bf16 %v5028_v50 }
 0x599   : > { %5102 = vrot.lane.b32.xlu1 %v5101_v45, %s5559_s16  ;;  %v5064_v45 = vunpack.i.l.bf16 %v5063_v18 }
 0x59a   : > { %v2488_v24 = vsel %vm2487_vm3, %v2471_v47, %v5029_v31  ;;  %v2489_v20 = vsel %vm2487_vm3, %v2472_v25, %v5030_v59  ;;  %v2461_v31 = vsel %vm877_vm0, %v6942_v3, %v5065_v57 }
 0x59b   : > { %v2504_v19 = vpack.c.bf16 %v2489_v20, %v2488_v24  ;;  %v2460_v47 = vsel %vm877_vm0, %v6935_v2, %v5064_v45 }
 0x59d   : > { %2584 = vmatmul.bf16.vlgmr.msra.gmra.mxu3 %v2504_v19 }
 0x5a0   : > { %v5038_v16 = vpop.permute.xlu0 %5037 }
 0x5a1   : > { %v5040_v51 = vunpack.i.h.bf16 %v5038_v16  ;;  %v5039_v58 = vunpack.i.l.bf16 %v5038_v16 }
 0x5a3   : > { %v2473_v11 = vsel %vm2470_vm2, %v2456_v14, %v5039_v58  ;;  %v2474_v21 = vsel %vm2470_vm2, %v2457_v36, %v5040_v51  ;;  %v5078_v58 = vpop.permute.xlu2 %5077 }
 0x5a4   : > { %v5079_v3 = vunpack.i.l.bf16 %v5078_v58 }
 0x5c9   : > { %v5043_v48 = vpop.permute.xlu1 %5042 }
 0x5ca   : > { %v5045_v54 = vunpack.i.h.bf16 %v5043_v48  ;;  %v5044_v8 = vunpack.i.l.bf16 %v5043_v48  ;;  %v5080_v48 = vunpack.i.h.bf16 %v5078_v58 }
 0x5cc   : > { %v2490_v38 = vsel %vm2487_vm3, %v2473_v11, %v5044_v8  ;;  %v2491_v13 = vsel %vm2487_vm3, %v2474_v21, %v5045_v54  ;;  %v2463_v21 = vsel %vm877_vm0, %v6958_v17, %v5080_v48 }
 0x5cd   : > { %v2505_v5 = vpack.c.bf16 %v2491_v13, %v2490_v38  ;;  %v2462_v38 = vsel %vm877_vm0, %v6947_v32, %v5079_v3 }
 0x5ce   : > { %v1893_v9 = vpop.f32.mrf.mxu0 }
 0x5cf   : > { %2589 = vmatmul.bf16.gmra.mxu3 %v2505_v5 }
 0x5d4   : > { %v5053_v61 = vpop.permute.xlu0 %5052 }
 0x5d5   : > { %v5055_v43 = vunpack.i.h.bf16 %v5053_v61  ;;  %v5054_v15 = vunpack.i.l.bf16 %v5053_v61 }
 0x5d6   : > { %v1895_v63 = vpop.f32.mrf.mxu0 }
 0x5d7   : > { %v5096_v12 = vpack.i.bf16 %v1895_v63, %v1893_v9  ;;  %v2475_v30 = vsel %vm2470_vm2, %v2458_v1, %v5054_v15  ;;  %v2476_v34 = vsel %vm2470_vm2, %v2459_v46, %v5055_v43  ;;  %v5463_v15 = vld [vmem:[%s5752_s24] sm:$0xff]  ;;  %v5093_v1 = vpop.permute.xlu2 %5092 }
 0x5d9   : > { %v5058_v35 = vpop.permute.xlu1 %5057  ;;  %5097 = vrot.lane.b32.xlu0 %v5096_v12, %s5560_s21 }
 0x5da   : > { %v5060_v6 = vunpack.i.h.bf16 %v5058_v35  ;;  %v5059_v26 = vunpack.i.l.bf16 %v5058_v35  ;;  %v5464_v35 = vld [vmem:[%s5752_s24 + $0x8] sm:$0xff] }
 0x5dc   : > { %v2492_v41 = vsel %vm2487_vm3, %v2475_v30, %v5059_v26  ;;  %v2493_v62 = vsel %vm2487_vm3, %v2476_v34, %v5060_v6  ;;  %v2252_v55 = vpop.f32.mrf.mxu2  ;;  %v5095_v6 = vunpack.i.h.bf16 %v5093_v1  ;;  %v5094_v26 = vunpack.i.l.bf16 %v5093_v1 }
 0x5dd   : > { %v2506_v37 = vpack.c.bf16 %v2493_v62, %v2492_v41 }
 0x5de   : > { %v1898_v42 = vpop.f32.mrf.mxu0 }
 0x5df   : > { %2594 = vmatmul.bf16.gmra.mxu3 %v2506_v37  ;;  %v2464_v37 = vsel %vm877_vm0, %v6970_v29, %v5094_v26  ;;  %v5108_v29 = vpop.permute.xlu2 %5107  ;;  %v5563_v26 = vmov 128.0  }
 0x5e0   : > { %5397 = vrcp.f32 %v5563_v26 }
 0x5e4   : > { %v2254_v44 = vpop.f32.mrf.mxu2 }
 0x5e5   : > { %v5068_v10 = vpop.permute.xlu0 %5067  ;;  %v5116_v56 = vpack.i.bf16 %v2254_v44, %v2252_v55  ;;  %v2465_v55 = vsel %vm877_vm0, %v6985_v53, %v5095_v6  ;;  %v5110_v53 = vunpack.i.h.bf16 %v5108_v29 }
 0x5e6   : > { %v1900_v22 = vpop.f32.mrf.mxu0  ;;  %v5070_v4 = vunpack.i.h.bf16 %v5068_v10  ;;  %v5069_v40 = vunpack.i.l.bf16 %v5068_v10 }
 0x5e7   : > { %v5111_v50 = vpack.i.bf16 %v1900_v22, %v1898_v42  ;;  %5117 = vrot.lane.b32.xlu1 %v5116_v56, %s5559_s16 }
 0x5e8   : > { %v2477_v20 = vsel %vm2470_vm2, %v2460_v47, %v5069_v40  ;;  %v2478_v19 = vsel %vm2470_vm2, %v2461_v31, %v5070_v4  ;;  %v5109_v40 = vunpack.i.l.bf16 %v5108_v29  ;;  %v5466_v47 = vld [vmem:[%s5752_s24 + $0x18] sm:$0xff] }
 0x5e9   : > { %5112 = vrot.lane.b32.xlu0 %v5111_v50, %s5560_s21  ;;  %v5465_v50 = vld [vmem:[%s5752_s24 + $0x10] sm:$0xff] }
 0x5eb   : > { %v5073_v59 = vpop.permute.xlu1 %5072 }
 0x5ec   : > { %v5075_v25 = vunpack.i.h.bf16 %v5073_v59  ;;  %v5074_v24 = vunpack.i.l.bf16 %v5073_v59 }
 0x5ee   : > { %v2494_v28 = vsel %vm2487_vm3, %v2477_v20, %v5074_v24  ;;  %v2495_v16 = vsel %vm2487_vm3, %v2478_v19, %v5075_v25 }
 0x5ef   : > { %v2507_v49 = vpack.c.bf16 %v2495_v16, %v2494_v28  ;;  %v2467_v28 = vsel %vm877_vm0, %v7009_v33, %v5110_v53  ;;  %v2466_v16 = vsel %vm877_vm0, %v6999_v39, %v5109_v40  ;;  %v5468_v39 = vld [vmem:[%s5752_s24 + $0x28] sm:$0xff]  ;;  %v5471_v53 = vld [vmem:[%s5752_s24 + $0x40] sm:$0xff] }
 0x5f1   : > { %2599 = vmatmul.bf16.gmra.mxu3 %v2507_v49 }
 0x5f4   : > { %v2257_v60 = vpop.f32.mrf.mxu2 }
 0x5f6   : > { %v1903_v51 = vpop.f32.mrf.mxu0 }
 0x5fb   : > { %v5088_v36 = vpop.permute.xlu1 %5087 }
 0x5fc   : > { %v5083_v14 = vpop.permute.xlu0 %5082  ;;  %v2259_v2 = vpop.f32.mrf.mxu2  ;;  %v5090_v13 = vunpack.i.h.bf16 %v5088_v36  ;;  %v5089_v5 = vunpack.i.l.bf16 %v5088_v36 }
 0x5fd   : > { %v5085_v54 = vunpack.i.h.bf16 %v5083_v14  ;;  %v5084_v8 = vunpack.i.l.bf16 %v5083_v14  ;;  %v5131_v11 = vpack.i.bf16 %v2259_v2, %v2257_v60  ;;  %v5467_v2 = vld [vmem:[%s5752_s24 + $0x20] sm:$0xff] }
 0x5fe   : > { %v1905_v9 = vpop.f32.mrf.mxu0 }
 0x5ff   : > { %v2479_v0 = vsel %vm2470_vm2, %v2462_v38, %v5084_v8  ;;  %v2480_v61 = vsel %vm2470_vm2, %v2463_v21, %v5085_v54  ;;  %v5126_v7 = vpack.i.bf16 %v1905_v9, %v1903_v51  ;;  %5132 = vrot.lane.b32.xlu1 %v5131_v11, %s5559_s16  ;;  %v5123_v11 = vpop.permute.xlu2 %5122  ;;  %s4370_s16 = scalar_lea.hbm %s8132_s13, %s4961_s19  ;;  %s5515_s19 = scalar_lea.hbm %s8132_s13, 256 }
 0x600   : > { %v2496_v27 = vsel %vm2487_vm3, %v2479_v0, %v5089_v5  ;;  %v2497_v43 = vsel %vm2487_vm3, %v2480_v61, %v5090_v13  ;;  %v5125_v21 = vunpack.i.h.bf16 %v5123_v11  ;;  %v5124_v38 = vunpack.i.l.bf16 %v5123_v11  ;;  %v5474_v11 = vld [vmem:[%s5752_s24 + $0x58] sm:$0xff] }
 0x601   : > { %5127 = vrot.lane.b32.xlu0 %v5126_v7, %s5560_s21  ;;  %v2508_v17 = vpack.c.bf16 %v2497_v43, %v2496_v27  ;;  %s4373_s21 = sshll.u32 %s4370_s16, 4  ;;  %s4374_s21 = int_to_ptr.hbm [resolvable:$true] %s4373_s21 }
 0x602   : > { %v2469_v9 = vsel %vm877_vm0, %v7027_v52, %v5125_v21  ;;  %v2468_v27 = vsel %vm877_vm0, %v7021_v23, %v5124_v38  ;;  %v5398_v23 = vpop.eup %5397  ;;  %s5509_s14 = sshra.s32 %s4374_s21, 4  ;;  %s5510_s14 = int_to_ptr.hbm [resolvable:$true] %s5509_s14 }
 0x603   : > { %2604 = vmatmul.bf16.gmra.mxu3 %v2508_v17  ;;  %vm2680_vm0 = vweird.f32 %v5398_v23  ;;  %s5511_s22 = scalar_lea.hbm %s5510_s14, 128  ;;  %p5516_p0 = scmp.lt.s32.totalorder %s5510_s14, %s8132_s13 }
 0x604   : > { %p5512_p11 = scmp.ne.s32.totalorder %s5510_s14, %s5511_s22  ;;  %p5517_p1 = scmp.lt.s32.totalorder %s5515_s19, %s5511_s22 }
 0x606   : > { %p5513_p12 = pnand %p5512_p11, %p5674_p5  ;;  %p5518_p2 = por %p5517_p1, %p5516_p0 }
 0x608   : > { %p5514_p13 = pneg %p5513_p12 }
 0x60a   : > { %p5519_p3 = pnand %p5518_p2, %p5514_p13 }
 0x60b   : > { %v5103_v30 = vpop.permute.xlu1 %5102 }
 0x60c   : > { %v5105_v42 = vunpack.i.h.bf16 %v5103_v30  ;;  %v5104_v18 = vunpack.i.l.bf16 %v5103_v30  ;;  %v2676_v30 = vmul.f32 128.0, %v5398_v23 }
 0x620   : > { %v2585_v32 = vpop.f32.mrf.mxu3 }
 0x621   : > { %v7122_v63 = vadd.f32 %v5463_v15, %v2585_v32  ;;  %v5469_v32 = vld [vmem:[%s5752_s24 + $0x30] sm:$0xff] }
 0x623   : > { %2643 = vadd.xlane.f32.xlu2 %v7122_v63 }
 0x628   : > { %v2587_v12 = vpop.f32.mrf.mxu3 }
 0x629   : > { %v7126_v46 = vadd.f32 %v5464_v35, %v2587_v12 }
 0x62b   : > { %2645 = vadd.xlane.f32.xlu0 %v7126_v46 }
 0x64b   : > { %v5098_v34 = vpop.permute.xlu0 %5097 }
 0x64c   : > { %v5100_v41 = vunpack.i.h.bf16 %v5098_v34  ;;  %v5099_v62 = vunpack.i.l.bf16 %v5098_v34  ;;  %v2677_v34 = vsub.f32 1.0, %v2676_v30  ;;  %v4727_v30 = vld [vmem:[%s8126_s7 + $0xf8] sm:$0xf0] }
 0x64e   : > { %v2481_v44 = vsel %vm2470_vm2, %v2464_v37, %v5099_v62  ;;  %v2482_v10 = vsel %vm2470_vm2, %v2465_v55, %v5100_v41  ;;  %v2678_v41 = vmul.f32 %v5398_v23, %v2677_v34 }
 0x64f   : > { %v2498_v56 = vsel %vm2487_vm3, %v2481_v44, %v5104_v18  ;;  %v2499_v22 = vsel %vm2487_vm3, %v2482_v10, %v5105_v42 }
 0x650   : > { %v2509_v57 = vpack.c.bf16 %v2499_v22, %v2498_v56  ;;  %v2679_v62 = vadd.f32 %v5398_v23, %v2678_v41  ;;  %v4701_v41 = vld [vmem:[%s8126_s7 + $0xc0] sm:$0xf] }
 0x652   : > { %v2590_v45 = vpop.f32.mrf.mxu3  ;;  %2609 = vmatmul.bf16.gmra.mxu3 %v2509_v57  ;;  %v7173_v55 = vsel %vm2680_vm0, %v5398_v23, %v2679_v62  ;;  %v4926_v23 = vld [vmem:[%s8126_s7 + $0xec] sm:$0xf]  ;;  %v4923_v62 = vld [vmem:[%s8126_s7 + $0xcc] sm:$0xf0] }
 0x653   : > { %v7138_v4 = vadd.f32 %v5465_v50, %v2590_v45  ;;  %v5470_v45 = vld [vmem:[%s5752_s24 + $0x38] sm:$0xff]  ;;  %v4730_v34 = vor.u32 %v4926_v23, %v4727_v30 }
 0x655   : > { %2647 = vadd.xlane.f32.xlu1 %v7138_v4  ;;  %3365 = vmatpush.bf16.msrb.mxu3 %v4730_v34  ;;  %v4910_v34 = vld [vmem:[%s8126_s7 + $0x6c] sm:$0xf] }
 0x659   : > { %v5118_v31 = vpop.permute.xlu1 %5117 }
 0x65a   : > { %v2592_v59 = vpop.f32.mrf.mxu3  ;;  %v5120_v49 = vunpack.i.h.bf16 %v5118_v31  ;;  %v5119_v60 = vunpack.i.l.bf16 %v5118_v31 }
 0x65b   : > { %v7142_v25 = vadd.f32 %v5466_v47, %v2592_v59  ;;  %v5113_v24 = vpop.permute.xlu0 %5112 }
 0x65c   : > { %v5115_v20 = vunpack.i.h.bf16 %v5113_v24  ;;  %v5114_v19 = vunpack.i.l.bf16 %v5113_v24 }
 0x65d   : > { %2649 = vadd.xlane.f32.xlu2 %v7142_v25 }
 0x65e   : > { %v2483_v51 = vsel %vm2470_vm2, %v2466_v16, %v5114_v19  ;;  %v2484_v58 = vsel %vm2470_vm2, %v2467_v28, %v5115_v20  ;;  %v5472_v16 = vld [vmem:[%s5752_s24 + $0x48] sm:$0xff] }
 0x65f   : > { %v2500_v48 = vsel %vm2487_vm3, %v2483_v51, %v5119_v60  ;;  %v2501_v3 = vsel %vm2487_vm3, %v2484_v58, %v5120_v49 }
 0x660   : > { %v2510_v36 = vpack.c.bf16 %v2501_v3, %v2500_v48  ;;  %v5473_v3 = vld [vmem:[%s5752_s24 + $0x50] sm:$0xff] }
 0x662   : > { %v2595_v14 = vpop.f32.mrf.mxu3  ;;  %2614 = vmatmul.bf16.gmra.mxu3 %v2510_v36 }
 0x663   : > { %v7154_v54 = vadd.f32 %v5467_v2, %v2595_v14 }
 0x665   : > { %2651 = vadd.xlane.f32.xlu0 %v7154_v54 }
 0x66a   : > { %v2597_v33 = vpop.f32.mrf.mxu3 }
 0x66b   : > { %v7158_v8 = vadd.f32 %v5468_v39, %v2597_v33 }
 0x66d   : > { %2653 = vadd.xlane.f32.xlu1 %v7158_v8 }
 0x671   : > { %v5133_v13 = vpop.permute.xlu1 %5132 }
 0x672   : > { %v5135_v43 = vunpack.i.h.bf16 %v5133_v13  ;;  %v5134_v17 = vunpack.i.l.bf16 %v5133_v13 }
 0x673   : > { %v5128_v5 = vpop.permute.xlu0 %5127 }
 0x674   : > { %v5130_v0 = vunpack.i.h.bf16 %v5128_v5  ;;  %v5129_v61 = vunpack.i.l.bf16 %v5128_v5  ;;  %v2600_v7 = vpop.f32.mrf.mxu3 }
 0x675   : > { %v7166_v15 = vadd.f32 %v5469_v32, %v2600_v7  ;;  %v5476_v32 = vld [vmem:[%s5752_s24 + $0x68] sm:$0xff] }
 0x676   : > { %v2485_v12 = vsel %vm2470_vm2, %v2468_v27, %v5129_v61  ;;  %v2486_v35 = vsel %vm2470_vm2, %v2469_v9, %v5130_v0  ;;  %v5475_v9 = vld [vmem:[%s5752_s24 + $0x60] sm:$0xff] }
 0x677   : > { %2655 = vadd.xlane.f32.xlu1 %v7166_v15  ;;  %v2502_v1 = vsel %vm2487_vm3, %v2485_v12, %v5134_v17  ;;  %v2503_v52 = vsel %vm2487_vm3, %v2486_v35, %v5135_v43  ;;  %v4717_v27 = vld [vmem:[%s8126_s7 + $0xe0] sm:$0xf]  ;;  %v4927_v43 = vld [vmem:[%s8126_s7 + $0xec] sm:$0xf0]  ;;  %v4925_v17 = vld [vmem:[%s8126_s7 + $0xe4] sm:$0xf] }
 0x678   : > { %v2511_v6 = vpack.c.bf16 %v2503_v52, %v2502_v1  ;;  %v4718_v12 = vor.u32 %v4927_v43, %v4717_v27  ;;  %v4719_v35 = vld [vmem:[%s8126_s7 + $0xf0] sm:$0xf0]  ;;  %v4725_v1 = vld [vmem:[%s8126_s7 + $0xe8] sm:$0xf]  ;;  %v4928_v52 = vld [vmem:[%s8126_s7 + $0xf4] sm:$0xf0] }
 0x679   : > { %v4726_v26 = vor.u32 %v4928_v52, %v4725_v1  ;;  %v4914_v27 = vld [vmem:[%s8126_s7 + $0x8c] sm:$0xf]  ;;  %v4679_v43 = vld [vmem:[%s8126_s7 + $0x98] sm:$0xf0]  ;;  %v4655_v52 = vld [vmem:[%s8126_s7 + $0x70] sm:$0xf0] }
 0x67a   : > { %2619 = vmatmul.bf16.gmra.mxu3 %v2511_v6  ;;  %v4722_v6 = vor.u32 %v4925_v17, %v4719_v35  ;;  %3218 = vmatpush.bf16.msrb.mxu0 %v4718_v12  ;;  %v4682_v17 = vor.u32 %v4914_v27, %v4679_v43  ;;  %v4911_v12 = vld [vmem:[%s8126_s7 + $0x6c] sm:$0xf0]  ;;  %v4909_v35 = vld [vmem:[%s8126_s7 + $0x64] sm:$0xf]  ;;  %v4900_v43 = vld [vmem:[%s8126_s7 + $0x14] sm:$0xf0] }
 0x67b   : > { %3316 = vmatpush.bf16.msrb.mxu2 %v4726_v26  ;;  %v4912_v26 = vld [vmem:[%s8126_s7 + $0x74] sm:$0xf0]  ;;  %v4658_v23 = vor.u32 %v4909_v35, %v4655_v52 }
 0x67c   : > { %v2602_v22 = vpop.f32.mrf.mxu3  ;;  %3267 = vmatpush.bf16.msrb.mxu1 %v4722_v6  ;;  %v4661_v6 = vld [vmem:[%s8126_s7 + $0x68] sm:$0xf] }
 0x67d   : > { %v7186_v50 = vadd.f32 %v5470_v45, %v2602_v22  ;;  %v4662_v30 = vor.u32 %v4912_v26, %v4661_v6 }
 0x696   : > { %v2644_v37 = vpop.xlane.xlu2 %2643 }
 0x697   : > { %v2682_v42 = vmul.f32 %v7173_v55, %v2644_v37  ;;  %v4921_v37 = vld [vmem:[%s8126_s7 + $0xc4] sm:$0xf] }
 0x699   : > { %v7177_v18 = vsub.f32 %v7122_v63, %v2682_v42  ;;  %v2605_v63 = vpop.f32.mrf.mxu3  ;;  %v4702_v42 = vor.u32 %v4923_v62, %v4701_v41  ;;  %v4663_v41 = vld [vmem:[%s8126_s7 + $0x78] sm:$0xf0] }
 0x69a   : > { %v7192_v40 = vadd.f32 %v5471_v53, %v2605_v63  ;;  %v4711_v63 = vld [vmem:[%s8126_s7 + $0xd8] sm:$0xf0]  ;;  %v4666_v62 = vor.u32 %v4910_v34, %v4663_v41 }
 0x69b   : > { %v2714_v44 = vmul.f32 %v7177_v18, %v7177_v18  ;;  %3219 = vmatpush.bf16.msrb.mxu0 %v4702_v42  ;;  %v4907_v42 = vld [vmem:[%s8126_s7 + $0x4c] sm:$0xf0] }
 0x69d   : > { %2730 = vadd.xlane.f32.xlu2 %v2714_v44  ;;  %v4703_v44 = vld [vmem:[%s8126_s7 + $0xd0] sm:$0xf0] }
 0x69e   : > { %v2646_v10 = vpop.xlane.xlu0 %2645  ;;  %v4706_v22 = vor.u32 %v4921_v37, %v4703_v44  ;;  %v4637_v37 = vld [vmem:[%s8126_s7 + $0x40] sm:$0xf]  ;;  %v4905_v44 = vld [vmem:[%s8126_s7 + $0x44] sm:$0xf] }
 0x69f   : > { %v2683_v56 = vmul.f32 %v7173_v55, %v2646_v10  ;;  %v4709_v10 = vld [vmem:[%s8126_s7 + $0xc8] sm:$0xf] }
 0x6a0   : > { %3268 = vmatpush.bf16.msrb.mxu1 %v4706_v22  ;;  %v4645_v22 = vld [vmem:[%s8126_s7 + $0x48] sm:$0xf] }
 0x6a1   : > { %v7183_v57 = vsub.f32 %v7126_v46, %v2683_v56  ;;  %v2607_v24 = vpop.f32.mrf.mxu3  ;;  %v4924_v56 = vld [vmem:[%s8126_s7 + $0xd4] sm:$0xf0] }
 0x6a2   : > { %v7206_v49 = vadd.f32 %v5472_v16, %v2607_v24  ;;  %v4710_v45 = vor.u32 %v4924_v56, %v4709_v10  ;;  %v4685_v24 = vld [vmem:[%s8126_s7 + $0xa0] sm:$0xf]  ;;  %v4638_v10 = vor.u32 %v4907_v42, %v4637_v37  ;;  %v4639_v56 = vld [vmem:[%s8126_s7 + $0x50] sm:$0xf0] }
 0x6a3   : > { %v2715_v29 = vmul.f32 %v7183_v57, %v7183_v57 }
 0x6a4   : > { %3317 = vmatpush.bf16.msrb.mxu2 %v4710_v45  ;;  %v4908_v45 = vld [vmem:[%s8126_s7 + $0x54] sm:$0xf0] }
 0x6a5   : > { %2732 = vadd.xlane.f32.xlu0 %v2715_v29  ;;  %2657 = vadd.xlane.f32.xlu2 %v7186_v50  ;;  %v4922_v29 = vld [vmem:[%s8126_s7 + $0xcc] sm:$0xf] }
 0x6ad   : > { %2659 = vadd.xlane.f32.xlu2 %v7192_v40 }
 0x6c8   : > { %v2648_v59 = vpop.xlane.xlu1 %2647 }
 0x6c9   : > { %v2684_v46 = vmul.f32 %v7173_v55, %v2648_v59  ;;  %v4714_v59 = vor.u32 %v4922_v29, %v4711_v63  ;;  %v4642_v29 = vor.u32 %v4905_v44, %v4639_v56  ;;  %v4646_v63 = vor.u32 %v4908_v45, %v4645_v22 }
 0x6cb   : > { %v7197_v31 = vsub.f32 %v7138_v4, %v2684_v46  ;;  %v5477_v46 = vld [vmem:[%s5752_s24 + $0x70] sm:$0xff]  ;;  %3366 = vmatpush.bf16.msrb.mxu3 %v4714_v59  ;;  %v4647_v59 = vld [vmem:[%s8126_s7 + $0x58] sm:$0xf0] }
 0x6cd   : > { %v2716_v47 = vmul.f32 %v7197_v31, %v7197_v31 }
 0x6cf   : > { %2734 = vadd.xlane.f32.xlu0 %v2716_v47 }
 0x6d0   : > { %v2650_v20 = vpop.xlane.xlu2 %2649 }
 0x6d1   : > { %v2685_v19 = vmul.f32 %v7173_v55, %v2650_v20  ;;  %v4919_v20 = vld [vmem:[%s8126_s7 + $0xac] sm:$0xf0] }
 0x6d2   : > { %v4686_v16 = vor.u32 %v4919_v20, %v4685_v24  ;;  %v4621_v24 = vld [vmem:[%s8126_s7 + $0x20] sm:$0xf]  ;;  %v4903_v20 = vld [vmem:[%s8126_s7 + $0x2c] sm:$0xf0] }
 0x6d3   : > { %v7203_v28 = vsub.f32 %v7142_v25, %v2685_v19  ;;  %v4917_v19 = vld [vmem:[%s8126_s7 + $0xa4] sm:$0xf] }
 0x6d4   : > { %3220 = vmatpush.bf16.msrb.mxu0 %v4686_v16  ;;  %v4622_v16 = vor.u32 %v4903_v20, %v4621_v24 }
 0x6d5   : > { %v2717_v60 = vmul.f32 %v7203_v28, %v7203_v28  ;;  %v2610_v4 = vpop.f32.mrf.mxu3 }
 0x6d6   : > { %v7216_v25 = vadd.f32 %v5473_v3, %v2610_v4  ;;  %v4693_v4 = vld [vmem:[%s8126_s7 + $0xa8] sm:$0xf] }
 0x6d7   : > { %2736 = vadd.xlane.f32.xlu1 %v2717_v60  ;;  %2661 = vadd.xlane.f32.xlu0 %v7206_v49  ;;  %v4687_v60 = vld [vmem:[%s8126_s7 + $0xb0] sm:$0xf0] }
 0x6d8   : > { %v2652_v51 = vpop.xlane.xlu0 %2651 }
 0x6d9   : > { %v2686_v58 = vmul.f32 %v7173_v55, %v2652_v51  ;;  %v4920_v51 = vld [vmem:[%s8126_s7 + $0xb4] sm:$0xf0] }
 0x6da   : > { %v4694_v3 = vor.u32 %v4920_v51, %v4693_v4  ;;  %v4629_v4 = vld [vmem:[%s8126_s7 + $0x28] sm:$0xf]  ;;  %v4904_v51 = vld [vmem:[%s8126_s7 + $0x34] sm:$0xf0] }
 0x6db   : > { %v7213_v48 = vsub.f32 %v7154_v54, %v2686_v58  ;;  %v4690_v58 = vor.u32 %v4917_v19, %v4687_v60  ;;  %v4901_v19 = vld [vmem:[%s8126_s7 + $0x24] sm:$0xf]  ;;  %v4623_v60 = vld [vmem:[%s8126_s7 + $0x30] sm:$0xf0] }
 0x6dc   : > { %3318 = vmatpush.bf16.msrb.mxu2 %v4694_v3  ;;  %v4626_v3 = vor.u32 %v4901_v19, %v4623_v60  ;;  %v5478_v60 = vld [vmem:[%s5752_s24 + $0x78] sm:$0xff] }
 0x6dd   : > { %v2718_v36 = vmul.f32 %v7213_v48, %v7213_v48  ;;  %v2612_v14 = vpop.f32.mrf.mxu3  ;;  %3269 = vmatpush.bf16.msrb.mxu1 %v4690_v58 }
 0x6de   : > { %v7226_v54 = vadd.f32 %v5474_v11, %v2612_v14  ;;  %v4695_v14 = vld [vmem:[%s8126_s7 + $0xb8] sm:$0xf0]  ;;  %v4915_v11 = vld [vmem:[%s8126_s7 + $0x8c] sm:$0xf0] }
 0x6df   : > { %2738 = vadd.xlane.f32.xlu1 %v2718_v36  ;;  %2663 = vadd.xlane.f32.xlu0 %v7216_v25  ;;  %v4918_v36 = vld [vmem:[%s8126_s7 + $0xac] sm:$0xf] }
 0x6e0   : > { %v2654_v2 = vpop.xlane.xlu1 %2653 }
 0x6e1   : > { %v2687_v33 = vmul.f32 %v7173_v55, %v2654_v2  ;;  %v4698_v2 = vor.u32 %v4918_v36, %v4695_v14  ;;  %v4630_v36 = vor.u32 %v4904_v51, %v4629_v4  ;;  %v4902_v14 = vld [vmem:[%s8126_s7 + $0x2c] sm:$0xf] }
 0x6e3   : > { %v7223_v39 = vsub.f32 %v7158_v8, %v2687_v33  ;;  %v4669_v33 = vld [vmem:[%s8126_s7 + $0x80] sm:$0xf]  ;;  %3367 = vmatpush.bf16.msrb.mxu3 %v4698_v2  ;;  %v4631_v2 = vld [vmem:[%s8126_s7 + $0x38] sm:$0xf0] }
 0x6e5   : > { %v2719_v21 = vmul.f32 %v7223_v39, %v7223_v39  ;;  %v2615_v38 = vpop.f32.mrf.mxu3 }
 0x6e6   : > { %v7233_v0 = vadd.f32 %v5475_v9, %v2615_v38  ;;  %v4670_v38 = vor.u32 %v4915_v11, %v4669_v33  ;;  %v4916_v9 = vld [vmem:[%s8126_s7 + $0x94] sm:$0xf0]  ;;  %v4634_v11 = vor.u32 %v4902_v14, %v4631_v2 }
 0x6e7   : > { %2740 = vadd.xlane.f32.xlu2 %v2719_v21  ;;  %2665 = vadd.xlane.f32.xlu1 %v7226_v54  ;;  %v4913_v21 = vld [vmem:[%s8126_s7 + $0x84] sm:$0xf] }
 0x6e8   : > { %3221 = vmatpush.bf16.msrb.mxu0 %v4670_v38  ;;  %3368 = vmatpush.bf16.msrb.mxu3 %v4682_v17  ;;  %v4899_v38 = vld [vmem:[%s8126_s7 + $0xc] sm:$0xf0]  ;;  %v4898_v17 = vld [vmem:[%s8126_s7 + $0xc] sm:$0xf] }
 0x6ea   : > { %v2656_v13 = vpop.xlane.xlu1 %2655 }
 0x6eb   : > { %v2688_v5 = vmul.f32 %v7173_v55, %v2656_v13  ;;  %v4671_v13 = vld [vmem:[%s8126_s7 + $0x90] sm:$0xf0] }
 0x6ec   : > { %3369 = vmatpush.bf16.msrb.mxu3 %v4666_v62 }
 0x6ed   : > { %v7236_v8 = vsub.f32 %v7166_v15, %v2688_v5  ;;  %v2617_v7 = vpop.f32.mrf.mxu3  ;;  %v4677_v5 = vld [vmem:[%s8126_s7 + $0x88] sm:$0xf] }
 0x6ee   : > { %v7251_v15 = vadd.f32 %v5476_v32, %v2617_v7  ;;  %v4678_v7 = vor.u32 %v4916_v9, %v4677_v5  ;;  %v4653_v32 = vld [vmem:[%s8126_s7 + $0x60] sm:$0xf] }
 0x6ef   : > { %v2720_v61 = vmul.f32 %v7236_v8, %v7236_v8  ;;  %2667 = vadd.xlane.f32.xlu1 %v7233_v0  ;;  %v4654_v1 = vor.u32 %v4911_v12, %v4653_v32  ;;  %v4615_v32 = vld [vmem:[%s8126_s7 + $0x18] sm:$0xf0] }
 0x6f0   : > { %3319 = vmatpush.bf16.msrb.mxu2 %v4678_v7  ;;  %v4613_v7 = vld [vmem:[%s8126_s7 + $0x8] sm:$0xf]  ;;  %v4618_v35 = vor.u32 %v4898_v17, %v4615_v32 }
 0x6f1   : > { %2742 = vadd.xlane.f32.xlu2 %v2720_v61  ;;  %v4674_v61 = vor.u32 %v4913_v21, %v4671_v13  ;;  %3222 = vmatpush.bf16.msrb.mxu0 %v4654_v1  ;;  %v4605_v21 = vld [vmem:[%s8126_s7] sm:$0xf]  ;;  %v4897_v13 = vld [vmem:[%s8126_s7 + $0x4] sm:$0xf]  ;;  %v4614_v12 = vor.u32 %v4900_v43, %v4613_v7 }
 0x6f2   : > { %v4606_v9 = vor.u32 %v4899_v38, %v4605_v21 }
 0x6f3   : > { %3270 = vmatpush.bf16.msrb.mxu1 %v4674_v61  ;;  %v4607_v61 = vld [vmem:[%s8126_s7 + $0x10] sm:$0xf0] }
 0x6f4   : > { %3320 = vmatpush.bf16.msrb.mxu2 %v4662_v30  ;;  %v4610_v27 = vor.u32 %v4897_v13, %v4607_v61 }
 0x6f5   : > { %3223 = vmatpush.bf16.msrb.mxu0 %v4638_v10 }
 0x6f7   : > { %3271 = vmatpush.bf16.msrb.mxu1 %v4658_v23 }
 0x6f8   : > { %3321 = vmatpush.bf16.msrb.mxu2 %v4646_v63 }
 0x6f9   : > { %2669 = vadd.xlane.f32.xlu2 %v7251_v15  ;;  %3224 = vmatpush.bf16.msrb.mxu0 %v4622_v16 }
 0x6fb   : > { %3272 = vmatpush.bf16.msrb.mxu1 %v4642_v29 }
 0x6fc   : > { %3322 = vmatpush.bf16.msrb.mxu2 %v4630_v36 }
 0x6fd   : > { %v2620_v53 = vpop.f32.mrf.mxu3  ;;  %3225 = vmatpush.bf16.msrb.mxu0 %v4606_v9 }
 0x6fe   : > { %v7294_v47 = vadd.f32 %v5477_v46, %v2620_v53  ;;  %v4906_v53 = vld [vmem:[%s8126_s7 + $0x4c] sm:$0xf] }
 0x6ff   : > { %v4650_v46 = vor.u32 %v4906_v53, %v4647_v59  ;;  %3273 = vmatpush.bf16.msrb.mxu1 %v4626_v3 }
 0x700   : > { %3323 = vmatpush.bf16.msrb.mxu2 %v4614_v12 }
 0x701   : > { %2671 = vadd.xlane.f32.xlu2 %v7294_v47  ;;  %3370 = vmatpush.bf16.msrb.mxu3 %v4650_v46 }
 0x703   : > { %3274 = vmatpush.bf16.msrb.mxu1 %v4610_v27 }
 0x705   : > { %3371 = vmatpush.bf16.msrb.mxu3 %v4634_v11  ;;  %v2622_v24 = vpop.f32.mrf.mxu3 }
 0x706   : > { %v7462_v4 = vadd.f32 %v5478_v60, %v2622_v24 }
 0x709   : > { %3372 = vmatpush.bf16.msrb.mxu3 %v4618_v35 }
 0x710   : > { %v2731_v58 = vpop.xlane.xlu2 %2730 }
 0x711   : > { %v2762_v33 = vmul.f32 %v2731_v58, %v7173_v55  ;;  %v7467_v58 = vld [vmem:[%s8125_s6] ss:$0 sm:$0xff] }
 0x713   : > { %v2778_v5 = vadd.f32 1e-05, %v2762_v33 }
 0x715   : > { %5399 = vrsqrt.f32 %v2778_v5  ;;  %vm2800_vm5 = vweird.f32 %v2778_v5 }
 0x718   : > { %v2733_v1 = vpop.xlane.xlu0 %2732  ;;  %v2658_v52 = vpop.xlane.xlu2 %2657 }
 0x719   : > { %v2763_v6 = vmul.f32 %v2733_v1, %v7173_v55  ;;  %v2689_v26 = vmul.f32 %v7173_v55, %v2658_v52 }
 0x71b   : > { %v5400_v23 = vpop.eup %5399  ;;  %v2779_v30 = vadd.f32 1e-05, %v2763_v6  ;;  %v7445_v34 = vsub.f32 %v7186_v50, %v2689_v26 }
 0x71c   : > { %v2795_v41 = vmul.f32 %v5400_v23, %v2778_v5  ;;  %vm2801_vm4 = vweird.f32 %v5400_v23 }
 0x71d   : > { %5401 = vrsqrt.f32 %v2779_v30  ;;  %v2721_v62 = vmul.f32 %v7445_v34, %v7445_v34  ;;  %vm2802_vm6 = vmor %vm2800_vm5, %vm2801_vm4  ;;  %vm2810_vm8 = vweird.f32 %v2779_v30 }
 0x71e   : > { %v2796_v37 = vmul.f32 %v5400_v23, %v2795_v41 }
 0x71f   : > { %2744 = vadd.xlane.f32.xlu0 %v2721_v62 }
 0x720   : > { %v2797_v42 = vmul.f32 0.5, %v2796_v37  ;;  %v2660_v44 = vpop.xlane.xlu2 %2659 }
 0x721   : > { %v2690_v10 = vmul.f32 %v7173_v55, %v2660_v44 }
 0x722   : > { %v2798_v56 = vsub.f32 1.5, %v2797_v42 }
 0x723   : > { %v5402_v22 = vpop.eup %5401  ;;  %v7451_v45 = vsub.f32 %v7192_v40, %v2690_v10  ;;  %v7458_v40 = vld [vmem:[%s8124_s5] ss:$0 sm:$0xff] }
 0x724   : > { %v2799_v29 = vmul.f32 %v5400_v23, %v2798_v56  ;;  %v2805_v50 = vmul.f32 %v5402_v22, %v2779_v30  ;;  %vm2811_vm7 = vweird.f32 %v5402_v22 }
 0x725   : > { %v2722_v63 = vmul.f32 %v7451_v45, %v7451_v45  ;;  %vm2812_vm9 = vmor %vm2810_vm8, %vm2811_vm7 }
 0x726   : > { %v2806_v53 = vmul.f32 %v5402_v22, %v2805_v50  ;;  %v2803_v59 = vsel %vm2802_vm6, %v5400_v23, %v2799_v29 }
 0x727   : > { %2746 = vadd.xlane.f32.xlu0 %v2722_v63  ;;  %v2954_v19 = vmul.f32 %v2803_v59, %v7177_v18 }
 0x728   : > { %v2807_v46 = vmul.f32 0.5, %v2806_v53 }
 0x729   : > { %v2973_v3 = vmul.f32 %v7458_v40, %v2954_v19 }
 0x72a   : > { %v2808_v20 = vsub.f32 1.5, %v2807_v46 }
 0x72b   : > { %v2992_v14 = vadd.f32 %v7467_v58, %v2973_v3 }
 0x72c   : > { %v2809_v16 = vmul.f32 %v5402_v22, %v2808_v20 }
 0x72e   : > { %v2813_v51 = vsel %vm2812_vm9, %v5402_v22, %v2809_v16 }
 0x72f   : > { %v2955_v36 = vmul.f32 %v2813_v51, %v7183_v57  ;;  %2673 = vadd.xlane.f32.xlu0 %v7462_v4 }
 0x731   : > { %v2974_v18 = vmul.f32 %v7458_v40, %v2955_v36 }
 0x733   : > { %v2993_v2 = vadd.f32 %v7467_v58, %v2974_v18 }
 0x735   : > { %v3008_v33 = vpack.c.bf16 %v2993_v2, %v2992_v14 }
 0x737   : > { %3226 = vmatmul.bf16.vlgmr.msrb.gmra.mxu0 %v3008_v33  ;;  %3275 = vmatmul.bf16.vlgmr.msrb.gmra.mxu1 %v3008_v33 }
 0x738   : > { %3324 = vmatmul.bf16.vlgmr.msrb.gmra.mxu2 %v3008_v33  ;;  %3373 = vmatmul.bf16.vlgmr.msrb.gmra.mxu3 %v3008_v33 }
 0x742   : > { %v2735_v11 = vpop.xlane.xlu0 %2734 }
 0x743   : > { %v2764_v21 = vmul.f32 %v2735_v11, %v7173_v55 }
 0x745   : > { %v2780_v38 = vadd.f32 1e-05, %v2764_v21 }
 0x747   : > { %5403 = vrsqrt.f32 %v2780_v38  ;;  %vm2820_vm11 = vweird.f32 %v2780_v38 }
 0x74a   : > { %v2737_v13 = vpop.xlane.xlu1 %2736  ;;  %v2662_v57 = vpop.xlane.xlu0 %2661 }
 0x74b   : > { %v2765_v5 = vmul.f32 %v2737_v13, %v7173_v55  ;;  %v2691_v9 = vmul.f32 %v7173_v55, %v2662_v57 }
 0x74d   : > { %v5404_v61 = vpop.eup %5403  ;;  %v2781_v7 = vadd.f32 1e-05, %v2765_v5  ;;  %v7479_v27 = vsub.f32 %v7206_v49, %v2691_v9 }
 0x74e   : > { %v2815_v43 = vmul.f32 %v5404_v61, %v2780_v38  ;;  %vm2821_vm10 = vweird.f32 %v5404_v61 }
 0x74f   : > { %5405 = vrsqrt.f32 %v2781_v7  ;;  %v2723_v17 = vmul.f32 %v7479_v27, %v7479_v27  ;;  %vm2822_vm12 = vmor %vm2820_vm11, %vm2821_vm10  ;;  %vm2830_vm14 = vweird.f32 %v2781_v7 }
 0x750   : > { %v2816_v32 = vmul.f32 %v5404_v61, %v2815_v43 }
 0x751   : > { %2748 = vadd.xlane.f32.xlu1 %v2723_v17 }
 0x752   : > { %v2817_v12 = vmul.f32 0.5, %v2816_v32  ;;  %v2739_v35 = vpop.xlane.xlu1 %2738  ;;  %v2664_v1 = vpop.xlane.xlu0 %2663 }
 0x753   : > { %v2766_v52 = vmul.f32 %v2739_v35, %v7173_v55  ;;  %v2692_v6 = vmul.f32 %v7173_v55, %v2664_v1 }
 0x754   : > { %v2818_v26 = vsub.f32 1.5, %v2817_v12 }
 0x755   : > { %v5406_v23 = vpop.eup %5405  ;;  %v2782_v30 = vadd.f32 1e-05, %v2766_v52  ;;  %v7486_v49 = vsub.f32 %v7216_v25, %v2692_v6 }
 0x756   : > { %v2819_v41 = vmul.f32 %v5404_v61, %v2818_v26  ;;  %v2825_v62 = vmul.f32 %v5406_v23, %v2781_v7  ;;  %vm2831_vm13 = vweird.f32 %v5406_v23 }
 0x757   : > { %5407 = vrsqrt.f32 %v2782_v30  ;;  %v2724_v37 = vmul.f32 %v7486_v49, %v7486_v49  ;;  %vm2832_vm15 = vmor %vm2830_vm14, %vm2831_vm13  ;;  %vm2840_vm2 = vweird.f32 %v2782_v30 }
 0x758   : > { %v2826_v42 = vmul.f32 %v5406_v23, %v2825_v62  ;;  %v2823_v44 = vsel %vm2822_vm12, %v5404_v61, %v2819_v41 }
 0x759   : > { %2750 = vadd.xlane.f32.xlu1 %v2724_v37  ;;  %v2956_v53 = vmul.f32 %v2823_v44, %v7197_v31 }
 0x75a   : > { %v2827_v10 = vmul.f32 0.5, %v2826_v42  ;;  %v2741_v56 = vpop.xlane.xlu2 %2740  ;;  %v2666_v22 = vpop.xlane.xlu1 %2665 }
 0x75b   : > { %v2767_v29 = vmul.f32 %v2741_v56, %v7173_v55  ;;  %v2693_v25 = vmul.f32 %v7173_v55, %v2666_v22  ;;  %v2975_v3 = vmul.f32 %v7458_v40, %v2956_v53 }
 0x75c   : > { %v2828_v50 = vsub.f32 1.5, %v2827_v10 }
 0x75d   : > { %v5408_v63 = vpop.eup %5407  ;;  %v2783_v59 = vadd.f32 1e-05, %v2767_v29  ;;  %v7494_v46 = vsub.f32 %v7226_v54, %v2693_v25  ;;  %v2994_v21 = vadd.f32 %v7467_v58, %v2975_v3 }
 0x75e   : > { %v2829_v24 = vmul.f32 %v5406_v23, %v2828_v50  ;;  %v2835_v20 = vmul.f32 %v5408_v63, %v2782_v30  ;;  %vm2841_vm1 = vweird.f32 %v5408_v63 }
 0x75f   : > { %5409 = vrsqrt.f32 %v2783_v59  ;;  %v2725_v19 = vmul.f32 %v7494_v46, %v7494_v46  ;;  %vm2842_vm3 = vmor %vm2840_vm2, %vm2841_vm1  ;;  %vm2850_vm4 = vweird.f32 %v2783_v59 }
 0x760   : > { %v2833_v16 = vsel %vm2832_vm15, %v5406_v23, %v2829_v24  ;;  %v2836_v60 = vmul.f32 %v5408_v63, %v2835_v20 }
 0x761   : > { %v2957_v51 = vmul.f32 %v2833_v16, %v7203_v28  ;;  %2752 = vadd.xlane.f32.xlu2 %v2725_v19 }
 0x762   : > { %v2837_v31 = vmul.f32 0.5, %v2836_v60  ;;  %v2668_v36 = vpop.xlane.xlu1 %2667 }
 0x763   : > { %v2694_v54 = vmul.f32 %v7173_v55, %v2668_v36  ;;  %v2976_v18 = vmul.f32 %v7458_v40, %v2957_v51 }
 0x764   : > { %v2838_v14 = vsub.f32 1.5, %v2837_v31  ;;  %v2743_v2 = vpop.xlane.xlu2 %2742 }
 0x765   : > { %v5410_v33 = vpop.eup %5409  ;;  %v7503_v11 = vsub.f32 %v7233_v0, %v2694_v54  ;;  %v2995_v38 = vadd.f32 %v7467_v58, %v2976_v18  ;;  %v2768_v42 = vmul.f32 %v2743_v2, %v7173_v55 }
 0x766   : > { %v2839_v28 = vmul.f32 %v5408_v63, %v2838_v14  ;;  %v2845_v13 = vmul.f32 %v5410_v33, %v2783_v59  ;;  %vm2851_vm0 = vweird.f32 %v5410_v33 }
 0x767   : > { %v3009_v57 = vpack.c.bf16 %v2995_v38, %v2994_v21  ;;  %v2726_v5 = vmul.f32 %v7503_v11, %v7503_v11  ;;  %vm2852_vm5 = vmor %vm2850_vm4, %vm2851_vm0  ;;  %v2784_v44 = vadd.f32 1e-05, %v2768_v42 }
 0x768   : > { %v2846_v9 = vmul.f32 %v5410_v33, %v2845_v13  ;;  %v2843_v61 = vsel %vm2842_vm3, %v5408_v63, %v2839_v28 }
 0x769   : > { %3231 = vmatmul.bf16.gmra.mxu0 %v3009_v57  ;;  %3280 = vmatmul.bf16.gmra.mxu1 %v3009_v57  ;;  %v2958_v17 = vmul.f32 %v2843_v61, %v7213_v48  ;;  %5411 = vrsqrt.f32 %v2784_v44  ;;  %vm2860_vm7 = vweird.f32 %v2784_v44 }
 0x76a   : > { %v2847_v7 = vmul.f32 0.5, %v2846_v9  ;;  %3329 = vmatmul.bf16.gmra.mxu2 %v3009_v57  ;;  %3378 = vmatmul.bf16.gmra.mxu3 %v3009_v57 }
 0x76b   : > { %2754 = vadd.xlane.f32.xlu0 %v2726_v5  ;;  %v2977_v26 = vmul.f32 %v7458_v40, %v2958_v17 }
 0x76c   : > { %v2848_v0 = vsub.f32 1.5, %v2847_v7  ;;  %v2670_v43 = vpop.xlane.xlu2 %2669 }
 0x76d   : > { %v2695_v32 = vmul.f32 %v7173_v55, %v2670_v43  ;;  %v2996_v41 = vadd.f32 %v7467_v58, %v2977_v26 }
 0x76e   : > { %v2849_v12 = vmul.f32 %v5410_v33, %v2848_v0 }
 0x76f   : > { %v7512_v35 = vsub.f32 %v7251_v15, %v2695_v32  ;;  %v5412_v10 = vpop.eup %5411 }
 0x770   : > { %v2853_v1 = vsel %vm2852_vm5, %v5410_v33, %v2849_v12  ;;  %v2855_v56 = vmul.f32 %v5412_v10, %v2784_v44  ;;  %vm2861_vm6 = vweird.f32 %v5412_v10 }
 0x771   : > { %v2959_v52 = vmul.f32 %v2853_v1, %v7223_v39  ;;  %v2727_v6 = vmul.f32 %v7512_v35, %v7512_v35  ;;  %vm2862_vm8 = vmor %vm2860_vm7, %vm2861_vm6 }
 0x772   : > { %v2856_v22 = vmul.f32 %v5412_v10, %v2855_v56 }
 0x773   : > { %2756 = vadd.xlane.f32.xlu1 %v2727_v6  ;;  %v2978_v23 = vmul.f32 %v7458_v40, %v2959_v52 }
 0x774   : > { %v2672_v48 = vpop.xlane.xlu2 %2671  ;;  %v2857_v50 = vmul.f32 0.5, %v2856_v22 }
 0x775   : > { %v2696_v30 = vmul.f32 %v7173_v55, %v2672_v48  ;;  %v2997_v62 = vadd.f32 %v7467_v58, %v2978_v23 }
 0x776   : > { %v2858_v63 = vsub.f32 1.5, %v2857_v50 }
 0x777   : > { %v7523_v15 = vsub.f32 %v7294_v47, %v2696_v30  ;;  %v3010_v37 = vpack.c.bf16 %v2997_v62, %v2996_v41 }
 0x778   : > { %v2859_v24 = vmul.f32 %v5412_v10, %v2858_v63 }
 0x779   : > { %3236 = vmatmul.bf16.gmra.mxu0 %v3010_v37  ;;  %3285 = vmatmul.bf16.gmra.mxu1 %v3010_v37  ;;  %v2728_v39 = vmul.f32 %v7523_v15, %v7523_v15 }
 0x77a   : > { %3334 = vmatmul.bf16.gmra.mxu2 %v3010_v37  ;;  %3383 = vmatmul.bf16.gmra.mxu3 %v3010_v37  ;;  %v2863_v16 = vsel %vm2862_vm8, %v5412_v10, %v2859_v24 }
 0x77b   : > { %2758 = vadd.xlane.f32.xlu2 %v2728_v39  ;;  %v2960_v36 = vmul.f32 %v2863_v16, %v7236_v8 }
 0x77d   : > { %v2979_v21 = vmul.f32 %v7458_v40, %v2960_v36 }
 0x77f   : > { %v2998_v28 = vadd.f32 %v7467_v58, %v2979_v21 }
 0x792   : > { %v2745_v29 = vpop.xlane.xlu0 %2744 }
 0x793   : > { %v2769_v47 = vmul.f32 %v2745_v29, %v7173_v55 }
 0x795   : > { %v2785_v25 = vadd.f32 1e-05, %v2769_v47 }
 0x797   : > { %5413 = vrsqrt.f32 %v2785_v25  ;;  %vm2870_vm10 = vweird.f32 %v2785_v25 }
 0x79a   : > { %v2747_v53 = vpop.xlane.xlu0 %2746 }
 0x79d   : > { %v5414_v59 = vpop.eup %5413 }
 0x79e   : > { %v2865_v20 = vmul.f32 %v5414_v59, %v2785_v25  ;;  %vm2871_vm9 = vweird.f32 %v5414_v59 }
 0x79f   : > { %vm2872_vm11 = vmor %vm2870_vm10, %vm2871_vm9 }
 0x7a0   : > { %v2866_v19 = vmul.f32 %v5414_v59, %v2865_v20 }
 0x7a2   : > { %v2867_v60 = vmul.f32 0.5, %v2866_v19  ;;  %v2674_v51 = vpop.xlane.xlu0 %2673 }
 0x7a3   : > { %v2697_v3 = vmul.f32 %v7173_v55, %v2674_v51 }
 0x7a4   : > { %v2868_v31 = vsub.f32 1.5, %v2867_v60 }
 0x7a5   : > { %v7532_v54 = vsub.f32 %v7462_v4, %v2697_v3  ;;  %v2770_v4 = vmul.f32 %v2747_v53, %v7173_v55 }
 0x7a6   : > { %v2869_v18 = vmul.f32 %v5414_v59, %v2868_v31 }
 0x7a7   : > { %v2729_v14 = vmul.f32 %v7532_v54, %v7532_v54  ;;  %v2786_v57 = vadd.f32 1e-05, %v2770_v4 }
 0x7a8   : > { %v2873_v2 = vsel %vm2872_vm11, %v5414_v59, %v2869_v18 }
 0x7a9   : > { %v2961_v33 = vmul.f32 %v2873_v2, %v7445_v34  ;;  %2760 = vadd.xlane.f32.xlu0 %v2729_v14  ;;  %5415 = vrsqrt.f32 %v2786_v57  ;;  %vm2880_vm13 = vweird.f32 %v2786_v57 }
 0x7ab   : > { %v2980_v38 = vmul.f32 %v7458_v40, %v2961_v33 }
 0x7ad   : > { %v2999_v8 = vadd.f32 %v7467_v58, %v2980_v38  ;;  %v4936_v38 = vld [vmem:[%s8128_s9 + $0x38] sm:$0xff] }
 0x7ae   : > { %3770 = vmatpush.bf16.msra.mxu0 %v4936_v38 }
 0x7af   : > { %v3011_v13 = vpack.c.bf16 %v2999_v8, %v2998_v28  ;;  %v5416_v5 = vpop.eup %5415 }
 0x7b0   : > { %v2875_v34 = vmul.f32 %v5416_v5, %v2786_v57  ;;  %vm2881_vm12 = vweird.f32 %v5416_v5 }
 0x7b1   : > { %3241 = vmatmul.bf16.gmra.mxu0 %v3011_v13  ;;  %3290 = vmatmul.bf16.gmra.mxu1 %v3011_v13  ;;  %vm2882_vm14 = vmor %vm2880_vm13, %vm2881_vm12 }
 0x7b2   : > { %3339 = vmatmul.bf16.gmra.mxu2 %v3011_v13  ;;  %3388 = vmatmul.bf16.gmra.mxu3 %v3011_v13  ;;  %v2876_v9 = vmul.f32 %v5416_v5, %v2875_v34 }
 0x7b4   : > { %v2877_v43 = vmul.f32 0.5, %v2876_v9 }
 0x7b6   : > { %v2878_v17 = vsub.f32 1.5, %v2877_v43 }
 0x7b8   : > { %v2879_v6 = vmul.f32 %v5416_v5, %v2878_v17 }
 0x7ba   : > { %v2883_v48 = vsel %vm2882_vm14, %v5416_v5, %v2879_v6 }
 0x7bb   : > { %v2962_v42 = vmul.f32 %v2883_v48, %v7451_v45 }
 0x7bd   : > { %v2981_v25 = vmul.f32 %v7458_v40, %v2962_v42 }
 0x7bf   : > { %v3000_v20 = vadd.f32 %v7467_v58, %v2981_v25  ;;  %v4951_v25 = vld [vmem:[%s8128_s9 + $0xb0] sm:$0xff] }
 0x7c4   : > { %v2749_v61 = vpop.xlane.xlu1 %2748 }
 0x7c5   : > { %v2771_v7 = vmul.f32 %v2749_v61, %v7173_v55 }
 0x7c7   : > { %v2787_v0 = vadd.f32 1e-05, %v2771_v7 }
 0x7c9   : > { %5417 = vrsqrt.f32 %v2787_v0  ;;  %vm2890_vm1 = vweird.f32 %v2787_v0 }
 0x7cc   : > { %v2751_v32 = vpop.xlane.xlu1 %2750 }
 0x7cd   : > { %v2772_v12 = vmul.f32 %v2751_v32, %v7173_v55 }
 0x7cf   : > { %v5418_v1 = vpop.eup %5417  ;;  %v2788_v52 = vadd.f32 1e-05, %v2772_v12 }
 0x7d0   : > { %v2885_v26 = vmul.f32 %v5418_v1, %v2787_v0  ;;  %vm2891_vm15 = vweird.f32 %v5418_v1 }
 0x7d1   : > { %5419 = vrsqrt.f32 %v2788_v52  ;;  %vm2892_vm2 = vmor %vm2890_vm1, %vm2891_vm15  ;;  %vm2900_vm0 = vweird.f32 %v2788_v52 }
 0x7d2   : > { %v2886_v23 = vmul.f32 %v5418_v1, %v2885_v26 }
 0x7d4   : > { %v2887_v30 = vmul.f32 0.5, %v2886_v23  ;;  %v2753_v41 = vpop.xlane.xlu2 %2752 }
 0x7d5   : > { %v2773_v62 = vmul.f32 %v2753_v41, %v7173_v55 }
 0x7d6   : > { %v2888_v37 = vsub.f32 1.5, %v2887_v30 }
 0x7d7   : > { %v5420_v39 = vpop.eup %5419  ;;  %v2789_v44 = vadd.f32 1e-05, %v2773_v62 }
 0x7d8   : > { %v2889_v10 = vmul.f32 %v5418_v1, %v2888_v37  ;;  %v2895_v56 = vmul.f32 %v5420_v39, %v2788_v52  ;;  %vm2901_vm3 = vweird.f32 %v5420_v39 }
 0x7d9   : > { %5421 = vrsqrt.f32 %v2789_v44  ;;  %vm2902_vm4 = vmor %vm2900_vm0, %vm2901_vm3  ;;  %vm2910_vm6 = vweird.f32 %v2789_v44 }
 0x7da   : > { %v2893_v22 = vsel %vm2892_vm2, %v5418_v1, %v2889_v10  ;;  %v2896_v29 = vmul.f32 %v5420_v39, %v2895_v56  ;;  %v4944_v56 = vld [vmem:[%s8128_s9 + $0x78] sm:$0xff] }
 0x7db   : > { %v2963_v47 = vmul.f32 %v2893_v22, %v7479_v27  ;;  %v7580_v22 = vld [vmem:[%s8128_s9 + $0xf8] sm:$0xff]  ;;  %3819 = vmatpush.bf16.msra.mxu1 %v4944_v56 }
 0x7dc   : > { %v2897_v50 = vmul.f32 0.5, %v2896_v29  ;;  %4962 = vmatpush.bf16.msra.mxu3 %v7580_v22  ;;  %v4935_v29 = vld [vmem:[%s8128_s9 + $0x30] sm:$0xff] }
 0x7dd   : > { %v2982_v63 = vmul.f32 %v7458_v40, %v2963_v47  ;;  %v4943_v47 = vld [vmem:[%s8128_s9 + $0x70] sm:$0xff]  ;;  %3771 = vmatpush.bf16.msra.mxu0 %v4935_v29 }
 0x7de   : > { %v2898_v53 = vsub.f32 1.5, %v2897_v50  ;;  %v2755_v59 = vpop.xlane.xlu0 %2754  ;;  %v7596_v50 = vld [vmem:[%s8128_s9 + $0xf0] sm:$0xff] }
 0x7df   : > { %v5422_v24 = vpop.eup %5421  ;;  %v2774_v45 = vmul.f32 %v2755_v59, %v7173_v55  ;;  %v3001_v19 = vadd.f32 %v7467_v58, %v2982_v63  ;;  %3820 = vmatpush.bf16.msra.mxu1 %v4943_v47  ;;  %v4934_v63 = vld [vmem:[%s8128_s9 + $0x28] sm:$0xff] }
 0x7e0   : > { %v2899_v16 = vmul.f32 %v5420_v39, %v2898_v53  ;;  %v2905_v60 = vmul.f32 %v5422_v24, %v2789_v44  ;;  %vm2911_vm5 = vweird.f32 %v5422_v24  ;;  %4963 = vmatpush.bf16.msra.mxu3 %v7596_v50  ;;  %v4942_v53 = vld [vmem:[%s8128_s9 + $0x68] sm:$0xff] }
 0x7e1   : > { %v2790_v51 = vadd.f32 1e-05, %v2774_v45  ;;  %v3012_v3 = vpack.c.bf16 %v3001_v19, %v3000_v20  ;;  %vm2912_vm7 = vmor %vm2910_vm6, %vm2911_vm5  ;;  %v4950_v59 = vld [vmem:[%s8128_s9 + $0xa8] sm:$0xff]  ;;  %3772 = vmatpush.bf16.msra.mxu0 %v4934_v63  ;;  %v4933_v19 = vld [vmem:[%s8128_s9 + $0x20] sm:$0xff] }
 0x7e2   : > { %v2906_v27 = vmul.f32 %v5422_v24, %v2905_v60  ;;  %v2903_v31 = vsel %vm2902_vm4, %v5420_v39, %v2899_v16  ;;  %v7613_v45 = vld [vmem:[%s8128_s9 + $0xe8] sm:$0xff]  ;;  %v4941_v16 = vld [vmem:[%s8128_s9 + $0x60] sm:$0xff] }
 0x7e3   : > { %5423 = vrsqrt.f32 %v2790_v51  ;;  %3246 = vmatmul.bf16.gmra.mxu0 %v3012_v3  ;;  %3295 = vmatmul.bf16.gmra.mxu1 %v3012_v3  ;;  %v2964_v2 = vmul.f32 %v2903_v31, %v7486_v49  ;;  %vm2920_vm9 = vweird.f32 %v2790_v51  ;;  %v4949_v60 = vld [vmem:[%s8128_s9 + $0xa0] sm:$0xff]  ;;  %v4932_v31 = vld [vmem:[%s8128_s9 + $0x18] sm:$0xff] }
 0x7e4   : > { %v2907_v36 = vmul.f32 0.5, %v2906_v27  ;;  %3344 = vmatmul.bf16.gmra.mxu2 %v3012_v3  ;;  %3393 = vmatmul.bf16.gmra.mxu3 %v3012_v3 }
 0x7e5   : > { %v2983_v5 = vmul.f32 %v7458_v40, %v2964_v2  ;;  %3821 = vmatpush.bf16.msra.mxu1 %v4942_v53  ;;  %4964 = vmatpush.bf16.msra.mxu3 %v7613_v45 }
 0x7e6   : > { %v2908_v18 = vsub.f32 1.5, %v2907_v36  ;;  %v2757_v14 = vpop.xlane.xlu1 %2756  ;;  %3773 = vmatpush.bf16.msra.mxu0 %v4933_v19  ;;  %v4940_v36 = vld [vmem:[%s8128_s9 + $0x58] sm:$0xff] }
 0x7e7   : > { %v2775_v33 = vmul.f32 %v2757_v14, %v7173_v55  ;;  %v3002_v61 = vadd.f32 %v7467_v58, %v2983_v5  ;;  %v7643_v14 = vpop.f32.mrf.mxu3  ;;  %v7668_v5 = vpop.f32.mrf.mxu1 }
 0x7e8   : > { %v2909_v21 = vmul.f32 %v5422_v24, %v2908_v18  ;;  %v4948_v18 = vld [vmem:[%s8128_s9 + $0x98] sm:$0xff] }
 0x7e9   : > { %v5424_v28 = vpop.eup %5423  ;;  %v2791_v8 = vadd.f32 1e-05, %v2775_v33  ;;  %3822 = vmatpush.bf16.msra.mxu1 %v4941_v16  ;;  %v7649_v33 = vld [vmem:[%s8128_s9 + $0xd8] sm:$0xff] }
 0x7ea   : > { %v2913_v4 = vsel %vm2912_vm7, %v5422_v24, %v2909_v21  ;;  %v2915_v13 = vmul.f32 %v5424_v28, %v2790_v51  ;;  %vm2921_vm8 = vweird.f32 %v5424_v28  ;;  %v7630_v51 = vld [vmem:[%s8128_s9 + $0xe0] sm:$0xff]  ;;  %3774 = vmatpush.bf16.msra.mxu0 %v4932_v31 }
 0x7eb   : > { %v2965_v57 = vmul.f32 %v2913_v4, %v7494_v46  ;;  %5425 = vrsqrt.f32 %v2791_v8  ;;  %vm2922_vm10 = vmor %vm2920_vm9, %vm2921_vm8  ;;  %vm2930_vm12 = vweird.f32 %v2791_v8  ;;  %4965 = vmatpush.bf16.msra.mxu3 %v7630_v51  ;;  %v4947_v4 = vld [vmem:[%s8128_s9 + $0x90] sm:$0xff] }
 0x7ec   : > { %v2916_v49 = vmul.f32 %v5424_v28, %v2915_v13  ;;  %v7664_v13 = vld [vmem:[%s8128_s9 + $0xd0] sm:$0xff] }
 0x7ed   : > { %v2984_v34 = vmul.f32 %v7458_v40, %v2965_v57  ;;  %3823 = vmatpush.bf16.msra.mxu1 %v4940_v36  ;;  %v7666_v57 = vpop.f32.mrf.mxu0 }
 0x7ee   : > { %v2917_v9 = vmul.f32 0.5, %v2916_v49  ;;  %v2759_v44 = vpop.xlane.xlu2 %2758  ;;  %v4930_v49 = vld [vmem:[%s8128_s9 + $0x8] sm:$0xff] }
 0x7ef   : > { %v3003_v7 = vadd.f32 %v7467_v58, %v2984_v34  ;;  %4966 = vmatpush.bf16.msra.mxu3 %v7649_v33  ;;  %v4938_v34 = vld [vmem:[%s8128_s9 + $0x48] sm:$0xff] }
 0x7f0   : > { %v2918_v0 = vsub.f32 1.5, %v2917_v9  ;;  %v7676_v9 = vpop.f32.mrf.mxu2 }
 0x7f1   : > { %v5426_v43 = vpop.eup %5425  ;;  %v3013_v17 = vpack.c.bf16 %v3003_v7, %v3002_v61  ;;  %v4946_v61 = vld [vmem:[%s8128_s9 + $0x88] sm:$0xff] }
 0x7f2   : > { %v2919_v32 = vmul.f32 %v5424_v28, %v2918_v0  ;;  %v2925_v12 = vmul.f32 %v5426_v43, %v2791_v8  ;;  %vm2931_vm11 = vweird.f32 %v5426_v43  ;;  %v4939_v8 = vld [vmem:[%s8128_s9 + $0x50] sm:$0xff]  ;;  %v7685_v7 = vld [vmem:[%s8128_s9 + $0xc8] sm:$0xff] }
 0x7f3   : > { %3251 = vmatmul.bf16.gmra.mxu0 %v3013_v17  ;;  %3300 = vmatmul.bf16.gmra.mxu1 %v3013_v17  ;;  %vm2932_vm13 = vmor %vm2930_vm12, %vm2931_vm11 }
 0x7f4   : > { %v2926_v46 = vmul.f32 %v5426_v43, %v2925_v12  ;;  %3349 = vmatmul.bf16.gmra.mxu2 %v3013_v17  ;;  %3398 = vmatmul.bf16.gmra.mxu3 %v3013_v17  ;;  %v2923_v1 = vsel %vm2922_vm10, %v5424_v28, %v2919_v32  ;;  %v4931_v28 = vld [vmem:[%s8128_s9 + $0x10] sm:$0xff]  ;;  %v4937_v17 = vld [vmem:[%s8128_s9 + $0x40] sm:$0xff]  ;;  %v7693_v12 = vpop.f32.mrf.mxu3 }
 0x7f5   : > { %v2966_v26 = vmul.f32 %v2923_v1, %v7503_v11  ;;  %v2776_v11 = vmul.f32 %v2759_v44, %v7173_v55  ;;  %3775 = vmatpush.bf16.msra.mxu0 %v4931_v28  ;;  %3824 = vmatpush.bf16.msra.mxu1 %v4939_v8  ;;  %v7702_v1 = vld [vmem:[%s8128_s9 + $0xc0] sm:$0xff] }
 0x7f6   : > { %v2927_v52 = vmul.f32 0.5, %v2926_v46  ;;  %4967 = vmatpush.bf16.msra.mxu3 %v7664_v13  ;;  %v4945_v46 = vld [vmem:[%s8128_s9 + $0x80] sm:$0xff] }
 0x7f7   : > { %v2985_v41 = vmul.f32 %v7458_v40, %v2966_v26  ;;  %v7569_v10 = vadd.f32 1e-05, %v2776_v11 }
 0x7f8   : > { %v2928_v6 = vsub.f32 1.5, %v2927_v52 }
 0x7f9   : > { %v3004_v37 = vadd.f32 %v7467_v58, %v2985_v41  ;;  %5427 = vrsqrt.f32 %v7569_v10  ;;  %3776 = vmatpush.bf16.msra.mxu0 %v4930_v49  ;;  %3825 = vmatpush.bf16.msra.mxu1 %v4938_v34  ;;  %vm2940_vm15 = vweird.f32 %v7569_v10 }
 0x7fa   : > { %v2929_v23 = vmul.f32 %v5426_v43, %v2928_v6  ;;  %4968 = vmatpush.bf16.msra.mxu3 %v7685_v7 }
 0x7fc   : > { %v2933_v48 = vsel %vm2932_vm13, %v5426_v43, %v2929_v23  ;;  %v4929_v43 = vld [vmem:[%s8128_s9] sm:$0xff]  ;;  %v3229_v23 = vpop.f32.mrf.mxu0 }
 0x7fd   : > { %v2967_v30 = vmul.f32 %v2933_v48, %v7512_v35  ;;  %v4952_v35 = vld [vmem:[%s8128_s9 + $0xb8] sm:$0xff]  ;;  %3777 = vmatpush.bf16.msra.mxu0 %v4929_v43  ;;  %3826 = vmatpush.bf16.msra.mxu1 %v4937_v17  ;;  %v3278_v48 = vpop.f32.mrf.mxu1 }
 0x7fe   : > { %3868 = vmatpush.bf16.msra.mxu2 %v4952_v35  ;;  %4969 = vmatpush.bf16.msra.mxu3 %v7702_v1 }
 0x7ff   : > { %v2986_v62 = vmul.f32 %v7458_v40, %v2967_v30  ;;  %v7608_v24 = vpop.eup %5427 }
 0x800   : > { %v2935_v20 = vmul.f32 %v7608_v24, %v7569_v10  ;;  %vm2941_vm14 = vweird.f32 %v7608_v24 }
 0x801   : > { %v3005_v39 = vadd.f32 %v7467_v58, %v2986_v62  ;;  %vm2942_vm1 = vmor %vm2940_vm15, %vm2941_vm14  ;;  %3917 = vmatpush.bf16.msrb.mxu0 %v7580_v22  ;;  %v3327_v62 = vpop.f32.mrf.mxu2 }
 0x802   : > { %3869 = vmatpush.bf16.msra.mxu2 %v4951_v25  ;;  %v2936_v3 = vmul.f32 %v7608_v24, %v2935_v20 }
 0x803   : > { %v3014_v42 = vpack.c.bf16 %v3005_v39, %v3004_v37 }
 0x804   : > { %v2937_v38 = vmul.f32 0.5, %v2936_v3  ;;  %v3232_v56 = vpop.f32.mrf.mxu0 }
 0x805   : > { %3256 = vmatmul.bf16.gmra.mxu0 %v3014_v42  ;;  %3305 = vmatmul.bf16.gmra.mxu1 %v3014_v42  ;;  %v3281_v29 = vpop.f32.mrf.mxu1 }
 0x806   : > { %3354 = vmatmul.bf16.gmra.mxu2 %v3014_v42  ;;  %3403 = vmatmul.bf16.gmra.mxu3 %v3014_v42  ;;  %v2938_v0 = vsub.f32 1.5, %v2937_v38  ;;  %v3379_v42 = vpop.f32.mrf.mxu3 }
 0x807   : > { %3870 = vmatpush.bf16.msra.mxu2 %v4950_v59  ;;  %3918 = vmatpush.bf16.msrb.mxu0 %v7596_v50 }
 0x808   : > { %v2939_v52 = vmul.f32 %v7608_v24, %v2938_v0 }
 0x809   : > { %v3330_v22 = vpop.f32.mrf.mxu2 }
 0x80a   : > { %v2943_v30 = vsel %vm2942_vm1, %v7608_v24, %v2939_v52 }
 0x80b   : > { %3871 = vmatpush.bf16.msra.mxu2 %v4949_v60  ;;  %v2968_v39 = vmul.f32 %v2943_v30, %v7523_v15  ;;  %3919 = vmatpush.bf16.msrb.mxu0 %v7613_v45 }
 0x80c   : > { %v3234_v53 = vpop.f32.mrf.mxu0 }
 0x80d   : > { %v2987_v35 = vmul.f32 %v7458_v40, %v2968_v39 }
 0x80e   : > { %v3381_v50 = vpop.f32.mrf.mxu3 }
 0x80f   : > { %3872 = vmatpush.bf16.msra.mxu2 %v4948_v18  ;;  %v3006_v15 = vadd.f32 %v7467_v58, %v2987_v35  ;;  %3920 = vmatpush.bf16.msrb.mxu0 %v7630_v51 }
 0x813   : > { %3873 = vmatpush.bf16.msra.mxu2 %v4947_v4  ;;  %3921 = vmatpush.bf16.msrb.mxu0 %v7649_v33 }
 0x816   : > { %v3384_v31 = vpop.f32.mrf.mxu3 }
 0x817   : > { %3874 = vmatpush.bf16.msra.mxu2 %v4946_v61  ;;  %3922 = vmatpush.bf16.msrb.mxu0 %v7664_v13 }
 0x81b   : > { %3875 = vmatpush.bf16.msra.mxu2 %v4945_v46  ;;  %3923 = vmatpush.bf16.msrb.mxu0 %v7685_v7 }
 0x81c   : > { %v2761_v27 = vpop.xlane.xlu0 %2760 }
 0x81d   : > { %v2777_v2 = vmul.f32 %v2761_v27, %v7173_v55 }
 0x81e   : > { %v3386_v7 = vpop.f32.mrf.mxu3 }
 0x81f   : > { %v2793_v21 = vadd.f32 1e-05, %v2777_v2  ;;  %3924 = vmatpush.bf16.msrb.mxu0 %v7702_v1 }
 0x821   : > { %5429 = vrsqrt.f32 %v2793_v21  ;;  %vm2950_vm3 = vweird.f32 %v2793_v21 }
 0x827   : > { %v5430_v32 = vpop.eup %5429 }
 0x828   : > { %v2945_v6 = vmul.f32 %v5430_v32, %v2793_v21  ;;  %vm2951_vm2 = vweird.f32 %v5430_v32 }
 0x829   : > { %vm2952_vm0 = vmor %vm2950_vm3, %vm2951_vm2 }
 0x82a   : > { %v2946_v26 = vmul.f32 %v5430_v32, %v2945_v6 }
 0x82c   : > { %v2947_v41 = vmul.f32 0.5, %v2946_v26 }
 0x82e   : > { %v2948_v37 = vsub.f32 1.5, %v2947_v41 }
 0x830   : > { %v2949_v44 = vmul.f32 %v5430_v32, %v2948_v37 }
 0x832   : > { %v2953_v11 = vsel %vm2952_vm0, %v5430_v32, %v2949_v44 }
 0x833   : > { %v2969_v10 = vmul.f32 %v2953_v11, %v7532_v54  ;;  %v3048_v54 = vld [vmem:[%s8127_s8] sm:$0xf] }
 0x834   : > { %v7723_v59 = vperm.slane %v3048_v54, 0  ;;  %v7725_v24 = vperm.slane %v3048_v54, 1  ;;  %v7727_v45 = vperm.slane %v3048_v54, 2  ;;  %v7729_v20 = vperm.slane %v3048_v54, 3 }
 0x835   : > { %v2988_v47 = vmul.f32 %v7458_v40, %v2969_v10  ;;  %v3283_v40 = vpop.f32.mrf.mxu1  ;;  %v3389_v37 = vpop.f32.mrf.mxu3 }
 0x836   : > { %v3230_v19 = vadd.f32 %v3229_v23, %v7723_v59  ;;  %v3279_v16 = vadd.f32 %v3278_v48, %v7725_v24  ;;  %v3328_v60 = vadd.f32 %v3327_v62, %v7727_v45  ;;  %v3382_v51 = vadd.f32 %v3381_v50, %v7729_v20 }
 0x837   : > { %v3007_v25 = vadd.f32 %v7467_v58, %v2988_v47  ;;  %v3332_v58 = vpop.f32.mrf.mxu2  ;;  %v3228_v3 = vadd.f32 %v7666_v57, %v7723_v59  ;;  %v3277_v27 = vadd.f32 %v7668_v5, %v7725_v24  ;;  %v3326_v36 = vadd.f32 %v7676_v9, %v7727_v45  ;;  %v3237_v57 = vpop.f32.mrf.mxu0 }
 0x838   : > { %v3380_v18 = vadd.f32 %v3379_v42, %v7729_v20  ;;  %v3418_v2 = vmax.f32 %v3230_v19, 0.0  ;;  %v3419_v33 = vmax.f32 %v3279_v16, 0.0  ;;  %v3420_v21 = vmax.f32 %v3328_v60, 0.0 }
 0x839   : > { %v3015_v63 = vpack.c.bf16 %v3007_v25, %v3006_v15  ;;  %v3429_v38 = vmax.f32 %v3382_v51, 0.0  ;;  %v3414_v28 = vmax.f32 %v3228_v3, 0.0  ;;  %v3415_v8 = vmax.f32 %v3277_v27, 0.0 }
 0x83a   : > { %v3416_v4 = vmax.f32 %v3326_v36, 0.0  ;;  %v3425_v13 = vmax.f32 %v3380_v18, 0.0  ;;  %v3235_v43 = vadd.f32 %v3234_v53, %v7723_v59  ;;  %v3284_v17 = vadd.f32 %v3283_v40, %v7725_v24 }
 0x83b   : > { %3261 = vmatmul.bf16.gmra.mxu0 %v3015_v63  ;;  %3310 = vmatmul.bf16.gmra.mxu1 %v3015_v63  ;;  %v3478_v34 = vpack.c.bf16 %v3418_v2, %v3414_v28  ;;  %v3479_v5 = vpack.c.bf16 %v3419_v33, %v3415_v8  ;;  %v3333_v32 = vadd.f32 %v3332_v58, %v7727_v45 }
 0x83c   : > { %3359 = vmatmul.bf16.gmra.mxu2 %v3015_v63  ;;  %3408 = vmatmul.bf16.gmra.mxu3 %v3015_v63  ;;  %v3480_v9 = vpack.c.bf16 %v3420_v21, %v3416_v4  ;;  %v3485_v0 = vpack.c.bf16 %v3429_v38, %v3425_v13  ;;  %v3387_v6 = vadd.f32 %v3386_v7, %v7729_v20  ;;  %v3426_v41 = vmax.f32 %v3235_v43, 0.0 }
 0x83d   : > { %v3286_v49 = vpop.f32.mrf.mxu1  ;;  %v3233_v26 = vadd.f32 %v3232_v56, %v7723_v59  ;;  %v3282_v1 = vadd.f32 %v3281_v29, %v7725_v24  ;;  %v3331_v48 = vadd.f32 %v3330_v22, %v7727_v45  ;;  %v3385_v30 = vadd.f32 %v3384_v31, %v7729_v20  ;;  %v3391_v22 = vpop.f32.mrf.mxu3 }
 0x83e   : > { %v3427_v62 = vmax.f32 %v3284_v17, 0.0  ;;  %v3428_v39 = vmax.f32 %v3333_v32, 0.0  ;;  %v3437_v42 = vmax.f32 %v3387_v6, 0.0  ;;  %v3392_v58 = vadd.f32 %v3391_v22, %v7729_v20 }
 0x83f   : > { %v3335_v61 = vpop.f32.mrf.mxu2  ;;  %v3239_v46 = vpop.f32.mrf.mxu0  ;;  %v3422_v44 = vmax.f32 %v3233_v26, 0.0  ;;  %v3423_v11 = vmax.f32 %v3282_v1, 0.0  ;;  %v3424_v10 = vmax.f32 %v3331_v48, 0.0  ;;  %v3433_v35 = vmax.f32 %v3385_v30, 0.0 }
 0x840   : > { %v3240_v54 = vadd.f32 %v3239_v46, %v7723_v59  ;;  %v3238_v19 = vadd.f32 %v3237_v57, %v7723_v59  ;;  %v3287_v16 = vadd.f32 %v3286_v49, %v7725_v24  ;;  %v3336_v60 = vadd.f32 %v3335_v61, %v7727_v45 }
 0x841   : > { %v3482_v47 = vpack.c.bf16 %v3426_v41, %v3422_v44  ;;  %v3483_v15 = vpack.c.bf16 %v3427_v62, %v3423_v11  ;;  %v3484_v50 = vpack.c.bf16 %v3428_v39, %v3424_v10  ;;  %v3489_v29 = vpack.c.bf16 %v3437_v42, %v3433_v35 }
 0x842   : > { %v3390_v51 = vadd.f32 %v3389_v37, %v7729_v20  ;;  %v3434_v31 = vmax.f32 %v3240_v54, 0.0  ;;  %v3445_v33 = vmax.f32 %v3392_v58, 0.0  ;;  %v3430_v21 = vmax.f32 %v3238_v19, 0.0 }
 0x843   : > { %v3431_v38 = vmax.f32 %v3287_v16, 0.0  ;;  %v3432_v8 = vmax.f32 %v3336_v60, 0.0 }
 0x844   : > { %v3441_v4 = vmax.f32 %v3390_v51, 0.0  ;;  %v3486_v13 = vpack.c.bf16 %v3434_v31, %v3430_v21 }
 0x845   : > { %v3288_v52 = vpop.f32.mrf.mxu1 }
 0x846   : > { %v3289_v53 = vadd.f32 %v3288_v52, %v7725_v24 }
 0x847   : > { %v3337_v23 = vpop.f32.mrf.mxu2  ;;  %v3242_v25 = vpop.f32.mrf.mxu0 }
 0x848   : > { %v3338_v40 = vadd.f32 %v3337_v23, %v7727_v45  ;;  %v3435_v36 = vmax.f32 %v3289_v53, 0.0  ;;  %v3243_v46 = vadd.f32 %v3242_v25, %v7723_v59 }
 0x84a   : > { %v3436_v2 = vmax.f32 %v3338_v40, 0.0  ;;  %v3487_v57 = vpack.c.bf16 %v3435_v36, %v3431_v38  ;;  %v3438_v37 = vmax.f32 %v3243_v46, 0.0 }
 0x84b   : > { %3778 = vmatmul.bf16.vlgmr.msra.gmra.mxu0 %v3478_v34  ;;  %3827 = vmatmul.bf16.vlgmr.msra.gmra.mxu1 %v3479_v5  ;;  %v3493_v34 = vpack.c.bf16 %v3445_v33, %v3441_v4 }
 0x84c   : > { %3876 = vmatmul.bf16.vlgmr.msra.gmra.mxu2 %v3480_v9  ;;  %3930 = vmatmul.bf16.vlgmr.msra.gmra.mxu3 %v3485_v0  ;;  %v3488_v49 = vpack.c.bf16 %v3436_v2, %v3432_v8 }
 0x84d   : > { %v3291_v56 = vpop.f32.mrf.mxu1 }
 0x84e   : > { %v3292_v52 = vadd.f32 %v3291_v56, %v7725_v24 }
 0x84f   : > { %v3340_v63 = vpop.f32.mrf.mxu2  ;;  %v3244_v3 = vpop.f32.mrf.mxu0 }
 0x850   : > { %v3245_v7 = vadd.f32 %v3244_v3, %v7723_v59  ;;  %v3341_v6 = vadd.f32 %v3340_v63, %v7727_v45  ;;  %v3439_v39 = vmax.f32 %v3292_v52, 0.0 }
 0x852   : > { %v3442_v1 = vmax.f32 %v3245_v7, 0.0  ;;  %v3440_v11 = vmax.f32 %v3341_v6, 0.0 }
 0x854   : > { %v3490_v35 = vpack.c.bf16 %v3442_v1, %v3438_v37 }
 0x855   : > { %v3293_v27 = vpop.f32.mrf.mxu1 }
 0x856   : > { %v3294_v43 = vadd.f32 %v3293_v27, %v7725_v24 }
 0x857   : > { %v3342_v18 = vpop.f32.mrf.mxu2 }
 0x858   : > { %v3343_v17 = vadd.f32 %v3342_v18, %v7727_v45  ;;  %v3443_v23 = vmax.f32 %v3294_v43, 0.0 }
 0x85a   : > { %v3444_v48 = vmax.f32 %v3343_v17, 0.0 }
 0x85b   : > { %3783 = vmatmul.bf16.gmra.mxu0 %v3482_v47  ;;  %3832 = vmatmul.bf16.gmra.mxu1 %v3483_v15  ;;  %v3491_v47 = vpack.c.bf16 %v3443_v23, %v3439_v39 }
 0x85c   : > { %3881 = vmatmul.bf16.gmra.mxu2 %v3484_v50  ;;  %3935 = vmatmul.bf16.gmra.mxu3 %v3489_v29  ;;  %v3492_v25 = vpack.c.bf16 %v3444_v48, %v3440_v11 }
 0x860   : > { %v3247_v5 = vpop.f32.mrf.mxu0  ;;  %v3296_v61 = vpop.f32.mrf.mxu1 }
 0x861   : > { %v3248_v58 = vadd.f32 %v3247_v5, %v7723_v59  ;;  %v3297_v19 = vadd.f32 %v3296_v61, %v7725_v24 }
 0x863   : > { %v3446_v36 = vmax.f32 %v3248_v58, 0.0  ;;  %v3447_v18 = vmax.f32 %v3297_v19, 0.0 }
 0x867   : > { %v3394_v28 = vpop.f32.mrf.mxu3  ;;  %v3345_v9 = vpop.f32.mrf.mxu2 }
 0x868   : > { %v3395_v26 = vadd.f32 %v3394_v28, %v7729_v20  ;;  %v3249_v30 = vpop.f32.mrf.mxu0  ;;  %v3298_v41 = vpop.f32.mrf.mxu1  ;;  %v3346_v16 = vadd.f32 %v3345_v9, %v7727_v45 }
 0x869   : > { %v3250_v63 = vadd.f32 %v3249_v30, %v7723_v59  ;;  %v3299_v22 = vadd.f32 %v3298_v41, %v7725_v24 }
 0x86a   : > { %v3449_v10 = vmax.f32 %v3395_v26, 0.0  ;;  %v3448_v2 = vmax.f32 %v3346_v16, 0.0 }
 0x86b   : > { %3788 = vmatmul.bf16.gmra.mxu0 %v3486_v13  ;;  %3837 = vmatmul.bf16.gmra.mxu1 %v3487_v57  ;;  %v3450_v51 = vmax.f32 %v3250_v63, 0.0  ;;  %v3451_v3 = vmax.f32 %v3299_v22, 0.0 }
 0x86c   : > { %3886 = vmatmul.bf16.gmra.mxu2 %v3488_v49  ;;  %3940 = vmatmul.bf16.gmra.mxu3 %v3493_v34 }
 0x86d   : > { %v3495_v21 = vpack.c.bf16 %v3451_v3, %v3447_v18  ;;  %v3494_v28 = vpack.c.bf16 %v3450_v51, %v3446_v36 }
 0x86f   : > { %v3396_v0 = vpop.f32.mrf.mxu3  ;;  %v3347_v42 = vpop.f32.mrf.mxu2 }
 0x870   : > { %v3397_v32 = vadd.f32 %v3396_v0, %v7729_v20  ;;  %v3252_v50 = vpop.f32.mrf.mxu0  ;;  %v3301_v29 = vpop.f32.mrf.mxu1  ;;  %v3348_v53 = vadd.f32 %v3347_v42, %v7727_v45 }
 0x871   : > { %v3253_v7 = vadd.f32 %v3252_v50, %v7723_v59  ;;  %v3302_v43 = vadd.f32 %v3301_v29, %v7725_v24 }
 0x872   : > { %v3453_v62 = vmax.f32 %v3397_v32, 0.0  ;;  %v3452_v27 = vmax.f32 %v3348_v53, 0.0 }
 0x873   : > { %v3454_v30 = vmax.f32 %v3253_v7, 0.0  ;;  %v3455_v41 = vmax.f32 %v3302_v43, 0.0 }
 0x874   : > { %v3497_v15 = vpack.c.bf16 %v3453_v62, %v3449_v10  ;;  %v3496_v8 = vpack.c.bf16 %v3452_v27, %v3448_v2 }
 0x877   : > { %v3399_v44 = vpop.f32.mrf.mxu3  ;;  %v3350_v54 = vpop.f32.mrf.mxu2 }
 0x878   : > { %v3400_v60 = vadd.f32 %v3399_v44, %v7729_v20  ;;  %v3254_v4 = vpop.f32.mrf.mxu0  ;;  %v3303_v13 = vpop.f32.mrf.mxu1  ;;  %v3351_v17 = vadd.f32 %v3350_v54, %v7727_v45 }
 0x879   : > { %v3255_v49 = vadd.f32 %v3254_v4, %v7723_v59  ;;  %v3304_v5 = vadd.f32 %v3303_v13, %v7725_v24 }
 0x87a   : > { %v3457_v33 = vmax.f32 %v3400_v60, 0.0  ;;  %v3456_v62 = vmax.f32 %v3351_v17, 0.0 }
 0x87b   : > { %3793 = vmatmul.bf16.gmra.mxu0 %v3490_v35  ;;  %3842 = vmatmul.bf16.gmra.mxu1 %v3491_v47  ;;  %v3458_v6 = vmax.f32 %v3255_v49, 0.0  ;;  %v3459_v26 = vmax.f32 %v3304_v5, 0.0  ;;  %v7798_v5 = vld [vmem:[%s8129_s10] ss:$0 sm:$0xff] }
 0x87c   : > { %3891 = vmatmul.bf16.gmra.mxu2 %v3492_v25  ;;  %3945 = vmatmul.bf16.gmra.mxu3 %v3497_v15 }
 0x87d   : > { %v3498_v39 = vpack.c.bf16 %v3458_v6, %v3454_v30  ;;  %v3499_v42 = vpack.c.bf16 %v3459_v26, %v3455_v41  ;;  %v3377_v30 = vadd.f32 %v7693_v12, %v7729_v20 }
 0x87f   : > { %v3401_v56 = vpop.f32.mrf.mxu3  ;;  %v3352_v34 = vpop.f32.mrf.mxu2 }
 0x880   : > { %v3402_v40 = vadd.f32 %v3401_v56, %v7729_v20  ;;  %v3353_v9 = vadd.f32 %v3352_v34, %v7727_v45 }
 0x882   : > { %v3461_v31 = vmax.f32 %v3402_v40, 0.0  ;;  %v3257_v32 = vpop.f32.mrf.mxu0  ;;  %v3306_v46 = vpop.f32.mrf.mxu1  ;;  %v3460_v23 = vmax.f32 %v3353_v9, 0.0 }
 0x883   : > { %v3258_v50 = vadd.f32 %v3257_v32, %v7723_v59  ;;  %v3307_v29 = vadd.f32 %v3306_v46, %v7725_v24 }
 0x884   : > { %v3501_v57 = vpack.c.bf16 %v3461_v31, %v3457_v33  ;;  %v3500_v44 = vpack.c.bf16 %v3460_v23, %v3456_v62 }
 0x885   : > { %v3462_v40 = vmax.f32 %v3258_v50, 0.0  ;;  %v3463_v58 = vmax.f32 %v3307_v29, 0.0 }
 0x889   : > { %v3404_v38 = vpop.f32.mrf.mxu3  ;;  %v3355_v1 = vpop.f32.mrf.mxu2 }
 0x88a   : > { %v3405_v52 = vadd.f32 %v3404_v38, %v7729_v20  ;;  %v3259_v10 = vpop.f32.mrf.mxu0  ;;  %v3308_v35 = vpop.f32.mrf.mxu1  ;;  %v3356_v63 = vadd.f32 %v3355_v1, %v7727_v45 }
 0x88b   : > { %3798 = vmatmul.bf16.gmra.mxu0 %v3494_v28  ;;  %3847 = vmatmul.bf16.gmra.mxu1 %v3495_v21  ;;  %v3260_v15 = vadd.f32 %v3259_v10, %v7723_v59  ;;  %v3309_v25 = vadd.f32 %v3308_v35, %v7725_v24 }
 0x88c   : > { %3896 = vmatmul.bf16.gmra.mxu2 %v3496_v8  ;;  %3950 = vmatmul.bf16.gmra.mxu3 %v3501_v57  ;;  %v3465_v37 = vmax.f32 %v3405_v52, 0.0  ;;  %v3464_v19 = vmax.f32 %v3356_v63, 0.0 }
 0x88d   : > { %v3466_v22 = vmax.f32 %v3260_v15, 0.0  ;;  %v3467_v54 = vmax.f32 %v3309_v25, 0.0 }
 0x88f   : > { %v3502_v16 = vpack.c.bf16 %v3466_v22, %v3462_v40  ;;  %v3503_v60 = vpack.c.bf16 %v3467_v54, %v3463_v58 }
 0x891   : > { %v3406_v61 = vpop.f32.mrf.mxu3  ;;  %v3357_v47 = vpop.f32.mrf.mxu2 }
 0x892   : > { %v3407_v0 = vadd.f32 %v3406_v61, %v7729_v20  ;;  %v3358_v56 = vadd.f32 %v3357_v47, %v7727_v45 }
 0x894   : > { %v3469_v48 = vmax.f32 %v3407_v0, 0.0  ;;  %v3468_v53 = vmax.f32 %v3358_v56, 0.0 }
 0x896   : > { %v3505_v11 = vpack.c.bf16 %v3469_v48, %v3465_v37  ;;  %v3504_v51 = vpack.c.bf16 %v3468_v53, %v3464_v19  ;;  %v5479_v19 = vld [vmem:[%s5752_s24 + $0x10] sm:$0xff] }
 0x89b   : > { %3803 = vmatmul.bf16.gmra.mxu0 %v3498_v39  ;;  %3852 = vmatmul.bf16.gmra.mxu1 %v3499_v42 }
 0x89c   : > { %3901 = vmatmul.bf16.gmra.mxu2 %v3500_v44  ;;  %3955 = vmatmul.bf16.gmra.mxu3 %v3505_v11  ;;  %v3421_v44 = vmax.f32 %v3377_v30, 0.0 }
 0x8ab   : > { %3808 = vmatmul.bf16.gmra.mxu0 %v3502_v16  ;;  %3857 = vmatmul.bf16.gmra.mxu1 %v3503_v60 }
 0x8ac   : > { %3906 = vmatmul.bf16.gmra.mxu2 %v3504_v51 }
 0x8b8   : > { %v3262_v3 = vpop.f32.mrf.mxu0  ;;  %v3311_v27 = vpop.f32.mrf.mxu1 }
 0x8b9   : > { %v3263_v31 = vadd.f32 %v3262_v3, %v7723_v59  ;;  %v3312_v36 = vadd.f32 %v3311_v27, %v7725_v24 }
 0x8bb   : > { %v3470_v8 = vmax.f32 %v3263_v31, 0.0  ;;  %v3471_v4 = vmax.f32 %v3312_v36, 0.0 }
 0x8bf   : > { %v3360_v18 = vpop.f32.mrf.mxu2  ;;  %v3409_v2 = vpop.f32.mrf.mxu3 }
 0x8c0   : > { %v3264_v33 = vpop.f32.mrf.mxu0  ;;  %v3313_v21 = vpop.f32.mrf.mxu1  ;;  %v3361_v61 = vadd.f32 %v3360_v18, %v7727_v45  ;;  %v3410_v9 = vadd.f32 %v3409_v2, %v7729_v20 }
 0x8c1   : > { %v3265_v38 = vadd.f32 %v3264_v33, %v7723_v59  ;;  %v3314_v28 = vadd.f32 %v3313_v21, %v7725_v24  ;;  %v5480_v33 = vld [vmem:[%s5752_s24 + $0x18] sm:$0xff] }
 0x8c2   : > { %v3472_v46 = vmax.f32 %v3361_v61, 0.0  ;;  %v3473_v52 = vmax.f32 %v3410_v9, 0.0  ;;  %v5481_v61 = vld [vmem:[%s5752_s24 + $0x20] sm:$0xff] }
 0x8c3   : > { %v3474_v13 = vmax.f32 %v3265_v38, 0.0  ;;  %v3475_v57 = vmax.f32 %v3314_v28, 0.0 }
 0x8c5   : > { %v3506_v34 = vpack.c.bf16 %v3474_v13, %v3470_v8  ;;  %v3507_v49 = vpack.c.bf16 %v3475_v57, %v3471_v4 }
 0x8c7   : > { %v3362_v0 = vpop.f32.mrf.mxu2  ;;  %v3411_v7 = vpop.f32.mrf.mxu3  ;;  %3813 = vmatmul.bf16.gmra.mxu0 %v3506_v34  ;;  %3862 = vmatmul.bf16.gmra.mxu1 %v3507_v49 }
 0x8c8   : > { %v3363_v59 = vadd.f32 %v3362_v0, %v7727_v45  ;;  %v3412_v24 = vadd.f32 %v3411_v7, %v7729_v20  ;;  %v3779_v43 = vpop.f32.mrf.mxu0  ;;  %v3828_v17 = vpop.f32.mrf.mxu1  ;;  %v3375_v45 = vadd.f32 %v7643_v14, %v7729_v20 }
 0x8c9   : > { %v3780_v32 = vadd.f32 %v7798_v5, %v3779_v43 }
 0x8ca   : > { %v3476_v6 = vmax.f32 %v3363_v59, 0.0  ;;  %v3477_v26 = vmax.f32 %v3412_v24, 0.0  ;;  %v3417_v10 = vmax.f32 %v3375_v45, 0.0 }
 0x8cb   : > { %v3829_v1 = vadd.f32 %v3828_v17, %v3780_v32 }
 0x8cc   : > { %v3508_v23 = vpack.c.bf16 %v3476_v6, %v3472_v46  ;;  %v3509_v48 = vpack.c.bf16 %v3477_v26, %v3473_v52  ;;  %v3481_v47 = vpack.c.bf16 %v3421_v44, %v3417_v10  ;;  %v5482_v46 = vld [vmem:[%s5752_s24 + $0x28] sm:$0xff] }
 0x8ce   : > { %3911 = vmatmul.bf16.gmra.mxu2 %v3508_v23  ;;  %3960 = vmatmul.bf16.gmra.mxu3 %v3509_v48 }
 0x8cf   : > { %v3877_v41 = vpop.f32.mrf.mxu2  ;;  %v3931_v62 = vpop.f32.mrf.mxu3 }
 0x8d0   : > { %v7809_v37 = vadd.f32 %v3877_v41, %v3829_v1  ;;  %v3781_v39 = vpop.f32.mrf.mxu0  ;;  %v3830_v42 = vpop.f32.mrf.mxu1 }
 0x8d1   : > { %v3782_v11 = vadd.f32 %v7798_v5, %v3781_v39 }
 0x8d3   : > { %v3831_v35 = vadd.f32 %v3830_v42, %v3782_v11 }
 0x8d7   : > { %v3879_v15 = vpop.f32.mrf.mxu2  ;;  %v3933_v12 = vpop.f32.mrf.mxu3  ;;  %3925 = vmatmul.bf16.vlgmr.msrb.gmra.mxu0 %v3481_v47 }
 0x8d8   : > { %v7812_v25 = vadd.f32 %v3879_v15, %v3831_v35  ;;  %v3784_v56 = vpop.f32.mrf.mxu0  ;;  %v3833_v14 = vpop.f32.mrf.mxu1 }
 0x8d9   : > { %v3785_v20 = vadd.f32 %v7798_v5, %v3784_v56  ;;  %v5484_v56 = vld [vmem:[%s5752_s24 + $0x38] sm:$0xff] }
 0x8db   : > { %v3834_v50 = vadd.f32 %v3833_v14, %v3785_v20 }
 0x8df   : > { %v3882_v29 = vpop.f32.mrf.mxu2  ;;  %v3936_v63 = vpop.f32.mrf.mxu3 }
 0x8e0   : > { %v3883_v22 = vadd.f32 %v3882_v29, %v3834_v50  ;;  %v3786_v54 = vpop.f32.mrf.mxu0  ;;  %v3835_v53 = vpop.f32.mrf.mxu1 }
 0x8e1   : > { %v3787_v58 = vadd.f32 %v7798_v5, %v3786_v54 }
 0x8e2   : > { %v3932_v40 = vadd.f32 %v3931_v62, %v3883_v22  ;;  %v5483_v62 = vld [vmem:[%s5752_s24 + $0x30] sm:$0xff] }
 0x8e3   : > { %v3836_v60 = vadd.f32 %v3835_v53, %v3787_v58  ;;  %v5485_v58 = vld [vmem:[%s5752_s24 + $0x40] sm:$0xff] }
 0x8e4   : > { %v7817_v16 = vadd.f32 %v5479_v19, %v3932_v40 }
 0x8e6   : > { %3988 = vadd.xlane.f32.xlu0 %v7817_v16 }
 0x8e7   : > { %v3884_v51 = vpop.f32.mrf.mxu2  ;;  %v3938_v36 = vpop.f32.mrf.mxu3 }
 0x8e8   : > { %v3885_v3 = vadd.f32 %v3884_v51, %v3836_v60  ;;  %v3789_v27 = vpop.f32.mrf.mxu0  ;;  %v3838_v31 = vpop.f32.mrf.mxu1 }
 0x8e9   : > { %v3790_v2 = vadd.f32 %v7798_v5, %v3789_v27 }
 0x8ea   : > { %v3934_v18 = vadd.f32 %v3933_v12, %v3885_v3 }
 0x8eb   : > { %v3839_v38 = vadd.f32 %v3838_v31, %v3790_v2 }
 0x8ec   : > { %v7822_v21 = vadd.f32 %v5480_v33, %v3934_v18  ;;  %v5486_v33 = vld [vmem:[%s5752_s24 + $0x48] sm:$0xff] }
 0x8ee   : > { %3990 = vadd.xlane.f32.xlu1 %v7822_v21 }
 0x8ef   : > { %v3887_v28 = vpop.f32.mrf.mxu2  ;;  %v3941_v49 = vpop.f32.mrf.mxu3 }
 0x8f0   : > { %v3888_v8 = vadd.f32 %v3887_v28, %v3839_v38  ;;  %v3791_v4 = vpop.f32.mrf.mxu0  ;;  %v3840_v13 = vpop.f32.mrf.mxu1 }
 0x8f1   : > { %v3792_v34 = vadd.f32 %v7798_v5, %v3791_v4 }
 0x8f2   : > { %v3937_v57 = vadd.f32 %v3936_v63, %v3888_v8 }
 0x8f3   : > { %v3841_v0 = vadd.f32 %v3840_v13, %v3792_v34 }
 0x8f4   : > { %v7827_v9 = vadd.f32 %v5481_v61, %v3937_v57  ;;  %v5487_v61 = vld [vmem:[%s5752_s24 + $0x50] sm:$0xff] }
 0x8f6   : > { %3992 = vadd.xlane.f32.xlu2 %v7827_v9 }
 0x8f7   : > { %v3889_v7 = vpop.f32.mrf.mxu2  ;;  %v3943_v6 = vpop.f32.mrf.mxu3 }
 0x8f8   : > { %v3890_v59 = vadd.f32 %v3889_v7, %v3841_v0  ;;  %v3794_v24 = vpop.f32.mrf.mxu0  ;;  %v3843_v43 = vpop.f32.mrf.mxu1 }
 0x8f9   : > { %v3795_v32 = vadd.f32 %v7798_v5, %v3794_v24 }
 0x8fa   : > { %v3939_v17 = vadd.f32 %v3938_v36, %v3890_v59 }
 0x8fb   : > { %v3844_v26 = vadd.f32 %v3843_v43, %v3795_v32 }
 0x8fc   : > { %v7832_v52 = vadd.f32 %v5482_v46, %v3939_v17 }
 0x8fe   : > { %3994 = vadd.xlane.f32.xlu0 %v7832_v52 }
 0x8ff   : > { %v3892_v1 = vpop.f32.mrf.mxu2  ;;  %v3946_v44 = vpop.f32.mrf.mxu3 }
 0x900   : > { %v3893_v23 = vadd.f32 %v3892_v1, %v3844_v26  ;;  %v3796_v48 = vpop.f32.mrf.mxu0  ;;  %v3845_v30 = vpop.f32.mrf.mxu1  ;;  %v5488_v26 = vld [vmem:[%s5752_s24 + $0x58] sm:$0xff] }
 0x901   : > { %v3797_v41 = vadd.f32 %v7798_v5, %v3796_v48 }
 0x902   : > { %v3942_v45 = vadd.f32 %v3941_v49, %v3893_v23 }
 0x903   : > { %v3846_v42 = vadd.f32 %v3845_v30, %v3797_v41 }
 0x904   : > { %v7837_v39 = vadd.f32 %v5483_v62, %v3942_v45 }
 0x906   : > { %3996 = vadd.xlane.f32.xlu1 %v7837_v39 }
 0x907   : > { %v3894_v11 = vpop.f32.mrf.mxu2  ;;  %v3948_v54 = vpop.f32.mrf.mxu3 }
 0x908   : > { %v3895_v10 = vadd.f32 %v3894_v11, %v3846_v42  ;;  %v3799_v35 = vpop.f32.mrf.mxu0  ;;  %v3848_v47 = vpop.f32.mrf.mxu1 }
 0x909   : > { %v3800_v12 = vadd.f32 %v7798_v5, %v3799_v35 }
 0x90a   : > { %v3944_v15 = vadd.f32 %v3943_v6, %v3895_v10 }
 0x90b   : > { %v3849_v20 = vadd.f32 %v3848_v47, %v3800_v12 }
 0x90c   : > { %v7842_v14 = vadd.f32 %v5484_v56, %v3944_v15 }
 0x90e   : > { %3998 = vadd.xlane.f32.xlu2 %v7842_v14 }
 0x90f   : > { %v3897_v50 = vpop.f32.mrf.mxu2  ;;  %v3951_v2 = vpop.f32.mrf.mxu3 }
 0x910   : > { %v3898_v29 = vadd.f32 %v3897_v50, %v3849_v20  ;;  %v3801_v63 = vpop.f32.mrf.mxu0  ;;  %v3850_v22 = vpop.f32.mrf.mxu1  ;;  %v5490_v20 = vld [vmem:[%s5752_s24 + $0x68] sm:$0xff] }
 0x911   : > { %v3802_v40 = vadd.f32 %v7798_v5, %v3801_v63 }
 0x912   : > { %v3947_v53 = vadd.f32 %v3946_v44, %v3898_v29  ;;  %v5489_v44 = vld [vmem:[%s5752_s24 + $0x60] sm:$0xff] }
 0x913   : > { %v3851_v60 = vadd.f32 %v3850_v22, %v3802_v40 }
 0x914   : > { %v7847_v19 = vadd.f32 %v5485_v58, %v3947_v53 }
 0x916   : > { %4000 = vadd.xlane.f32.xlu0 %v7847_v19 }
 0x917   : > { %v3899_v51 = vpop.f32.mrf.mxu2  ;;  %v3953_v7 = vpop.f32.mrf.mxu3 }
 0x918   : > { %v3900_v3 = vadd.f32 %v3899_v51, %v3851_v60  ;;  %v3804_v27 = vpop.f32.mrf.mxu0  ;;  %v3853_v31 = vpop.f32.mrf.mxu1 }
 0x919   : > { %v3805_v18 = vadd.f32 %v7798_v5, %v3804_v27 }
 0x91a   : > { %v3949_v36 = vadd.f32 %v3948_v54, %v3900_v3 }
 0x91b   : > { %v3854_v28 = vadd.f32 %v3853_v31, %v3805_v18 }
 0x91c   : > { %v7852_v38 = vadd.f32 %v5486_v33, %v3949_v36  ;;  %v5491_v36 = vld [vmem:[%s5752_s24 + $0x70] sm:$0xff]  ;;  %v5492_v33 = vld [vmem:[%s5752_s24] sm:$0xff] }
 0x91e   : > { %4002 = vadd.xlane.f32.xlu1 %v7852_v38 }
 0x91f   : > { %v3902_v8 = vpop.f32.mrf.mxu2  ;;  %v3956_v48 = vpop.f32.mrf.mxu3 }
 0x920   : > { %v3903_v4 = vadd.f32 %v3902_v8, %v3854_v28  ;;  %v3806_v13 = vpop.f32.mrf.mxu0  ;;  %v3855_v57 = vpop.f32.mrf.mxu1 }
 0x921   : > { %v3807_v49 = vadd.f32 %v7798_v5, %v3806_v13 }
 0x922   : > { %v3952_v34 = vadd.f32 %v3951_v2, %v3903_v4 }
 0x923   : > { %v3856_v59 = vadd.f32 %v3855_v57, %v3807_v49 }
 0x924   : > { %v7857_v0 = vadd.f32 %v5487_v61, %v3952_v34  ;;  %v5493_v61 = vld [vmem:[%s5752_s24 + $0x78] sm:$0xff] }
 0x926   : > { %4004 = vadd.xlane.f32.xlu2 %v7857_v0 }
 0x927   : > { %v3904_v24 = vpop.f32.mrf.mxu2  ;;  %v3958_v12 = vpop.f32.mrf.mxu3 }
 0x928   : > { %v3905_v43 = vadd.f32 %v3904_v24, %v3856_v59  ;;  %v3809_v17 = vpop.f32.mrf.mxu0  ;;  %v3858_v6 = vpop.f32.mrf.mxu1  ;;  %v5494_v24 = vld [vmem:[%s5752_s24 + $0x8] sm:$0xff]  ;;  %s431_s24 = sand.u32 1, %s5549_s26  }
 0x929   : > { %v3810_v46 = vadd.f32 %v7798_v5, %v3809_v17  ;;  %s4440_s20 = sshll.u32 %s431_s24, 7  ;;  %s4359_s15 = scalar_lea.sflag [#allocation3], %s431_s24 }
 0x92a   : > { %v3954_v32 = vadd.f32 %v3953_v7, %v3905_v43  ;;  %s8014_s30 = scalar_lea.vmem [#allocation2], %s4440_s20 }
 0x92b   : > { %v3859_v23 = vadd.f32 %v3858_v6, %v3810_v46  ;;  %s4371_s29 = sshll.u32 %s8014_s30, 4  ;;  %s4372_s29 = int_to_ptr.vmem [resolvable:$true] %s4371_s29 }
 0x92c   : > { %v7862_v1 = vadd.f32 %v5488_v26, %v3954_v32 }
 0x92e   : > { %4006 = vadd.xlane.f32.xlu0 %v7862_v1 }
 0x92f   : > { %v3907_v30 = vpop.f32.mrf.mxu2 }
 0x930   : > { %v3908_v45 = vadd.f32 %v3907_v30, %v3859_v23  ;;  %v3811_v41 = vpop.f32.mrf.mxu0  ;;  %v3860_v10 = vpop.f32.mrf.mxu1 }
 0x931   : > { %v3812_v42 = vadd.f32 %v7798_v5, %v3811_v41 }
 0x932   : > { %v3957_v62 = vadd.f32 %v3956_v48, %v3908_v45 }
 0x933   : > { %v3861_v35 = vadd.f32 %v3860_v10, %v3812_v42 }
 0x934   : > { %v7867_v11 = vadd.f32 %v5489_v44, %v3957_v62 }
 0x936   : > { %4008 = vadd.xlane.f32.xlu1 %v7867_v11 }
 0x937   : > { %v3909_v47 = vpop.f32.mrf.mxu2 }
 0x938   : > { %v3910_v15 = vadd.f32 %v3909_v47, %v3861_v35 }
 0x93a   : > { %v3959_v56 = vadd.f32 %v3958_v12, %v3910_v15 }
 0x93c   : > { %v7871_v50 = vadd.f32 %v5490_v20, %v3959_v56 }
 0x93e   : > { %4010 = vadd.xlane.f32.xlu2 %v7871_v50 }
 0x944   : > { %v3814_v29 = vpop.f32.mrf.mxu0  ;;  %v3863_v54 = vpop.f32.mrf.mxu1 }
 0x945   : > { %v3815_v63 = vadd.f32 %v7798_v5, %v3814_v29 }
 0x947   : > { %v3864_v53 = vadd.f32 %v3863_v54, %v3815_v63 }
 0x94c   : > { %v3816_v22 = vpop.f32.mrf.mxu0  ;;  %v3865_v2 = vpop.f32.mrf.mxu1 }
 0x94d   : > { %v3817_v51 = vadd.f32 %v7798_v5, %v3816_v22 }
 0x94f   : > { %v3866_v8 = vadd.f32 %v3865_v2, %v3817_v51 }
 0x951   : > { %v3912_v40 = vpop.f32.mrf.mxu2  ;;  %v3961_v58 = vpop.f32.mrf.mxu3 }
 0x952   : > { %v3913_v60 = vadd.f32 %v3912_v40, %v3864_v53 }
 0x954   : > { %v3962_v3 = vadd.f32 %v3961_v58, %v3913_v60  ;;  %v3926_v27 = vpop.f32.mrf.mxu0 }
 0x955   : > { %v3927_v31 = vadd.f32 %v3926_v27, %v7809_v37 }
 0x956   : > { %v7878_v18 = vadd.f32 %v5491_v36, %v3962_v3 }
 0x957   : > { %v7881_v28 = vadd.f32 %v5492_v33, %v3927_v31 }
 0x958   : > { %4012 = vadd.xlane.f32.xlu0 %v7878_v18 }
 0x959   : > { %v3914_v4 = vpop.f32.mrf.mxu2  ;;  %3984 = vadd.xlane.f32.xlu1 %v7881_v28  ;;  %v3963_v13 = vpop.f32.mrf.mxu3 }
 0x95a   : > { %v3915_v5 = vadd.f32 %v3914_v4, %v3866_v8  ;;  %v3989_v34 = vpop.xlane.xlu0 %3988 }
 0x95b   : > { %v4018_v59 = vmul.f32 %v3989_v34, %v7173_v55 }
 0x95c   : > { %v3964_v57 = vadd.f32 %v3963_v13, %v3915_v5  ;;  %v3928_v37 = vpop.f32.mrf.mxu0 }
 0x95d   : > { %v3929_v49 = vadd.f32 %v3928_v37, %v7812_v25  ;;  %v7897_v46 = vsub.f32 %v7817_v16, %v4018_v59 }
 0x95e   : > { %v7887_v7 = vadd.f32 %v5493_v61, %v3964_v57 }
 0x95f   : > { %v7891_v43 = vadd.f32 %v5494_v24, %v3929_v49  ;;  %v4050_v26 = vmul.f32 %v7897_v46, %v7897_v46 }
 0x961   : > { %v3991_v17 = vpop.xlane.xlu1 %3990  ;;  %3986 = vadd.xlane.f32.xlu2 %v7891_v43  ;;  %4014 = vadd.xlane.f32.xlu1 %v7887_v7 }
 0x962   : > { %v4019_v32 = vmul.f32 %v3991_v17, %v7173_v55 }
 0x964   : > { %v7900_v25 = vsub.f32 %v7822_v21, %v4019_v32 }
 0x966   : > { %v4051_v6 = vmul.f32 %v7900_v25, %v7900_v25 }
 0x969   : > { %v3993_v23 = vpop.xlane.xlu2 %3992  ;;  %4070 = vadd.xlane.f32.xlu2 %v4051_v6  ;;  %4068 = vadd.xlane.f32.xlu1 %v4050_v26 }
 0x96a   : > { %v4020_v48 = vmul.f32 %v3993_v23, %v7173_v55 }
 0x96c   : > { %v7908_v30 = vsub.f32 %v7827_v9, %v4020_v48 }
 0x96e   : > { %v4052_v16 = vmul.f32 %v7908_v30, %v7908_v30 }
 0x970   : > { %4072 = vadd.xlane.f32.xlu0 %v4052_v16 }
 0x971   : > { %v3995_v21 = vpop.xlane.xlu0 %3994 }
 0x972   : > { %v4021_v45 = vmul.f32 %v3995_v21, %v7173_v55 }
 0x974   : > { %v7914_v41 = vsub.f32 %v7832_v52, %v4021_v45 }
 0x976   : > { %v4053_v62 = vmul.f32 %v7914_v41, %v7914_v41 }
 0x978   : > { %4074 = vadd.xlane.f32.xlu1 %v4053_v62 }
 0x979   : > { %v3997_v42 = vpop.xlane.xlu1 %3996 }
 0x97a   : > { %v4022_v44 = vmul.f32 %v3997_v42, %v7173_v55 }
 0x97c   : > { %v7920_v9 = vsub.f32 %v7837_v39, %v4022_v44 }
 0x97e   : > { %v4054_v10 = vmul.f32 %v7920_v9, %v7920_v9 }
 0x980   : > { %4076 = vadd.xlane.f32.xlu2 %v4054_v10 }
 0x981   : > { %v3999_v35 = vpop.xlane.xlu2 %3998 }
 0x982   : > { %v4023_v47 = vmul.f32 %v3999_v35, %v7173_v55 }
 0x984   : > { %v7926_v52 = vsub.f32 %v7842_v14, %v4023_v47 }
 0x986   : > { %v4055_v15 = vmul.f32 %v7926_v52, %v7926_v52 }
 0x988   : > { %4078 = vadd.xlane.f32.xlu0 %v4055_v15 }
 0x989   : > { %v4001_v12 = vpop.xlane.xlu0 %4000 }
 0x98a   : > { %v4024_v56 = vmul.f32 %v4001_v12, %v7173_v55 }
 0x98c   : > { %v7932_v39 = vsub.f32 %v7847_v19, %v4024_v56 }
 0x98e   : > { %v4056_v20 = vmul.f32 %v7932_v39, %v7932_v39 }
 0x990   : > { %4080 = vadd.xlane.f32.xlu1 %v4056_v20 }
 0x991   : > { %v4003_v29 = vpop.xlane.xlu1 %4002 }
 0x992   : > { %v4025_v63 = vmul.f32 %v4003_v29, %v7173_v55 }
 0x994   : > { %v7938_v14 = vsub.f32 %v7852_v38, %v4025_v63 }
 0x996   : > { %v4057_v22 = vmul.f32 %v7938_v14, %v7938_v14 }
 0x998   : > { %4082 = vadd.xlane.f32.xlu2 %v4057_v22 }
 0x999   : > { %v4005_v54 = vpop.xlane.xlu2 %4004 }
 0x99a   : > { %v4026_v53 = vmul.f32 %v4005_v54, %v7173_v55 }
 0x99c   : > { %v7944_v19 = vsub.f32 %v7857_v0, %v4026_v53 }
 0x99e   : > { %v4058_v40 = vmul.f32 %v7944_v19, %v7944_v19 }
 0x9a0   : > { %4084 = vadd.xlane.f32.xlu0 %v4058_v40  ;;  %v7998_v40 = vld [vmem:[%s8130_s11] ss:$0 sm:$0xff] }
 0x9a1   : > { %v4007_v58 = vpop.xlane.xlu0 %4006 }
 0x9a2   : > { %v4027_v60 = vmul.f32 %v4007_v58, %v7173_v55 }
 0x9a4   : > { %v7950_v38 = vsub.f32 %v7862_v1, %v4027_v60 }
 0x9a6   : > { %v4059_v51 = vmul.f32 %v7950_v38, %v7950_v38 }
 0x9a8   : > { %4086 = vadd.xlane.f32.xlu1 %v4059_v51 }
 0x9a9   : > { %v4009_v3 = vpop.xlane.xlu1 %4008 }
 0x9aa   : > { %v4028_v27 = vmul.f32 %v4009_v3, %v7173_v55  ;;  %v8003_v3 = vld [vmem:[%s8131_s12] ss:$0 sm:$0xff] }
 0x9ac   : > { %v7956_v0 = vsub.f32 %v7867_v11, %v4028_v27 }
 0x9ae   : > { %v4060_v31 = vmul.f32 %v7956_v0, %v7956_v0 }
 0x9b0   : > { %4088 = vadd.xlane.f32.xlu2 %v4060_v31 }
 0x9b1   : > { %v4011_v2 = vpop.xlane.xlu2 %4010 }
 0x9b2   : > { %v4029_v61 = vmul.f32 %v4011_v2, %v7173_v55 }
 0x9b4   : > { %v7986_v6 = vsub.f32 %v7871_v50, %v4029_v61 }
 0x9b6   : > { %v4061_v48 = vmul.f32 %v7986_v6, %v7986_v6 }
 0x9cb   : > { %v4013_v36 = vpop.xlane.xlu0 %4012 }
 0x9cc   : > { %v4030_v33 = vmul.f32 %v4013_v36, %v7173_v55  ;;  %v3985_v1 = vpop.xlane.xlu1 %3984 }
 0x9cd   : > { %v4016_v8 = vmul.f32 %v3985_v1, %v7173_v55 }
 0x9ce   : > { %v7963_v4 = vsub.f32 %v7878_v18, %v4030_v33 }
 0x9cf   : > { %v7966_v5 = vsub.f32 %v7881_v28, %v4016_v8 }
 0x9d0   : > { %v4062_v11 = vmul.f32 %v7963_v4, %v7963_v4 }
 0x9d1   : > { %v4048_v13 = vmul.f32 %v7966_v5, %v7966_v5 }
 0x9d2   : > { %4092 = vadd.xlane.f32.xlu1 %v4062_v11 }
 0x9d3   : > { %4064 = vadd.xlane.f32.xlu2 %v4048_v13 }
 0x9d4   : > { %v3987_v57 = vpop.xlane.xlu2 %3986  ;;  %v4015_v34 = vpop.xlane.xlu1 %4014 }
 0x9d5   : > { %v4017_v37 = vmul.f32 %v3987_v57, %v7173_v55  ;;  %v4031_v49 = vmul.f32 %v4015_v34, %v7173_v55 }
 0x9d7   : > { %v7975_v18 = vsub.f32 %v7891_v43, %v4017_v37  ;;  %v7978_v28 = vsub.f32 %v7887_v7, %v4031_v49 }
 0x9d9   : > { %v4063_v59 = vmul.f32 %v7978_v28, %v7978_v28  ;;  %v4049_v24 = vmul.f32 %v7975_v18, %v7975_v18 }
 0x9db   : > { %4094 = vadd.xlane.f32.xlu2 %v4063_v59  ;;  %4066 = vadd.xlane.f32.xlu0 %v4049_v24 }
 0x9dc   : > { %v4071_v17 = vpop.xlane.xlu2 %4070  ;;  %v4069_v32 = vpop.xlane.xlu1 %4068 }
 0x9dd   : > { %v4099_v43 = vmul.f32 %v4071_v17, %v7173_v55  ;;  %v4098_v7 = vmul.f32 %v4069_v32, %v7173_v55 }
 0x9df   : > { %v4115_v26 = vadd.f32 1e-05, %v4099_v43  ;;  %v4114_v23 = vadd.f32 1e-05, %v4098_v7 }
 0x9e1   : > { %5431 = vrsqrt.f32 %v4115_v26  ;;  %vm4164_vm6 = vweird.f32 %v4115_v26  ;;  %vm4154_vm8 = vweird.f32 %v4114_v23 }
 0x9e2   : > { %5433 = vrsqrt.f32 %v4114_v23 }
 0x9e3   : > { %v4073_v16 = vpop.xlane.xlu0 %4072  ;;  %4090 = vadd.xlane.f32.xlu0 %v4061_v48 }
 0x9e4   : > { %v4100_v21 = vmul.f32 %v4073_v16, %v7173_v55 }
 0x9e6   : > { %v4116_v45 = vadd.f32 1e-05, %v4100_v21 }
 0x9e7   : > { %v5432_v62 = vpop.eup %5431 }
 0x9e8   : > { %v5434_v42 = vpop.eup %5433  ;;  %v4159_v50 = vmul.f32 %v5432_v62, %v4115_v26  ;;  %5435 = vrsqrt.f32 %v4116_v45  ;;  %vm4165_vm4 = vweird.f32 %v5432_v62  ;;  %vm4174_vm11 = vweird.f32 %v4116_v45 }
 0x9e9   : > { %v4149_v44 = vmul.f32 %v5434_v42, %v4114_v23  ;;  %vm4155_vm5 = vweird.f32 %v5434_v42  ;;  %vm4166_vm7 = vmor %vm4164_vm6, %vm4165_vm4 }
 0x9ea   : > { %v4160_v10 = vmul.f32 %v5432_v62, %v4159_v50  ;;  %vm4156_vm9 = vmor %vm4154_vm8, %vm4155_vm5 }
 0x9eb   : > { %v4150_v35 = vmul.f32 %v5434_v42, %v4149_v44  ;;  %v4075_v47 = vpop.xlane.xlu1 %4074 }
 0x9ec   : > { %v4161_v15 = vmul.f32 0.5, %v4160_v10  ;;  %v4101_v12 = vmul.f32 %v4075_v47, %v7173_v55 }
 0x9ed   : > { %v4151_v56 = vmul.f32 0.5, %v4150_v35 }
 0x9ee   : > { %v5436_v20 = vpop.eup %5435  ;;  %v4162_v29 = vsub.f32 1.5, %v4161_v15  ;;  %v4117_v63 = vadd.f32 1e-05, %v4101_v12 }
 0x9ef   : > { %v4152_v22 = vsub.f32 1.5, %v4151_v56  ;;  %v4169_v54 = vmul.f32 %v5436_v20, %v4116_v45  ;;  %vm4175_vm10 = vweird.f32 %v5436_v20 }
 0x9f0   : > { %v4163_v53 = vmul.f32 %v5432_v62, %v4162_v29  ;;  %5437 = vrsqrt.f32 %v4117_v63  ;;  %vm4176_vm12 = vmor %vm4174_vm11, %vm4175_vm10  ;;  %vm4184_vm14 = vweird.f32 %v4117_v63 }
 0x9f1   : > { %v4153_v58 = vmul.f32 %v5434_v42, %v4152_v22  ;;  %v4170_v60 = vmul.f32 %v5436_v20, %v4169_v54 }
 0x9f2   : > { %v4167_v51 = vsel %vm4166_vm7, %v5432_v62, %v4163_v53 }
 0x9f3   : > { %v4291_v27 = vmul.f32 %v4167_v51, %v7900_v25  ;;  %v4157_v31 = vsel %vm4156_vm9, %v5434_v42, %v4153_v58  ;;  %v4171_v36 = vmul.f32 0.5, %v4170_v60  ;;  %v4077_v2 = vpop.xlane.xlu2 %4076 }
 0x9f4   : > { %v4290_v33 = vmul.f32 %v4157_v31, %v7897_v46  ;;  %v4102_v1 = vmul.f32 %v4077_v2, %v7173_v55 }
 0x9f5   : > { %v4310_v8 = vmul.f32 %v7998_v40, %v4291_v27  ;;  %v4172_v11 = vsub.f32 1.5, %v4171_v36 }
 0x9f6   : > { %v5438_v13 = vpop.eup %5437  ;;  %v4309_v57 = vmul.f32 %v7998_v40, %v4290_v33  ;;  %v4118_v34 = vadd.f32 1e-05, %v4102_v1 }
 0x9f7   : > { %v4329_v37 = vadd.f32 %v8003_v3, %v4310_v8  ;;  %v4173_v49 = vmul.f32 %v5436_v20, %v4172_v11  ;;  %v4179_v25 = vmul.f32 %v5438_v13, %v4117_v63  ;;  %vm4185_vm13 = vweird.f32 %v5438_v13 }
 0x9f8   : > { %v4328_v61 = vadd.f32 %v8003_v3, %v4309_v57  ;;  %5439 = vrsqrt.f32 %v4118_v34  ;;  %vm4186_vm15 = vmor %vm4184_vm14, %vm4185_vm13  ;;  %vm4194_vm2 = vweird.f32 %v4118_v34 }
 0x9f9   : > { %4345 = vst [vmem:[%s8014_s30 + $0x18] sm:$0xff] %v4329_v37  ;;  %v4177_v46 = vsel %vm4176_vm12, %v5436_v20, %v4173_v49  ;;  %v4180_v59 = vmul.f32 %v5438_v13, %v4179_v25 }
 0x9fa   : > { %4344 = vst [vmem:[%s8014_s30 + $0x10] sm:$0xff] %v4328_v61  ;;  %v4292_v24 = vmul.f32 %v4177_v46, %v7908_v30 }
 0x9fb   : > { %v4181_v17 = vmul.f32 0.5, %v4180_v59  ;;  %v4079_v32 = vpop.xlane.xlu0 %4078 }
 0x9fc   : > { %v4311_v43 = vmul.f32 %v7998_v40, %v4292_v24  ;;  %v4103_v7 = vmul.f32 %v4079_v32, %v7173_v55 }
 0x9fd   : > { %v4182_v26 = vsub.f32 1.5, %v4181_v17 }
 0x9fe   : > { %v5440_v23 = vpop.eup %5439  ;;  %v4330_v48 = vadd.f32 %v8003_v3, %v4311_v43  ;;  %v4119_v16 = vadd.f32 1e-05, %v4103_v7 }
 0x9ff   : > { %v4183_v21 = vmul.f32 %v5438_v13, %v4182_v26  ;;  %v4189_v45 = vmul.f32 %v5440_v23, %v4118_v34  ;;  %vm4195_vm1 = vweird.f32 %v5440_v23 }
 0xa00   : > { %4346 = vst [vmem:[%s8014_s30 + $0x20] sm:$0xff] %v4330_v48  ;;  %5441 = vrsqrt.f32 %v4119_v16  ;;  %vm4196_vm3 = vmor %vm4194_vm2, %vm4195_vm1  ;;  %vm4204_vm4 = vweird.f32 %v4119_v16 }
 0xa01   : > { %v4187_v30 = vsel %vm4186_vm15, %v5438_v13, %v4183_v21  ;;  %v4190_v62 = vmul.f32 %v5440_v23, %v4189_v45 }
 0xa02   : > { %v4293_v42 = vmul.f32 %v4187_v30, %v7914_v41 }
 0xa03   : > { %v4191_v50 = vmul.f32 0.5, %v4190_v62  ;;  %v4081_v44 = vpop.xlane.xlu1 %4080 }
 0xa04   : > { %v4312_v10 = vmul.f32 %v7998_v40, %v4293_v42  ;;  %v4104_v35 = vmul.f32 %v4081_v44, %v7173_v55 }
 0xa05   : > { %v4192_v47 = vsub.f32 1.5, %v4191_v50 }
 0xa06   : > { %v5442_v15 = vpop.eup %5441  ;;  %v4331_v12 = vadd.f32 %v8003_v3, %v4312_v10  ;;  %v4120_v56 = vadd.f32 1e-05, %v4104_v35 }
 0xa07   : > { %v4193_v20 = vmul.f32 %v5440_v23, %v4192_v47  ;;  %v4199_v29 = vmul.f32 %v5442_v15, %v4119_v16  ;;  %vm4205_vm0 = vweird.f32 %v5442_v15 }
 0xa08   : > { %4347 = vst [vmem:[%s8014_s30 + $0x28] sm:$0xff] %v4331_v12  ;;  %5443 = vrsqrt.f32 %v4120_v56  ;;  %vm4206_vm5 = vmor %vm4204_vm4, %vm4205_vm0  ;;  %vm4214_vm7 = vweird.f32 %v4120_v56 }
 0xa09   : > { %v4197_v41 = vsel %vm4196_vm3, %v5440_v23, %v4193_v20  ;;  %v4200_v63 = vmul.f32 %v5442_v15, %v4199_v29 }
 0xa0a   : > { %v4294_v22 = vmul.f32 %v4197_v41, %v7920_v9 }
 0xa0b   : > { %v4201_v54 = vmul.f32 0.5, %v4200_v63  ;;  %v4083_v53 = vpop.xlane.xlu2 %4082 }
 0xa0c   : > { %v4313_v58 = vmul.f32 %v7998_v40, %v4294_v22  ;;  %v4105_v60 = vmul.f32 %v4083_v53, %v7173_v55 }
 0xa0d   : > { %v4202_v51 = vsub.f32 1.5, %v4201_v54 }
 0xa0e   : > { %v5444_v27 = vpop.eup %5443  ;;  %v4332_v31 = vadd.f32 %v8003_v3, %v4313_v58  ;;  %v4121_v36 = vadd.f32 1e-05, %v4105_v60 }
 0xa0f   : > { %v4203_v2 = vmul.f32 %v5442_v15, %v4202_v51  ;;  %v4209_v33 = vmul.f32 %v5444_v27, %v4120_v56  ;;  %vm4215_vm6 = vweird.f32 %v5444_v27 }
 0xa10   : > { %4348 = vst [vmem:[%s8014_s30 + $0x30] sm:$0xff] %v4332_v31  ;;  %5445 = vrsqrt.f32 %v4121_v36  ;;  %vm4216_vm8 = vmor %vm4214_vm7, %vm4215_vm6  ;;  %vm4224_vm10 = vweird.f32 %v4121_v36 }
 0xa11   : > { %v4207_v9 = vsel %vm4206_vm5, %v5442_v15, %v4203_v2  ;;  %v4210_v1 = vmul.f32 %v5444_v27, %v4209_v33 }
 0xa12   : > { %v4295_v8 = vmul.f32 %v4207_v9, %v7926_v52 }
 0xa13   : > { %v4211_v11 = vmul.f32 0.5, %v4210_v1  ;;  %v4085_v13 = vpop.xlane.xlu0 %4084 }
 0xa14   : > { %v4314_v57 = vmul.f32 %v7998_v40, %v4295_v8  ;;  %v4106_v34 = vmul.f32 %v4085_v13, %v7173_v55 }
 0xa15   : > { %v4212_v37 = vsub.f32 1.5, %v4211_v11 }
 0xa16   : > { %v5446_v49 = vpop.eup %5445  ;;  %v4333_v25 = vadd.f32 %v8003_v3, %v4314_v57  ;;  %v4122_v61 = vadd.f32 1e-05, %v4106_v34 }
 0xa17   : > { %v4213_v46 = vmul.f32 %v5444_v27, %v4212_v37  ;;  %v4219_v59 = vmul.f32 %v5446_v49, %v4121_v36  ;;  %vm4225_vm9 = vweird.f32 %v5446_v49 }
 0xa18   : > { %4349 = vst [vmem:[%s8014_s30 + $0x38] sm:$0xff] %v4333_v25  ;;  %5447 = vrsqrt.f32 %v4122_v61  ;;  %vm4226_vm11 = vmor %vm4224_vm10, %vm4225_vm9  ;;  %vm4234_vm13 = vweird.f32 %v4122_v61 }
 0xa19   : > { %v4217_v52 = vsel %vm4216_vm8, %v5444_v27, %v4213_v46  ;;  %v4220_v24 = vmul.f32 %v5446_v49, %v4219_v59 }
 0xa1a   : > { %v4296_v17 = vmul.f32 %v4217_v52, %v7932_v39 }
 0xa1b   : > { %v4221_v32 = vmul.f32 0.5, %v4220_v24  ;;  %v4087_v43 = vpop.xlane.xlu1 %4086 }
 0xa1c   : > { %v4315_v7 = vmul.f32 %v7998_v40, %v4296_v17  ;;  %v4107_v26 = vmul.f32 %v4087_v43, %v7173_v55 }
 0xa1d   : > { %v4222_v23 = vsub.f32 1.5, %v4221_v32 }
 0xa1e   : > { %v5448_v48 = vpop.eup %5447  ;;  %v4334_v16 = vadd.f32 %v8003_v3, %v4315_v7  ;;  %v4123_v21 = vadd.f32 1e-05, %v4107_v26 }
 0xa1f   : > { %v4223_v45 = vmul.f32 %v5446_v49, %v4222_v23  ;;  %v4229_v30 = vmul.f32 %v5448_v48, %v4122_v61  ;;  %vm4235_vm12 = vweird.f32 %v5448_v48 }
 0xa20   : > { %4350 = vst [vmem:[%s8014_s30 + $0x40] sm:$0xff] %v4334_v16  ;;  %5449 = vrsqrt.f32 %v4123_v21  ;;  %vm4236_vm14 = vmor %vm4234_vm13, %vm4235_vm12  ;;  %vm4244_vm1 = vweird.f32 %v4123_v21 }
 0xa21   : > { %v4227_v39 = vsel %vm4226_vm11, %v5446_v49, %v4223_v45  ;;  %v4230_v62 = vmul.f32 %v5448_v48, %v4229_v30 }
 0xa22   : > { %v4297_v42 = vmul.f32 %v4227_v39, %v7938_v14 }
 0xa23   : > { %v4231_v50 = vmul.f32 0.5, %v4230_v62  ;;  %v4089_v44 = vpop.xlane.xlu2 %4088 }
 0xa24   : > { %v4316_v10 = vmul.f32 %v7998_v40, %v4297_v42  ;;  %v4108_v35 = vmul.f32 %v4089_v44, %v7173_v55 }
 0xa25   : > { %v4232_v47 = vsub.f32 1.5, %v4231_v50 }
 0xa26   : > { %v5450_v15 = vpop.eup %5449  ;;  %v4335_v12 = vadd.f32 %v8003_v3, %v4316_v10  ;;  %v4124_v56 = vadd.f32 1e-05, %v4108_v35 }
 0xa27   : > { %v4233_v20 = vmul.f32 %v5448_v48, %v4232_v47  ;;  %v4239_v29 = vmul.f32 %v5450_v15, %v4123_v21  ;;  %vm4245_vm15 = vweird.f32 %v5450_v15 }
 0xa28   : > { %4351 = vst [vmem:[%s8014_s30 + $0x48] sm:$0xff] %v4335_v12  ;;  %5451 = vrsqrt.f32 %v4124_v56  ;;  %vm4246_vm2 = vmor %vm4244_vm1, %vm4245_vm15  ;;  %vm4254_vm0 = vweird.f32 %v4124_v56 }
 0xa29   : > { %v4237_v14 = vsel %vm4236_vm14, %v5448_v48, %v4233_v20  ;;  %v4240_v41 = vmul.f32 %v5450_v15, %v4239_v29 }
 0xa2a   : > { %v4298_v63 = vmul.f32 %v4237_v14, %v7944_v19 }
 0xa2b   : > { %v4241_v22 = vmul.f32 0.5, %v4240_v41 }
 0xa2c   : > { %v4317_v54 = vmul.f32 %v7998_v40, %v4298_v63 }
 0xa2d   : > { %v4242_v53 = vsub.f32 1.5, %v4241_v22 }
 0xa2e   : > { %v5452_v58 = vpop.eup %5451  ;;  %v4336_v60 = vadd.f32 %v8003_v3, %v4317_v54 }
 0xa2f   : > { %v4243_v51 = vmul.f32 %v5450_v15, %v4242_v53  ;;  %v4249_v27 = vmul.f32 %v5452_v58, %v4124_v56  ;;  %vm4255_vm3 = vweird.f32 %v5452_v58 }
 0xa30   : > { %4352 = vst [vmem:[%s8014_s30 + $0x50] sm:$0xff] %v4336_v60  ;;  %vm4256_vm4 = vmor %vm4254_vm0, %vm4255_vm3 }
 0xa31   : > { %v4247_v31 = vsel %vm4246_vm2, %v5450_v15, %v4243_v51  ;;  %v4250_v36 = vmul.f32 %v5452_v58, %v4249_v27 }
 0xa32   : > { %v4299_v2 = vmul.f32 %v4247_v31, %v7950_v38 }
 0xa33   : > { %v4251_v19 = vmul.f32 0.5, %v4250_v36 }
 0xa34   : > { %v4318_v33 = vmul.f32 %v7998_v40, %v4299_v2 }
 0xa35   : > { %v4252_v9 = vsub.f32 1.5, %v4251_v19 }
 0xa36   : > { %v4337_v1 = vadd.f32 %v8003_v3, %v4318_v33 }
 0xa37   : > { %v4253_v8 = vmul.f32 %v5452_v58, %v4252_v9 }
 0xa38   : > { %4353 = vst [vmem:[%s8014_s30 + $0x58] sm:$0xff] %v4337_v1 }
 0xa39   : > { %v4257_v11 = vsel %vm4256_vm4, %v5452_v58, %v4253_v8 }
 0xa3a   : > { %v4300_v13 = vmul.f32 %v4257_v11, %v7956_v0 }
 0xa3c   : > { %v4319_v57 = vmul.f32 %v7998_v40, %v4300_v13 }
 0xa3e   : > { %v4338_v34 = vadd.f32 %v8003_v3, %v4319_v57 }
 0xa40   : > { %4354 = vst [vmem:[%s8014_s30 + $0x60] sm:$0xff] %v4338_v34 }
 0xa45   : > { %v4093_v38 = vpop.xlane.xlu1 %4092 }
 0xa46   : > { %v4110_v37 = vmul.f32 %v4093_v38, %v7173_v55  ;;  %v4065_v49 = vpop.xlane.xlu2 %4064 }
 0xa47   : > { %v4096_v25 = vmul.f32 %v4065_v49, %v7173_v55 }
 0xa48   : > { %v4126_v61 = vadd.f32 1e-05, %v4110_v37 }
 0xa49   : > { %v4112_v46 = vadd.f32 1e-05, %v4096_v25 }
 0xa4a   : > { %5453 = vrsqrt.f32 %v4126_v61  ;;  %vm4274_vm7 = vweird.f32 %v4126_v61 }
 0xa4b   : > { %5455 = vrsqrt.f32 %v4112_v46  ;;  %vm4134_vm9 = vweird.f32 %v4112_v46 }
 0xa4e   : > { %v4095_v59 = vpop.xlane.xlu2 %4094  ;;  %v4067_v52 = vpop.xlane.xlu0 %4066 }
 0xa4f   : > { %v4111_v24 = vmul.f32 %v4095_v59, %v7173_v55  ;;  %v4097_v0 = vmul.f32 %v4067_v52, %v7173_v55 }
 0xa50   : > { %v5454_v17 = vpop.eup %5453 }
 0xa51   : > { %v5456_v32 = vpop.eup %5455  ;;  %v4269_v43 = vmul.f32 %v5454_v17, %v4126_v61  ;;  %v4127_v7 = vadd.f32 1e-05, %v4111_v24  ;;  %v4113_v26 = vadd.f32 1e-05, %v4097_v0  ;;  %vm4275_vm5 = vweird.f32 %v5454_v17 }
 0xa52   : > { %v4129_v23 = vmul.f32 %v5456_v32, %v4112_v46  ;;  %vm4135_vm6 = vweird.f32 %v5456_v32  ;;  %vm4276_vm8 = vmor %vm4274_vm7, %vm4275_vm5 }
 0xa53   : > { %v4270_v48 = vmul.f32 %v5454_v17, %v4269_v43  ;;  %5457 = vrsqrt.f32 %v4127_v7  ;;  %vm4136_vm10 = vmor %vm4134_vm9, %vm4135_vm6  ;;  %vm4284_vm13 = vweird.f32 %v4127_v7  ;;  %vm4144_vm15 = vweird.f32 %v4113_v26 }
 0xa54   : > { %v4130_v16 = vmul.f32 %v5456_v32, %v4129_v23  ;;  %5459 = vrsqrt.f32 %v4113_v26 }
 0xa55   : > { %v4271_v21 = vmul.f32 0.5, %v4270_v48 }
 0xa56   : > { %v4131_v45 = vmul.f32 0.5, %v4130_v16  ;;  %v4091_v30 = vpop.xlane.xlu0 %4090 }
 0xa57   : > { %v4272_v39 = vsub.f32 1.5, %v4271_v21  ;;  %v4109_v62 = vmul.f32 %v4091_v30, %v7173_v55 }
 0xa58   : > { %v4132_v42 = vsub.f32 1.5, %v4131_v45 }
 0xa59   : > { %v5458_v50 = vpop.eup %5457  ;;  %v4273_v44 = vmul.f32 %v5454_v17, %v4272_v39  ;;  %v4125_v10 = vadd.f32 1e-05, %v4109_v62 }
 0xa5a   : > { %v5460_v35 = vpop.eup %5459  ;;  %v4133_v47 = vmul.f32 %v5456_v32, %v4132_v42  ;;  %v4279_v15 = vmul.f32 %v5458_v50, %v4127_v7  ;;  %vm4285_vm11 = vweird.f32 %v5458_v50 }
 0xa5b   : > { %v4277_v12 = vsel %vm4276_vm8, %v5454_v17, %v4273_v44  ;;  %v4139_v56 = vmul.f32 %v5460_v35, %v4113_v26  ;;  %5461 = vrsqrt.f32 %v4125_v10  ;;  %vm4145_vm12 = vweird.f32 %v5460_v35  ;;  %vm4286_vm14 = vmor %vm4284_vm13, %vm4285_vm11 }
 0xa5c   : > { %v4302_v20 = vmul.f32 %v4277_v12, %v7963_v4  ;;  %v4137_v29 = vsel %vm4136_vm10, %v5456_v32, %v4133_v47  ;;  %v4280_v55 = vmul.f32 %v5458_v50, %v4279_v15  ;;  %vm4146_vm1 = vmor %vm4144_vm15, %vm4145_vm12  ;;  %vm4264_vm3 = vweird.f32 %v4125_v10 }
 0xa5d   : > { %v4288_v14 = vmul.f32 %v4137_v29, %v7966_v5  ;;  %v4140_v41 = vmul.f32 %v5460_v35, %v4139_v56 }
 0xa5e   : > { %v4321_v63 = vmul.f32 %v7998_v40, %v4302_v20  ;;  %v4281_v22 = vmul.f32 0.5, %v4280_v55 }
 0xa5f   : > { %v4307_v54 = vmul.f32 %v7998_v40, %v4288_v14  ;;  %v4141_v53 = vmul.f32 0.5, %v4140_v41 }
 0xa60   : > { %v4340_v58 = vadd.f32 %v8003_v3, %v4321_v63  ;;  %v4282_v60 = vsub.f32 1.5, %v4281_v22 }
 0xa61   : > { %v5462_v51 = vpop.eup %5461  ;;  %v4326_v4 = vadd.f32 %v8003_v3, %v4307_v54  ;;  %v4142_v27 = vsub.f32 1.5, %v4141_v53 }
 0xa62   : > { %4356 = vst [vmem:[%s8014_s30 + $0x70] sm:$0xff] %v4340_v58  ;;  %v4283_v5 = vmul.f32 %v5458_v50, %v4282_v60  ;;  %v4259_v31 = vmul.f32 %v5462_v51, %v4125_v10  ;;  %vm4265_vm2 = vweird.f32 %v5462_v51 }
 0xa63   : > { %4342 = vst [vmem:[%s8014_s30] sm:$0xff] %v4326_v4  ;;  %v4143_v36 = vmul.f32 %v5460_v35, %v4142_v27  ;;  %vm4266_vm0 = vmor %vm4264_vm3, %vm4265_vm2 }
 0xa64   : > { %v4287_v2 = vsel %vm4286_vm14, %v5458_v50, %v4283_v5  ;;  %v4260_v19 = vmul.f32 %v5462_v51, %v4259_v31 }
 0xa65   : > { %v4303_v33 = vmul.f32 %v4287_v2, %v7978_v28  ;;  %v4147_v9 = vsel %vm4146_vm1, %v5460_v35, %v4143_v36 }
 0xa66   : > { %v4289_v1 = vmul.f32 %v4147_v9, %v7975_v18  ;;  %v4261_v8 = vmul.f32 0.5, %v4260_v19 }
 0xa67   : > { %v4322_v11 = vmul.f32 %v7998_v40, %v4303_v33 }
 0xa68   : > { %v4308_v13 = vmul.f32 %v7998_v40, %v4289_v1  ;;  %v4262_v57 = vsub.f32 1.5, %v4261_v8 }
 0xa69   : > { %v4341_v34 = vadd.f32 %v8003_v3, %v4322_v11 }
 0xa6a   : > { %v4327_v38 = vadd.f32 %v8003_v3, %v4308_v13  ;;  %v4263_v28 = vmul.f32 %v5462_v51, %v4262_v57 }
 0xa6b   : > { %4357 = vst [vmem:[%s8014_s30 + $0x78] sm:$0xff] %v4341_v34 }
 0xa6c   : > { %4343 = vst [vmem:[%s8014_s30 + $0x8] sm:$0xff] %v4327_v38  ;;  %v4267_v18 = vsel %vm4266_vm0, %v5462_v51, %v4263_v28 }
 0xa6d   : > { %v4301_v37 = vmul.f32 %v4267_v18, %v7986_v6 }
 0xa6f   : > { %v4320_v49 = vmul.f32 %v7998_v40, %v4301_v37 }
 0xa71   : > { %v4339_v25 = vadd.f32 %v8003_v3, %v4320_v49 }
 0xa73   : > { %4355 = vst [vmem:[%s8014_s30 + $0x68] sm:$0xff] %v4339_v25 }
 0xa74   : > { %5522 = shalt.err (!%p5519_p3)
}
 0xa75   : > { %s5564_s24 = smov 128   ;;  %s5565_s30 = smov 8  }
 0xa76   : > { %4970 = dma.vmem_to_hbm [thread:$0]  (%p5674_p5), %s4372_s29, 2048, %s4374_s21, %s4359_s15, %s5564_s24, %s5564_s24, %s5565_s30  }
 0xa77 PF: > { %p4976_p4 = scmp.ge.s32.totalorder %s5557_s28, 2  ;;  %s4388_s23 = sand.u32 1, %s5545_s25  }
 0xa78   : > { %s4389_s20 = scalar_lea.sflag [#allocation3], %s4388_s23 }
 0xa79   : > { %p4973_p7 = pnand %p4976_p4, %p5678_p6 }
 0xa7b   : > { %p4974_p8 = pneg %p4973_p7 }
 0xa7d   : > { %5540 = dma.done.wait (%p4974_p8), %s4389_s20, 2048  }
 0xa7e   : > { %5542 = vsyncadd (%p4974_p8), %s4389_s20, 4294965248  ;;  %s8203_s28 = sld [smem:[#allocation6_spill]]  ;;  %s8206_s25 = smov %s5549_s26 }
 0xa7f   : > { %s8204_s14 = sld [smem:[#allocation5_spill]] }
 0xa80   : > { %s8205_s27 = sld [smem:[#allocation7_spill]] }
 0xa84   : > { %p23_p9 = scmp.ge.s32.totalorder %s8203_s28, 4  }
 0xa85   : > { %s8207_s26 = smov %s8204_s14 }
 0xa86   :  { %25 = sbr.rel (!%p23_p9) target bundleno = 3 (0x3), region = 107 }
 0xa8b   :  { %4395 = vsyncpa [#allocation3], 1 }
 0xa8c   :  { %4397 = vsyncpa [#allocation3 + $0x1], 1 }

</bundles_post_ra>
